<compile_context>
chip_gen: v7x
topology: tpu7x:2x2x1
jax: 0.10.0
libtpu: 0.0.40
codegen_flags: <defaults>
</compile_context>

<pallas_src>
import functools

import jax
import jax.numpy as jnp
from jax.experimental import pallas as pl
from jax.experimental.pallas import tpu as pltpu


def _round_up(x, m):
    return (x + m - 1) // m * m


# ----------------------------- Pallas kernels ------------------------------

def _conv_pool_kernel(p_ref, w_ref, b_ref, o_ref):
    """conv-as-matmul + bias + ReLU + 2x2 max-pool.

    p_ref : (4, TM, Kp) bf16  im2col patches, one leading chunk per pool
            sub-position (di, dj); rows within a chunk are (n, ip, jp).
    w_ref : (Kp, 128)  bf16   zero-padded flattened conv weight
    b_ref : (1, 128)   f32    zero-padded bias
    o_ref : (TM, 128)  bf16   pooled output rows (n, ip, jp)
    """
    w = w_ref[...]
    b = b_ref[...]

    def branch(k):
        y = jnp.dot(p_ref[k], w, preferred_element_type=jnp.float32)
        return jnp.maximum(y + b, 0.0)          # ReLU before max == max then ReLU

    pooled = jnp.maximum(jnp.maximum(branch(0), branch(1)),
                         jnp.maximum(branch(2), branch(3)))
    o_ref[...] = pooled.astype(o_ref.dtype)


def _tail_kernel(p_ref, w2_ref, b2_ref, wf1_ref, bf1_ref, wf2_ref, bf2_ref,
                 wf3_ref, bf3_ref, o_ref, *, batch, out_rows):
    """Fused conv2 + bias + ReLU + pool + fc1 + ReLU + fc2 + ReLU + fc3.

    p_ref  : (4, 25*batch, 256) bf16  conv2 im2col patches, chunk = pool
             sub-position, rows ordered (spatial position p, image n)
    w2_ref : (256, 16) bf16 ; b2_ref : (1, 16) f32
    wf1_ref: (25, 16, 128) bf16  fc1 weight regrouped per spatial position
    wf2/wf3: (128, 128) bf16 ;   biases (1, 128) f32 (zero padded)
    o_ref  : (out_rows, 128) f32  rows >= batch and lanes >= 10 are zero
    """
    w2 = w2_ref[...]
    b2 = b2_ref[...]

    def branch(k):
        y = jnp.dot(p_ref[k], w2, preferred_element_type=jnp.float32)
        return jnp.maximum(y + b2, 0.0)

    # (25*batch, 16) f32, rows ordered (position p, image n)
    pooled = jnp.maximum(jnp.maximum(branch(0), branch(1)),
                         jnp.maximum(branch(2), branch(3)))

    # fc1 as a sum over the 25 spatial positions: avoids any in-kernel
    # sublane->lane flatten; the flatten/permute lives in the weight prep.
    acc = jnp.zeros((batch, 128), jnp.float32)
    for p in range(25):
        lhs = pooled[p * batch:(p + 1) * batch, :].astype(jnp.bfloat16)  # (batch, 16)
        acc = acc + jnp.dot(lhs, wf1_ref[p], preferred_element_type=jnp.float32)
    h1 = jnp.maximum(acc + bf1_ref[...], 0.0).astype(jnp.bfloat16)       # (batch, 128)

    h2 = jnp.maximum(
        jnp.dot(h1, wf2_ref[...], preferred_element_type=jnp.float32) + bf2_ref[...],
        0.0).astype(jnp.bfloat16)                                        # (batch, 128)

    y = jnp.dot(h2, wf3_ref[...], preferred_element_type=jnp.float32) + bf3_ref[...]
    if out_rows > batch:                         # pad rows -> full (8,128) store
        y = jnp.concatenate(
            [y, jnp.zeros((out_rows - batch, 128), jnp.float32)], axis=0)
    o_ref[...] = y


def _full_spec(shape):
    nd = len(shape)
    return pl.BlockSpec(shape, lambda *_args, _nd=nd: (0,) * _nd)


def _conv_pool_call(patches, w, b, tm):
    """patches: (4, Mp, Kp) bf16 with Mp % tm == 0. Returns (Mp, 128) bf16."""
    _, mp, kp = patches.shape
    grid_m = mp // tm
    return pl.pallas_call(
        _conv_pool_kernel,
        out_shape=jax.ShapeDtypeStruct((mp, 128), jnp.bfloat16),
        grid=(grid_m,),
        in_specs=[pl.BlockSpec((4, tm, kp), lambda i: (0, i, 0)),
                  pl.BlockSpec((kp, 128), lambda i: (0, 0)),
                  pl.BlockSpec((1, 128), lambda i: (0, 0))],
        out_specs=pl.BlockSpec((tm, 128), lambda i: (i, 0)),
        compiler_params=pltpu.CompilerParams(
            dimension_semantics=("parallel",)),   # shards across v7x TensorCores
    )(patches, w, b)


def _tail_call(patches2, prep, batch, out_rows):
    inputs = [patches2, prep["w2"], prep["b2"], prep["wf1"], prep["bf1"],
              prep["wf2"], prep["bf2"], prep["wf3"], prep["bf3"]]
    return pl.pallas_call(
        functools.partial(_tail_kernel, batch=batch, out_rows=out_rows),
        out_shape=jax.ShapeDtypeStruct((out_rows, 128), jnp.float32),
        grid=(1,),
        in_specs=[_full_spec(a.shape) for a in inputs],
        out_specs=_full_spec((out_rows, 128)),
        compiler_params=pltpu.CompilerParams(
            dimension_semantics=("arbitrary",)),
    )(*inputs)


# ------------------------------ JAX-side glue -------------------------------

def _conv1_patches(x, n, tm):
    """x: (N,32,32,3) bf16 -> (4, Mp, 128) bf16 im2col patches.

    Chunk c = pool sub-position (di,dj); chunk rows ordered (n, ip, jp),
    K ordered (ki, kj, ci) and zero-padded 75 -> 128. Single copy (no 4x
    duplicated HBM matrices), single DMA, single matmul per chunk.
    """
    chunks = []
    for di in range(2):
        for dj in range(2):
            cols = []
            for ki in range(5):
                for kj in range(5):
                    cols.append(x[:, di + ki: di + ki + 28: 2,
                                  dj + kj: dj + kj + 28: 2, :])   # (N,14,14,3)
            c = jnp.stack(cols, axis=3).reshape(n * 196, 75)
            chunks.append(c)
    p = jnp.stack(chunks, axis=0)                                  # (4, N*196, 75)
    m = n * 196
    mp = _round_up(m, tm)
    p = jnp.pad(p, ((0, 0), (0, mp - m), (0, 128 - 75)))
    return p, m


def _conv2_patches(a, n):
    """a: (N,14,14,6) bf16 -> (4, 25*N, 256) bf16 conv2 im2col patches.

    Chunk = pool sub-position; rows ordered (spatial position p=h*5+w, image n)
    so kernel B's fc1 can consume pooled rows by contiguous slices; K ordered
    (ki, kj, ci), zero-padded 150 -> 256.
    """
    chunks = []
    for di in range(2):
        for dj in range(2):
            rows = []
            for h in range(5):
                for w in range(5):
                    i0, j0 = 2 * h + di, 2 * w + dj
                    rows.append(a[:, i0:i0 + 5, j0:j0 + 5, :].reshape(n, 150))
            chunks.append(jnp.stack(rows, axis=0).reshape(25 * n, 150))
    p = jnp.stack(chunks, axis=0)                                  # (4, 25N, 150)
    return jnp.pad(p, ((0, 0), (0, 0), (0, 256 - 150)))


def init_params(key):
    """Deterministic synthetic parameters (PyTorch-default-style uniform init)."""
    ks = jax.random.split(key, 10)

    def u(k, shape, fan_in):
        bound = 1.0 / jnp.sqrt(jnp.float32(fan_in))
        return jax.random.uniform(k, shape, jnp.float32, -bound, bound)

    return {
        "conv1_w": u(ks[0], (5, 5, 3, 6), 5 * 5 * 3),    # (KH, KW, Cin, Cout)
        "conv1_b": u(ks[1], (1, 6), 5 * 5 * 3),
        "conv2_w": u(ks[2], (5, 5, 6, 16), 5 * 5 * 6),
        "conv2_b": u(ks[3], (1, 16), 5 * 5 * 6),
        "fc1_w":   u(ks[4], (16 * 5 * 5, 120), 16 * 5 * 5),   # K ordered (c, h, w)
        "fc1_b":   u(ks[5], (1, 120), 16 * 5 * 5),
        "fc2_w":   u(ks[6], (120, 84), 120),
        "fc2_b":   u(ks[7], (1, 84), 120),
        "fc3_w":   u(ks[8], (84, 10), 84),
        "fc3_b":   u(ks[9], (1, 10), 84),
    }


def prepare_params(params):
    """One-time weight prep: flatten, zero-pad to lane multiples, permute fc1's
    K axis so the NHWC conv2 output feeds it directly, cast matmul operands to
    bf16 (biases stay f32)."""
    f32, bf16 = jnp.float32, jnp.bfloat16

    def pad2(a, rows, cols, dtype):
        r, c = a.shape
        return jnp.pad(a, ((0, rows - r), (0, cols - c))).astype(dtype)

    # fc1_w rows are ordered (c, h, w) per torch.flatten of NCHW; regroup as
    # (position p = h*5+w, c, feature) so no activation transpose is needed.
    wf1 = params["fc1_w"].reshape(16, 25, 120).transpose(1, 0, 2)   # (25,16,120)
    wf1 = jnp.pad(wf1, ((0, 0), (0, 0), (0, 128 - 120))).astype(bf16)

    return {
        "w1":  pad2(params["conv1_w"].reshape(75, 6), 128, 128, bf16),
        "b1":  pad2(params["conv1_b"], 1, 128, f32),
        "w2":  pad2(params["conv2_w"].reshape(150, 16), 256, 16, bf16),
        "b2":  params["conv2_b"].astype(f32),
        "wf1": wf1,
        "bf1": pad2(params["fc1_b"], 1, 128, f32),
        "wf2": pad2(params["fc2_w"], 128, 128, bf16),
        "bf2": pad2(params["fc2_b"], 1, 128, f32),
        "wf3": pad2(params["fc3_w"], 128, 128, bf16),
        "bf3": pad2(params["fc3_b"], 1, 128, f32),
    }


def net_forward(x_nchw, prep):
    n = x_nchw.shape[0]
    # NCHW (PyTorch convention) -> NHWC, bf16 operands for the MXU.
    x = jnp.transpose(x_nchw, (0, 2, 3, 1)).astype(jnp.bfloat16)

    # --- kernel A: conv1 + bias + ReLU + 2x2 maxpool ------------------------
    m1 = n * 14 * 14
    # tile over pooled rows: <= 512 rows/tile, and at least 2 programs so the
    # v7x megacore gets both TensorCores even at toy batch sizes.
    tm = min(512, _round_up((m1 + 1) // 2, 8))
    patches1, m1 = _conv1_patches(x, n, tm)
    pooled1 = _conv_pool_call(patches1, prep["w1"], prep["b1"], tm)  # (Mp,128) bf16
    a1 = pooled1[:m1, :6].reshape(n, 14, 14, 6)                      # (N,14,14,6)

    # --- kernel B: conv2 + bias + ReLU + pool + fc1 + fc2 + fc3 (fused) -----
    patches2 = _conv2_patches(a1, n)                                  # (4,25N,256)
    out_rows = max(8, _round_up(n, 8))
    y = _tail_call(patches2, prep, n, out_rows)                       # (out_rows,128)
    return y[:n, :10]


if __name__ == "__main__":
    key = jax.random.PRNGKey(0)
    kx, kp = jax.random.split(key)
    # CIFAR-10 geometry is forced by fc1 (16*5*5): 3x32x32 images; small batch.
    x = jax.random.normal(kx, (2, 3, 32, 32), jnp.float32)   # NCHW like PyTorch
    params = init_params(kp)
    prep = prepare_params(params)   # one-time weight prep (pad / permute / bf16)

    out = jax.jit(net_forward)(x, prep)
    out = jax.block_until_ready(out)
    assert out.shape == (2, 10) and out.dtype == jnp.float32
    print("KERNEL_OK")
</pallas_src>

<mosaic_0001>
module attributes {stable_mosaic.version = 11 : i64} {
  func.func @_conv_pool_kernel(%arg0: i32, %arg1: memref<4x200x128xbf16, #tpu.memory_space<vmem>>, %arg2: memref<128x128xbf16, #tpu.memory_space<vmem>>, %arg3: memref<1x128xf32, #tpu.memory_space<vmem>>, %arg4: memref<200x128xbf16, #tpu.memory_space<vmem>>) attributes {dimension_semantics = [#tpu.dimension_semantics<parallel>], iteration_bounds = array<i64: 2>, scalar_prefetch = 0 : i64, scratch_operands = 0 : i64, tpu.core_type = #tpu.core_type<tc>, window_params = [{transform_indices = @transform_0, window_bounds = array<i64: 4, 200, 128>}, {pipeline_mode = #tpu.pipeline_mode<synchronous>, transform_indices = @transform_1, window_bounds = array<i64: 128, 128>}, {pipeline_mode = #tpu.pipeline_mode<synchronous>, transform_indices = @transform_2, window_bounds = array<i64: 1, 128>}, {transform_indices = @transform_3, window_bounds = array<i64: 200, 128>}]} {
    %c0 = arith.constant 0 : index
    %c0_0 = arith.constant 0 : index
    %0 = vector.load %arg2[%c0, %c0_0] : memref<128x128xbf16, #tpu.memory_space<vmem>>, vector<128x128xbf16>
    %c0_1 = arith.constant 0 : index
    %c0_2 = arith.constant 0 : index
    %1 = vector.load %arg3[%c0_1, %c0_2] : memref<1x128xf32, #tpu.memory_space<vmem>>, vector<1x128xf32>
    %c0_3 = arith.constant 0 : index
    %c0_4 = arith.constant 0 : index
    %c0_5 = arith.constant 0 : index
    %2 = vector.load %arg1[%c0_3, %c0_4, %c0_5] : memref<4x200x128xbf16, #tpu.memory_space<vmem>>, vector<1x200x128xbf16>
    %3 = vector.shape_cast %2 : vector<1x200x128xbf16> to vector<200x128xbf16>
    %cst = arith.constant dense<0.000000e+00> : vector<200x128xf32>
    %4 = tpu.matmul %3, %0, %cst {dimension_numbers = #tpu.dot_dimension_numbers<[1], [0], [0], [1], [0, 0, 1, 1], [], []>} : vector<200x128xbf16>, vector<128x128xbf16>, vector<200x128xf32> -> vector<200x128xf32>
    %5 = vector.broadcast %1 : vector<1x128xf32> to vector<200x128xf32>
    %6 = arith.addf %4, %5 : vector<200x128xf32>
    %cst_6 = arith.constant 0.000000e+00 : f32
    %7 = vector.broadcast %cst_6 : f32 to vector<200x128xf32>
    %8 = arith.maximumf %6, %7 : vector<200x128xf32>
    %c1 = arith.constant 1 : index
    %c0_7 = arith.constant 0 : index
    %c0_8 = arith.constant 0 : index
    %9 = vector.load %arg1[%c1, %c0_7, %c0_8] : memref<4x200x128xbf16, #tpu.memory_space<vmem>>, vector<1x200x128xbf16>
    %10 = vector.shape_cast %9 : vector<1x200x128xbf16> to vector<200x128xbf16>
    %cst_9 = arith.constant dense<0.000000e+00> : vector<200x128xf32>
    %11 = tpu.matmul %10, %0, %cst_9 {dimension_numbers = #tpu.dot_dimension_numbers<[1], [0], [0], [1], [0, 0, 1, 1], [], []>} : vector<200x128xbf16>, vector<128x128xbf16>, vector<200x128xf32> -> vector<200x128xf32>
    %12 = vector.broadcast %1 : vector<1x128xf32> to vector<200x128xf32>
    %13 = arith.addf %11, %12 : vector<200x128xf32>
    %cst_10 = arith.constant 0.000000e+00 : f32
    %14 = vector.broadcast %cst_10 : f32 to vector<200x128xf32>
    %15 = arith.maximumf %13, %14 : vector<200x128xf32>
    %16 = arith.maximumf %8, %15 : vector<200x128xf32>
    %c2 = arith.constant 2 : index
    %c0_11 = arith.constant 0 : index
    %c0_12 = arith.constant 0 : index
    %17 = vector.load %arg1[%c2, %c0_11, %c0_12] : memref<4x200x128xbf16, #tpu.memory_space<vmem>>, vector<1x200x128xbf16>
    %18 = vector.shape_cast %17 : vector<1x200x128xbf16> to vector<200x128xbf16>
    %cst_13 = arith.constant dense<0.000000e+00> : vector<200x128xf32>
    %19 = tpu.matmul %18, %0, %cst_13 {dimension_numbers = #tpu.dot_dimension_numbers<[1], [0], [0], [1], [0, 0, 1, 1], [], []>} : vector<200x128xbf16>, vector<128x128xbf16>, vector<200x128xf32> -> vector<200x128xf32>
    %20 = vector.broadcast %1 : vector<1x128xf32> to vector<200x128xf32>
    %21 = arith.addf %19, %20 : vector<200x128xf32>
    %cst_14 = arith.constant 0.000000e+00 : f32
    %22 = vector.broadcast %cst_14 : f32 to vector<200x128xf32>
    %23 = arith.maximumf %21, %22 : vector<200x128xf32>
    %c3 = arith.constant 3 : index
    %c0_15 = arith.constant 0 : index
    %c0_16 = arith.constant 0 : index
    %24 = vector.load %arg1[%c3, %c0_15, %c0_16] : memref<4x200x128xbf16, #tpu.memory_space<vmem>>, vector<1x200x128xbf16>
    %25 = vector.shape_cast %24 : vector<1x200x128xbf16> to vector<200x128xbf16>
    %cst_17 = arith.constant dense<0.000000e+00> : vector<200x128xf32>
    %26 = tpu.matmul %25, %0, %cst_17 {dimension_numbers = #tpu.dot_dimension_numbers<[1], [0], [0], [1], [0, 0, 1, 1], [], []>} : vector<200x128xbf16>, vector<128x128xbf16>, vector<200x128xf32> -> vector<200x128xf32>
    %27 = vector.broadcast %1 : vector<1x128xf32> to vector<200x128xf32>
    %28 = arith.addf %26, %27 : vector<200x128xf32>
    %cst_18 = arith.constant 0.000000e+00 : f32
    %29 = vector.broadcast %cst_18 : f32 to vector<200x128xf32>
    %30 = arith.maximumf %28, %29 : vector<200x128xf32>
    %31 = arith.maximumf %23, %30 : vector<200x128xf32>
    %32 = arith.maximumf %16, %31 : vector<200x128xf32>
    %33 = arith.truncf %32 : vector<200x128xf32> to vector<200x128xbf16>
    %c0_19 = arith.constant 0 : index
    %c0_20 = arith.constant 0 : index
    %34 = vector.load %arg4[%c0_19, %c0_20] : memref<200x128xbf16, #tpu.memory_space<vmem>>, vector<200x128xbf16>
    tpu.vector_store %arg4[%c0_19, %c0_20], %33 {strides = array<i32>} : memref<200x128xbf16, #tpu.memory_space<vmem>>, vector<200x128xbf16>,
    return
  }
  func.func @transform_0(%arg0: i32) -> (i32, i32, i32) {
    %c0_i32 = arith.constant 0 : i32
    %c0_i32_0 = arith.constant 0 : i32
    %c0_i32_1 = arith.constant 0 : i32
    return %c0_i32, %arg0, %c0_i32_0 : i32, i32, i32
  }
  func.func @transform_1(%arg0: i32) -> (i32, i32) {
    %c0_i32 = arith.constant 0 : i32
    %c0_i32_0 = arith.constant 0 : i32
    %c0_i32_1 = arith.constant 0 : i32
    return %c0_i32, %c0_i32_0 : i32, i32
  }
  func.func @transform_2(%arg0: i32) -> (i32, i32) {
    %c0_i32 = arith.constant 0 : i32
    %c0_i32_0 = arith.constant 0 : i32
    %c0_i32_1 = arith.constant 0 : i32
    return %c0_i32, %c0_i32_0 : i32, i32
  }
  func.func @transform_3(%arg0: i32) -> (i32, i32) {
    %c0_i32 = arith.constant 0 : i32
    %c0_i32_0 = arith.constant 0 : i32
    return %arg0, %c0_i32 : i32, i32
  }
}

module attributes {stable_mosaic.version = 11 : i64} {
  func.func @_tail_kernel(%arg0: i32, %arg1: memref<4x50x256xbf16, #tpu.memory_space<vmem>>, %arg2: memref<256x16xbf16, #tpu.memory_space<vmem>>, %arg3: memref<1x16xf32, #tpu.memory_space<vmem>>, %arg4: memref<25x16x128xbf16, #tpu.memory_space<vmem>>, %arg5: memref<1x128xf32, #tpu.memory_space<vmem>>, %arg6: memref<128x128xbf16, #tpu.memory_space<vmem>>, %arg7: memref<1x128xf32, #tpu.memory_space<vmem>>, %arg8: memref<128x128xbf16, #tpu.memory_space<vmem>>, %arg9: memref<1x128xf32, #tpu.memory_space<vmem>>, %arg10: memref<8x128xf32, #tpu.memory_space<vmem>>) attributes {dimension_semantics = [#tpu.dimension_semantics<arbitrary>], iteration_bounds = array<i64: 1>, scalar_prefetch = 0 : i64, scratch_operands = 0 : i64, tpu.core_type = #tpu.core_type<tc>, window_params = [{pipeline_mode = #tpu.pipeline_mode<synchronous>, transform_indices = @transform_0, window_bounds = array<i64: 4, 50, 256>}, {pipeline_mode = #tpu.pipeline_mode<synchronous>, transform_indices = @transform_1, window_bounds = array<i64: 256, 16>}, {pipeline_mode = #tpu.pipeline_mode<synchronous>, transform_indices = @transform_2, window_bounds = array<i64: 1, 16>}, {pipeline_mode = #tpu.pipeline_mode<synchronous>, transform_indices = @transform_3, window_bounds = array<i64: 25, 16, 128>}, {pipeline_mode = #tpu.pipeline_mode<synchronous>, transform_indices = @transform_4, window_bounds = array<i64: 1, 128>}, {pipeline_mode = #tpu.pipeline_mode<synchronous>, transform_indices = @transform_5, window_bounds = array<i64: 128, 128>}, {pipeline_mode = #tpu.pipeline_mode<synchronous>, transform_indices = @transform_6, window_bounds = array<i64: 1, 128>}, {pipeline_mode = #tpu.pipeline_mode<synchronous>, transform_indices = @transform_7, window_bounds = array<i64: 128, 128>}, {pipeline_mode = #tpu.pipeline_mode<synchronous>, transform_indices = @transform_8, window_bounds = array<i64: 1, 128>}, {pipeline_mode = #tpu.pipeline_mode<synchronous>, transform_indices = @transform_9, window_bounds = array<i64: 8, 128>}]} {
    %c0 = arith.constant 0 : index
    %c0_0 = arith.constant 0 : index
    %0 = vector.load %arg2[%c0, %c0_0] : memref<256x16xbf16, #tpu.memory_space<vmem>>, vector<256x16xbf16>
    %c0_1 = arith.constant 0 : index
    %c0_2 = arith.constant 0 : index
    %1 = vector.load %arg3[%c0_1, %c0_2] : memref<1x16xf32, #tpu.memory_space<vmem>>, vector<1x16xf32>
    %c0_3 = arith.constant 0 : index
    %c0_4 = arith.constant 0 : index
    %c0_5 = arith.constant 0 : index
    %2 = vector.load %arg1[%c0_3, %c0_4, %c0_5] : memref<4x50x256xbf16, #tpu.memory_space<vmem>>, vector<1x50x256xbf16>
    %3 = vector.shape_cast %2 : vector<1x50x256xbf16> to vector<50x256xbf16>
    %cst = arith.constant dense<0.000000e+00> : vector<50x16xf32>
    %4 = tpu.matmul %3, %0, %cst {dimension_numbers = #tpu.dot_dimension_numbers<[1], [0], [0], [1], [0, 0, 1, 1], [], []>} : vector<50x256xbf16>, vector<256x16xbf16>, vector<50x16xf32> -> vector<50x16xf32>
    %5 = vector.broadcast %1 : vector<1x16xf32> to vector<50x16xf32>
    %6 = arith.addf %4, %5 : vector<50x16xf32>
    %cst_6 = arith.constant 0.000000e+00 : f32
    %7 = vector.broadcast %cst_6 : f32 to vector<50x16xf32>
    %8 = arith.maximumf %6, %7 : vector<50x16xf32>
    %c1 = arith.constant 1 : index
    %c0_7 = arith.constant 0 : index
    %c0_8 = arith.constant 0 : index
    %9 = vector.load %arg1[%c1, %c0_7, %c0_8] : memref<4x50x256xbf16, #tpu.memory_space<vmem>>, vector<1x50x256xbf16>
    %10 = vector.shape_cast %9 : vector<1x50x256xbf16> to vector<50x256xbf16>
    %cst_9 = arith.constant dense<0.000000e+00> : vector<50x16xf32>
    %11 = tpu.matmul %10, %0, %cst_9 {dimension_numbers = #tpu.dot_dimension_numbers<[1], [0], [0], [1], [0, 0, 1, 1], [], []>} : vector<50x256xbf16>, vector<256x16xbf16>, vector<50x16xf32> -> vector<50x16xf32>
    %12 = vector.broadcast %1 : vector<1x16xf32> to vector<50x16xf32>
    %13 = arith.addf %11, %12 : vector<50x16xf32>
    %cst_10 = arith.constant 0.000000e+00 : f32
    %14 = vector.broadcast %cst_10 : f32 to vector<50x16xf32>
    %15 = arith.maximumf %13, %14 : vector<50x16xf32>
    %16 = arith.maximumf %8, %15 : vector<50x16xf32>
    %c2 = arith.constant 2 : index
    %c0_11 = arith.constant 0 : index
    %c0_12 = arith.constant 0 : index
    %17 = vector.load %arg1[%c2, %c0_11, %c0_12] : memref<4x50x256xbf16, #tpu.memory_space<vmem>>, vector<1x50x256xbf16>
    %18 = vector.shape_cast %17 : vector<1x50x256xbf16> to vector<50x256xbf16>
    %cst_13 = arith.constant dense<0.000000e+00> : vector<50x16xf32>
    %19 = tpu.matmul %18, %0, %cst_13 {dimension_numbers = #tpu.dot_dimension_numbers<[1], [0], [0], [1], [0, 0, 1, 1], [], []>} : vector<50x256xbf16>, vector<256x16xbf16>, vector<50x16xf32> -> vector<50x16xf32>
    %20 = vector.broadcast %1 : vector<1x16xf32> to vector<50x16xf32>
    %21 = arith.addf %19, %20 : vector<50x16xf32>
    %cst_14 = arith.constant 0.000000e+00 : f32
    %22 = vector.broadcast %cst_14 : f32 to vector<50x16xf32>
    %23 = arith.maximumf %21, %22 : vector<50x16xf32>
    %c3 = arith.constant 3 : index
    %c0_15 = arith.constant 0 : index
    %c0_16 = arith.constant 0 : index
    %24 = vector.load %arg1[%c3, %c0_15, %c0_16] : memref<4x50x256xbf16, #tpu.memory_space<vmem>>, vector<1x50x256xbf16>
    %25 = vector.shape_cast %24 : vector<1x50x256xbf16> to vector<50x256xbf16>
    %cst_17 = arith.constant dense<0.000000e+00> : vector<50x16xf32>
    %26 = tpu.matmul %25, %0, %cst_17 {dimension_numbers = #tpu.dot_dimension_numbers<[1], [0], [0], [1], [0, 0, 1, 1], [], []>} : vector<50x256xbf16>, vector<256x16xbf16>, vector<50x16xf32> -> vector<50x16xf32>
    %27 = vector.broadcast %1 : vector<1x16xf32> to vector<50x16xf32>
    %28 = arith.addf %26, %27 : vector<50x16xf32>
    %cst_18 = arith.constant 0.000000e+00 : f32
    %29 = vector.broadcast %cst_18 : f32 to vector<50x16xf32>
    %30 = arith.maximumf %28, %29 : vector<50x16xf32>
    %31 = arith.maximumf %23, %30 : vector<50x16xf32>
    %32 = arith.maximumf %16, %31 : vector<50x16xf32>
    %cst_19 = arith.constant 0.000000e+00 : f32
    %33 = vector.broadcast %cst_19 : f32 to vector<2x128xf32>
    %34 = vector.extract_strided_slice %32 {offsets = [0, 0], sizes = [2, 16], strides = [1, 1]} : vector<50x16xf32> to vector<2x16xf32>
    %35 = arith.truncf %34 : vector<2x16xf32> to vector<2x16xbf16>
    %c0_20 = arith.constant 0 : index
    %c0_21 = arith.constant 0 : index
    %c0_22 = arith.constant 0 : index
    %36 = vector.load %arg4[%c0_20, %c0_21, %c0_22] : memref<25x16x128xbf16, #tpu.memory_space<vmem>>, vector<1x16x128xbf16>
    %37 = vector.shape_cast %36 : vector<1x16x128xbf16> to vector<16x128xbf16>
    %cst_23 = arith.constant dense<0.000000e+00> : vector<2x128xf32>
    %38 = tpu.matmul %35, %37, %cst_23 {dimension_numbers = #tpu.dot_dimension_numbers<[1], [0], [0], [1], [0, 0, 1, 1], [], []>} : vector<2x16xbf16>, vector<16x128xbf16>, vector<2x128xf32> -> vector<2x128xf32>
    %39 = arith.addf %33, %38 : vector<2x128xf32>
    %40 = vector.extract_strided_slice %32 {offsets = [2, 0], sizes = [2, 16], strides = [1, 1]} : vector<50x16xf32> to vector<2x16xf32>
    %41 = arith.truncf %40 : vector<2x16xf32> to vector<2x16xbf16>
    %c1_24 = arith.constant 1 : index
    %c0_25 = arith.constant 0 : index
    %c0_26 = arith.constant 0 : index
    %42 = vector.load %arg4[%c1_24, %c0_25, %c0_26] : memref<25x16x128xbf16, #tpu.memory_space<vmem>>, vector<1x16x128xbf16>
    %43 = vector.shape_cast %42 : vector<1x16x128xbf16> to vector<16x128xbf16>
    %cst_27 = arith.constant dense<0.000000e+00> : vector<2x128xf32>
    %44 = tpu.matmul %41, %43, %cst_27 {dimension_numbers = #tpu.dot_dimension_numbers<[1], [0], [0], [1], [0, 0, 1, 1], [], []>} : vector<2x16xbf16>, vector<16x128xbf16>, vector<2x128xf32> -> vector<2x128xf32>
    %45 = arith.addf %39, %44 : vector<2x128xf32>
    %46 = vector.extract_strided_slice %32 {offsets = [4, 0], sizes = [2, 16], strides = [1, 1]} : vector<50x16xf32> to vector<2x16xf32>
    %47 = arith.truncf %46 : vector<2x16xf32> to vector<2x16xbf16>
    %c2_28 = arith.constant 2 : index
    %c0_29 = arith.constant 0 : index
    %c0_30 = arith.constant 0 : index
    %48 = vector.load %arg4[%c2_28, %c0_29, %c0_30] : memref<25x16x128xbf16, #tpu.memory_space<vmem>>, vector<1x16x128xbf16>
    %49 = vector.shape_cast %48 : vector<1x16x128xbf16> to vector<16x128xbf16>
    %cst_31 = arith.constant dense<0.000000e+00> : vector<2x128xf32>
    %50 = tpu.matmul %47, %49, %cst_31 {dimension_numbers = #tpu.dot_dimension_numbers<[1], [0], [0], [1], [0, 0, 1, 1], [], []>} : vector<2x16xbf16>, vector<16x128xbf16>, vector<2x128xf32> -> vector<2x128xf32>
    %51 = arith.addf %45, %50 : vector<2x128xf32>
    %52 = vector.extract_strided_slice %32 {offsets = [6, 0], sizes = [2, 16], strides = [1, 1]} : vector<50x16xf32> to vector<2x16xf32>
    %53 = arith.truncf %52 : vector<2x16xf32> to vector<2x16xbf16>
    %c3_32 = arith.constant 3 : index
    %c0_33 = arith.constant 0 : index
    %c0_34 = arith.constant 0 : index
    %54 = vector.load %arg4[%c3_32, %c0_33, %c0_34] : memref<25x16x128xbf16, #tpu.memory_space<vmem>>, vector<1x16x128xbf16>
    %55 = vector.shape_cast %54 : vector<1x16x128xbf16> to vector<16x128xbf16>
    %cst_35 = arith.constant dense<0.000000e+00> : vector<2x128xf32>
    %56 = tpu.matmul %53, %55, %cst_35 {dimension_numbers = #tpu.dot_dimension_numbers<[1], [0], [0], [1], [0, 0, 1, 1], [], []>} : vector<2x16xbf16>, vector<16x128xbf16>, vector<2x128xf32> -> vector<2x128xf32>
    %57 = arith.addf %51, %56 : vector<2x128xf32>
    %58 = vector.extract_strided_slice %32 {offsets = [8, 0], sizes = [2, 16], strides = [1, 1]} : vector<50x16xf32> to vector<2x16xf32>
    %59 = arith.truncf %58 : vector<2x16xf32> to vector<2x16xbf16>
    %c4 = arith.constant 4 : index
    %c0_36 = arith.constant 0 : index
    %c0_37 = arith.constant 0 : index
    %60 = vector.load %arg4[%c4, %c0_36, %c0_37] : memref<25x16x128xbf16, #tpu.memory_space<vmem>>, vector<1x16x128xbf16>
    %61 = vector.shape_cast %60 : vector<1x16x128xbf16> to vector<16x128xbf16>
    %cst_38 = arith.constant dense<0.000000e+00> : vector<2x128xf32>
    %62 = tpu.matmul %59, %61, %cst_38 {dimension_numbers = #tpu.dot_dimension_numbers<[1], [0], [0], [1], [0, 0, 1, 1], [], []>} : vector<2x16xbf16>, vector<16x128xbf16>, vector<2x128xf32> -> vector<2x128xf32>
    %63 = arith.addf %57, %62 : vector<2x128xf32>
    %64 = vector.extract_strided_slice %32 {offsets = [10, 0], sizes = [2, 16], strides = [1, 1]} : vector<50x16xf32> to vector<2x16xf32>
    %65 = arith.truncf %64 : vector<2x16xf32> to vector<2x16xbf16>
    %c5 = arith.constant 5 : index
    %c0_39 = arith.constant 0 : index
    %c0_40 = arith.constant 0 : index
    %66 = vector.load %arg4[%c5, %c0_39, %c0_40] : memref<25x16x128xbf16, #tpu.memory_space<vmem>>, vector<1x16x128xbf16>
    %67 = vector.shape_cast %66 : vector<1x16x128xbf16> to vector<16x128xbf16>
    %cst_41 = arith.constant dense<0.000000e+00> : vector<2x128xf32>
    %68 = tpu.matmul %65, %67, %cst_41 {dimension_numbers = #tpu.dot_dimension_numbers<[1], [0], [0], [1], [0, 0, 1, 1], [], []>} : vector<2x16xbf16>, vector<16x128xbf16>, vector<2x128xf32> -> vector<2x128xf32>
    %69 = arith.addf %63, %68 : vector<2x128xf32>
    %70 = vector.extract_strided_slice %32 {offsets = [12, 0], sizes = [2, 16], strides = [1, 1]} : vector<50x16xf32> to vector<2x16xf32>
    %71 = arith.truncf %70 : vector<2x16xf32> to vector<2x16xbf16>
    %c6 = arith.constant 6 : index
    %c0_42 = arith.constant 0 : index
    %c0_43 = arith.constant 0 : index
    %72 = vector.load %arg4[%c6, %c0_42, %c0_43] : memref<25x16x128xbf16, #tpu.memory_space<vmem>>, vector<1x16x128xbf16>
    %73 = vector.shape_cast %72 : vector<1x16x128xbf16> to vector<16x128xbf16>
    %cst_44 = arith.constant dense<0.000000e+00> : vector<2x128xf32>
    %74 = tpu.matmul %71, %73, %cst_44 {dimension_numbers = #tpu.dot_dimension_numbers<[1], [0], [0], [1], [0, 0, 1, 1], [], []>} : vector<2x16xbf16>, vector<16x128xbf16>, vector<2x128xf32> -> vector<2x128xf32>
    %75 = arith.addf %69, %74 : vector<2x128xf32>
    %76 = vector.extract_strided_slice %32 {offsets = [14, 0], sizes = [2, 16], strides = [1, 1]} : vector<50x16xf32> to vector<2x16xf32>
    %77 = arith.truncf %76 : vector<2x16xf32> to vector<2x16xbf16>
    %c7 = arith.constant 7 : index
    %c0_45 = arith.constant 0 : index
    %c0_46 = arith.constant 0 : index
    %78 = vector.load %arg4[%c7, %c0_45, %c0_46] : memref<25x16x128xbf16, #tpu.memory_space<vmem>>, vector<1x16x128xbf16>
    %79 = vector.shape_cast %78 : vector<1x16x128xbf16> to vector<16x128xbf16>
    %cst_47 = arith.constant dense<0.000000e+00> : vector<2x128xf32>
    %80 = tpu.matmul %77, %79, %cst_47 {dimension_numbers = #tpu.dot_dimension_numbers<[1], [0], [0], [1], [0, 0, 1, 1], [], []>} : vector<2x16xbf16>, vector<16x128xbf16>, vector<2x128xf32> -> vector<2x128xf32>
    %81 = arith.addf %75, %80 : vector<2x128xf32>
    %82 = vector.extract_strided_slice %32 {offsets = [16, 0], sizes = [2, 16], strides = [1, 1]} : vector<50x16xf32> to vector<2x16xf32>
    %83 = arith.truncf %82 : vector<2x16xf32> to vector<2x16xbf16>
    %c8 = arith.constant 8 : index
    %c0_48 = arith.constant 0 : index
    %c0_49 = arith.constant 0 : index
    %84 = vector.load %arg4[%c8, %c0_48, %c0_49] : memref<25x16x128xbf16, #tpu.memory_space<vmem>>, vector<1x16x128xbf16>
    %85 = vector.shape_cast %84 : vector<1x16x128xbf16> to vector<16x128xbf16>
    %cst_50 = arith.constant dense<0.000000e+00> : vector<2x128xf32>
    %86 = tpu.matmul %83, %85, %cst_50 {dimension_numbers = #tpu.dot_dimension_numbers<[1], [0], [0], [1], [0, 0, 1, 1], [], []>} : vector<2x16xbf16>, vector<16x128xbf16>, vector<2x128xf32> -> vector<2x128xf32>
    %87 = arith.addf %81, %86 : vector<2x128xf32>
    %88 = vector.extract_strided_slice %32 {offsets = [18, 0], sizes = [2, 16], strides = [1, 1]} : vector<50x16xf32> to vector<2x16xf32>
    %89 = arith.truncf %88 : vector<2x16xf32> to vector<2x16xbf16>
    %c9 = arith.constant 9 : index
    %c0_51 = arith.constant 0 : index
    %c0_52 = arith.constant 0 : index
    %90 = vector.load %arg4[%c9, %c0_51, %c0_52] : memref<25x16x128xbf16, #tpu.memory_space<vmem>>, vector<1x16x128xbf16>
    %91 = vector.shape_cast %90 : vector<1x16x128xbf16> to vector<16x128xbf16>
    %cst_53 = arith.constant dense<0.000000e+00> : vector<2x128xf32>
    %92 = tpu.matmul %89, %91, %cst_53 {dimension_numbers = #tpu.dot_dimension_numbers<[1], [0], [0], [1], [0, 0, 1, 1], [], []>} : vector<2x16xbf16>, vector<16x128xbf16>, vector<2x128xf32> -> vector<2x128xf32>
    %93 = arith.addf %87, %92 : vector<2x128xf32>
    %94 = vector.extract_strided_slice %32 {offsets = [20, 0], sizes = [2, 16], strides = [1, 1]} : vector<50x16xf32> to vector<2x16xf32>
    %95 = arith.truncf %94 : vector<2x16xf32> to vector<2x16xbf16>
    %c10 = arith.constant 10 : index
    %c0_54 = arith.constant 0 : index
    %c0_55 = arith.constant 0 : index
    %96 = vector.load %arg4[%c10, %c0_54, %c0_55] : memref<25x16x128xbf16, #tpu.memory_space<vmem>>, vector<1x16x128xbf16>
    %97 = vector.shape_cast %96 : vector<1x16x128xbf16> to vector<16x128xbf16>
    %cst_56 = arith.constant dense<0.000000e+00> : vector<2x128xf32>
    %98 = tpu.matmul %95, %97, %cst_56 {dimension_numbers = #tpu.dot_dimension_numbers<[1], [0], [0], [1], [0, 0, 1, 1], [], []>} : vector<2x16xbf16>, vector<16x128xbf16>, vector<2x128xf32> -> vector<2x128xf32>
    %99 = arith.addf %93, %98 : vector<2x128xf32>
    %100 = vector.extract_strided_slice %32 {offsets = [22, 0], sizes = [2, 16], strides = [1, 1]} : vector<50x16xf32> to vector<2x16xf32>
    %101 = arith.truncf %100 : vector<2x16xf32> to vector<2x16xbf16>
    %c11 = arith.constant 11 : index
    %c0_57 = arith.constant 0 : index
    %c0_58 = arith.constant 0 : index
    %102 = vector.load %arg4[%c11, %c0_57, %c0_58] : memref<25x16x128xbf16, #tpu.memory_space<vmem>>, vector<1x16x128xbf16>
    %103 = vector.shape_cast %102 : vector<1x16x128xbf16> to vector<16x128xbf16>
    %cst_59 = arith.constant dense<0.000000e+00> : vector<2x128xf32>
    %104 = tpu.matmul %101, %103, %cst_59 {dimension_numbers = #tpu.dot_dimension_numbers<[1], [0], [0], [1], [0, 0, 1, 1], [], []>} : vector<2x16xbf16>, vector<16x128xbf16>, vector<2x128xf32> -> vector<2x128xf32>
    %105 = arith.addf %99, %104 : vector<2x128xf32>
    %106 = vector.extract_strided_slice %32 {offsets = [24, 0], sizes = [2, 16], strides = [1, 1]} : vector<50x16xf32> to vector<2x16xf32>
    %107 = arith.truncf %106 : vector<2x16xf32> to vector<2x16xbf16>
    %c12 = arith.constant 12 : index
    %c0_60 = arith.constant 0 : index
    %c0_61 = arith.constant 0 : index
    %108 = vector.load %arg4[%c12, %c0_60, %c0_61] : memref<25x16x128xbf16, #tpu.memory_space<vmem>>, vector<1x16x128xbf16>
    %109 = vector.shape_cast %108 : vector<1x16x128xbf16> to vector<16x128xbf16>
    %cst_62 = arith.constant dense<0.000000e+00> : vector<2x128xf32>
    %110 = tpu.matmul %107, %109, %cst_62 {dimension_numbers = #tpu.dot_dimension_numbers<[1], [0], [0], [1], [0, 0, 1, 1], [], []>} : vector<2x16xbf16>, vector<16x128xbf16>, vector<2x128xf32> -> vector<2x128xf32>
    %111 = arith.addf %105, %110 : vector<2x128xf32>
    %112 = vector.extract_strided_slice %32 {offsets = [26, 0], sizes = [2, 16], strides = [1, 1]} : vector<50x16xf32> to vector<2x16xf32>
    %113 = arith.truncf %112 : vector<2x16xf32> to vector<2x16xbf16>
    %c13 = arith.constant 13 : index
    %c0_63 = arith.constant 0 : index
    %c0_64 = arith.constant 0 : index
    %114 = vector.load %arg4[%c13, %c0_63, %c0_64] : memref<25x16x128xbf16, #tpu.memory_space<vmem>>, vector<1x16x128xbf16>
    %115 = vector.shape_cast %114 : vector<1x16x128xbf16> to vector<16x128xbf16>
    %cst_65 = arith.constant dense<0.000000e+00> : vector<2x128xf32>
    %116 = tpu.matmul %113, %115, %cst_65 {dimension_numbers = #tpu.dot_dimension_numbers<[1], [0], [0], [1], [0, 0, 1, 1], [], []>} : vector<2x16xbf16>, vector<16x128xbf16>, vector<2x128xf32> -> vector<2x128xf32>
    %117 = arith.addf %111, %116 : vector<2x128xf32>
    %118 = vector.extract_strided_slice %32 {offsets = [28, 0], sizes = [2, 16], strides = [1, 1]} : vector<50x16xf32> to vector<2x16xf32>
    %119 = arith.truncf %118 : vector<2x16xf32> to vector<2x16xbf16>
    %c14 = arith.constant 14 : index
    %c0_66 = arith.constant 0 : index
    %c0_67 = arith.constant 0 : index
    %120 = vector.load %arg4[%c14, %c0_66, %c0_67] : memref<25x16x128xbf16, #tpu.memory_space<vmem>>, vector<1x16x128xbf16>
    %121 = vector.shape_cast %120 : vector<1x16x128xbf16> to vector<16x128xbf16>
    %cst_68 = arith.constant dense<0.000000e+00> : vector<2x128xf32>
    %122 = tpu.matmul %119, %121, %cst_68 {dimension_numbers = #tpu.dot_dimension_numbers<[1], [0], [0], [1], [0, 0, 1, 1], [], []>} : vector<2x16xbf16>, vector<16x128xbf16>, vector<2x128xf32> -> vector<2x128xf32>
    %123 = arith.addf %117, %122 : vector<2x128xf32>
    %124 = vector.extract_strided_slice %32 {offsets = [30, 0], sizes = [2, 16], strides = [1, 1]} : vector<50x16xf32> to vector<2x16xf32>
    %125 = arith.truncf %124 : vector<2x16xf32> to vector<2x16xbf16>
    %c15 = arith.constant 15 : index
    %c0_69 = arith.constant 0 : index
    %c0_70 = arith.constant 0 : index
    %126 = vector.load %arg4[%c15, %c0_69, %c0_70] : memref<25x16x128xbf16, #tpu.memory_space<vmem>>, vector<1x16x128xbf16>
    %127 = vector.shape_cast %126 : vector<1x16x128xbf16> to vector<16x128xbf16>
    %cst_71 = arith.constant dense<0.000000e+00> : vector<2x128xf32>
    %128 = tpu.matmul %125, %127, %cst_71 {dimension_numbers = #tpu.dot_dimension_numbers<[1], [0], [0], [1], [0, 0, 1, 1], [], []>} : vector<2x16xbf16>, vector<16x128xbf16>, vector<2x128xf32> -> vector<2x128xf32>
    %129 = arith.addf %123, %128 : vector<2x128xf32>
    %130 = vector.extract_strided_slice %32 {offsets = [32, 0], sizes = [2, 16], strides = [1, 1]} : vector<50x16xf32> to vector<2x16xf32>
    %131 = arith.truncf %130 : vector<2x16xf32> to vector<2x16xbf16>
    %c16 = arith.constant 16 : index
    %c0_72 = arith.constant 0 : index
    %c0_73 = arith.constant 0 : index
    %132 = vector.load %arg4[%c16, %c0_72, %c0_73] : memref<25x16x128xbf16, #tpu.memory_space<vmem>>, vector<1x16x128xbf16>
    %133 = vector.shape_cast %132 : vector<1x16x128xbf16> to vector<16x128xbf16>
    %cst_74 = arith.constant dense<0.000000e+00> : vector<2x128xf32>
    %134 = tpu.matmul %131, %133, %cst_74 {dimension_numbers = #tpu.dot_dimension_numbers<[1], [0], [0], [1], [0, 0, 1, 1], [], []>} : vector<2x16xbf16>, vector<16x128xbf16>, vector<2x128xf32> -> vector<2x128xf32>
    %135 = arith.addf %129, %134 : vector<2x128xf32>
    %136 = vector.extract_strided_slice %32 {offsets = [34, 0], sizes = [2, 16], strides = [1, 1]} : vector<50x16xf32> to vector<2x16xf32>
    %137 = arith.truncf %136 : vector<2x16xf32> to vector<2x16xbf16>
    %c17 = arith.constant 17 : index
    %c0_75 = arith.constant 0 : index
    %c0_76 = arith.constant 0 : index
    %138 = vector.load %arg4[%c17, %c0_75, %c0_76] : memref<25x16x128xbf16, #tpu.memory_space<vmem>>, vector<1x16x128xbf16>
    %139 = vector.shape_cast %138 : vector<1x16x128xbf16> to vector<16x128xbf16>
    %cst_77 = arith.constant dense<0.000000e+00> : vector<2x128xf32>
    %140 = tpu.matmul %137, %139, %cst_77 {dimension_numbers = #tpu.dot_dimension_numbers<[1], [0], [0], [1], [0, 0, 1, 1], [], []>} : vector<2x16xbf16>, vector<16x128xbf16>, vector<2x128xf32> -> vector<2x128xf32>
    %141 = arith.addf %135, %140 : vector<2x128xf32>
    %142 = vector.extract_strided_slice %32 {offsets = [36, 0], sizes = [2, 16], strides = [1, 1]} : vector<50x16xf32> to vector<2x16xf32>
    %143 = arith.truncf %142 : vector<2x16xf32> to vector<2x16xbf16>
    %c18 = arith.constant 18 : index
    %c0_78 = arith.constant 0 : index
    %c0_79 = arith.constant 0 : index
    %144 = vector.load %arg4[%c18, %c0_78, %c0_79] : memref<25x16x128xbf16, #tpu.memory_space<vmem>>, vector<1x16x128xbf16>
    %145 = vector.shape_cast %144 : vector<1x16x128xbf16> to vector<16x128xbf16>
    %cst_80 = arith.constant dense<0.000000e+00> : vector<2x128xf32>
    %146 = tpu.matmul %143, %145, %cst_80 {dimension_numbers = #tpu.dot_dimension_numbers<[1], [0], [0], [1], [0, 0, 1, 1], [], []>} : vector<2x16xbf16>, vector<16x128xbf16>, vector<2x128xf32> -> vector<2x128xf32>
    %147 = arith.addf %141, %146 : vector<2x128xf32>
    %148 = vector.extract_strided_slice %32 {offsets = [38, 0], sizes = [2, 16], strides = [1, 1]} : vector<50x16xf32> to vector<2x16xf32>
    %149 = arith.truncf %148 : vector<2x16xf32> to vector<2x16xbf16>
    %c19 = arith.constant 19 : index
    %c0_81 = arith.constant 0 : index
    %c0_82 = arith.constant 0 : index
    %150 = vector.load %arg4[%c19, %c0_81, %c0_82] : memref<25x16x128xbf16, #tpu.memory_space<vmem>>, vector<1x16x128xbf16>
    %151 = vector.shape_cast %150 : vector<1x16x128xbf16> to vector<16x128xbf16>
    %cst_83 = arith.constant dense<0.000000e+00> : vector<2x128xf32>
    %152 = tpu.matmul %149, %151, %cst_83 {dimension_numbers = #tpu.dot_dimension_numbers<[1], [0], [0], [1], [0, 0, 1, 1], [], []>} : vector<2x16xbf16>, vector<16x128xbf16>, vector<2x128xf32> -> vector<2x128xf32>
    %153 = arith.addf %147, %152 : vector<2x128xf32>
    %154 = vector.extract_strided_slice %32 {offsets = [40, 0], sizes = [2, 16], strides = [1, 1]} : vector<50x16xf32> to vector<2x16xf32>
    %155 = arith.truncf %154 : vector<2x16xf32> to vector<2x16xbf16>
    %c20 = arith.constant 20 : index
    %c0_84 = arith.constant 0 : index
    %c0_85 = arith.constant 0 : index
    %156 = vector.load %arg4[%c20, %c0_84, %c0_85] : memref<25x16x128xbf16, #tpu.memory_space<vmem>>, vector<1x16x128xbf16>
    %157 = vector.shape_cast %156 : vector<1x16x128xbf16> to vector<16x128xbf16>
    %cst_86 = arith.constant dense<0.000000e+00> : vector<2x128xf32>
    %158 = tpu.matmul %155, %157, %cst_86 {dimension_numbers = #tpu.dot_dimension_numbers<[1], [0], [0], [1], [0, 0, 1, 1], [], []>} : vector<2x16xbf16>, vector<16x128xbf16>, vector<2x128xf32> -> vector<2x128xf32>
    %159 = arith.addf %153, %158 : vector<2x128xf32>
    %160 = vector.extract_strided_slice %32 {offsets = [42, 0], sizes = [2, 16], strides = [1, 1]} : vector<50x16xf32> to vector<2x16xf32>
    %161 = arith.truncf %160 : vector<2x16xf32> to vector<2x16xbf16>
    %c21 = arith.constant 21 : index
    %c0_87 = arith.constant 0 : index
    %c0_88 = arith.constant 0 : index
    %162 = vector.load %arg4[%c21, %c0_87, %c0_88] : memref<25x16x128xbf16, #tpu.memory_space<vmem>>, vector<1x16x128xbf16>
    %163 = vector.shape_cast %162 : vector<1x16x128xbf16> to vector<16x128xbf16>
    %cst_89 = arith.constant dense<0.000000e+00> : vector<2x128xf32>
    %164 = tpu.matmul %161, %163, %cst_89 {dimension_numbers = #tpu.dot_dimension_numbers<[1], [0], [0], [1], [0, 0, 1, 1], [], []>} : vector<2x16xbf16>, vector<16x128xbf16>, vector<2x128xf32> -> vector<2x128xf32>
    %165 = arith.addf %159, %164 : vector<2x128xf32>
    %166 = vector.extract_strided_slice %32 {offsets = [44, 0], sizes = [2, 16], strides = [1, 1]} : vector<50x16xf32> to vector<2x16xf32>
    %167 = arith.truncf %166 : vector<2x16xf32> to vector<2x16xbf16>
    %c22 = arith.constant 22 : index
    %c0_90 = arith.constant 0 : index
    %c0_91 = arith.constant 0 : index
    %168 = vector.load %arg4[%c22, %c0_90, %c0_91] : memref<25x16x128xbf16, #tpu.memory_space<vmem>>, vector<1x16x128xbf16>
    %169 = vector.shape_cast %168 : vector<1x16x128xbf16> to vector<16x128xbf16>
    %cst_92 = arith.constant dense<0.000000e+00> : vector<2x128xf32>
    %170 = tpu.matmul %167, %169, %cst_92 {dimension_numbers = #tpu.dot_dimension_numbers<[1], [0], [0], [1], [0, 0, 1, 1], [], []>} : vector<2x16xbf16>, vector<16x128xbf16>, vector<2x128xf32> -> vector<2x128xf32>
    %171 = arith.addf %165, %170 : vector<2x128xf32>
    %172 = vector.extract_strided_slice %32 {offsets = [46, 0], sizes = [2, 16], strides = [1, 1]} : vector<50x16xf32> to vector<2x16xf32>
    %173 = arith.truncf %172 : vector<2x16xf32> to vector<2x16xbf16>
    %c23 = arith.constant 23 : index
    %c0_93 = arith.constant 0 : index
    %c0_94 = arith.constant 0 : index
    %174 = vector.load %arg4[%c23, %c0_93, %c0_94] : memref<25x16x128xbf16, #tpu.memory_space<vmem>>, vector<1x16x128xbf16>
    %175 = vector.shape_cast %174 : vector<1x16x128xbf16> to vector<16x128xbf16>
    %cst_95 = arith.constant dense<0.000000e+00> : vector<2x128xf32>
    %176 = tpu.matmul %173, %175, %cst_95 {dimension_numbers = #tpu.dot_dimension_numbers<[1], [0], [0], [1], [0, 0, 1, 1], [], []>} : vector<2x16xbf16>, vector<16x128xbf16>, vector<2x128xf32> -> vector<2x128xf32>
    %177 = arith.addf %171, %176 : vector<2x128xf32>
    %178 = vector.extract_strided_slice %32 {offsets = [48, 0], sizes = [2, 16], strides = [1, 1]} : vector<50x16xf32> to vector<2x16xf32>
    %179 = arith.truncf %178 : vector<2x16xf32> to vector<2x16xbf16>
    %c24 = arith.constant 24 : index
    %c0_96 = arith.constant 0 : index
    %c0_97 = arith.constant 0 : index
    %180 = vector.load %arg4[%c24, %c0_96, %c0_97] : memref<25x16x128xbf16, #tpu.memory_space<vmem>>, vector<1x16x128xbf16>
    %181 = vector.shape_cast %180 : vector<1x16x128xbf16> to vector<16x128xbf16>
    %cst_98 = arith.constant dense<0.000000e+00> : vector<2x128xf32>
    %182 = tpu.matmul %179, %181, %cst_98 {dimension_numbers = #tpu.dot_dimension_numbers<[1], [0], [0], [1], [0, 0, 1, 1], [], []>} : vector<2x16xbf16>, vector<16x128xbf16>, vector<2x128xf32> -> vector<2x128xf32>
    %183 = arith.addf %177, %182 : vector<2x128xf32>
    %c0_99 = arith.constant 0 : index
    %c0_100 = arith.constant 0 : index
    %184 = vector.load %arg5[%c0_99, %c0_100] : memref<1x128xf32, #tpu.memory_space<vmem>>, vector<1x128xf32>
    %185 = vector.broadcast %184 : vector<1x128xf32> to vector<2x128xf32>
    %186 = arith.addf %183, %185 : vector<2x128xf32>
    %cst_101 = arith.constant 0.000000e+00 : f32
    %187 = vector.broadcast %cst_101 : f32 to vector<2x128xf32>
    %188 = arith.maximumf %186, %187 : vector<2x128xf32>
    %189 = arith.truncf %188 : vector<2x128xf32> to vector<2x128xbf16>
    %c0_102 = arith.constant 0 : index
    %c0_103 = arith.constant 0 : index
    %190 = vector.load %arg6[%c0_102, %c0_103] : memref<128x128xbf16, #tpu.memory_space<vmem>>, vector<128x128xbf16>
    %cst_104 = arith.constant dense<0.000000e+00> : vector<2x128xf32>
    %191 = tpu.matmul %189, %190, %cst_104 {dimension_numbers = #tpu.dot_dimension_numbers<[1], [0], [0], [1], [0, 0, 1, 1], [], []>} : vector<2x128xbf16>, vector<128x128xbf16>, vector<2x128xf32> -> vector<2x128xf32>
    %c0_105 = arith.constant 0 : index
    %c0_106 = arith.constant 0 : index
    %192 = vector.load %arg7[%c0_105, %c0_106] : memref<1x128xf32, #tpu.memory_space<vmem>>, vector<1x128xf32>
    %193 = vector.broadcast %192 : vector<1x128xf32> to vector<2x128xf32>
    %194 = arith.addf %191, %193 : vector<2x128xf32>
    %cst_107 = arith.constant 0.000000e+00 : f32
    %195 = vector.broadcast %cst_107 : f32 to vector<2x128xf32>
    %196 = arith.maximumf %194, %195 : vector<2x128xf32>
    %197 = arith.truncf %196 : vector<2x128xf32> to vector<2x128xbf16>
    %c0_108 = arith.constant 0 : index
    %c0_109 = arith.constant 0 : index
    %198 = vector.load %arg8[%c0_108, %c0_109] : memref<128x128xbf16, #tpu.memory_space<vmem>>, vector<128x128xbf16>
    %cst_110 = arith.constant dense<0.000000e+00> : vector<2x128xf32>
    %199 = tpu.matmul %197, %198, %cst_110 {dimension_numbers = #tpu.dot_dimension_numbers<[1], [0], [0], [1], [0, 0, 1, 1], [], []>} : vector<2x128xbf16>, vector<128x128xbf16>, vector<2x128xf32> -> vector<2x128xf32>
    %c0_111 = arith.constant 0 : index
    %c0_112 = arith.constant 0 : index
    %200 = vector.load %arg9[%c0_111, %c0_112] : memref<1x128xf32, #tpu.memory_space<vmem>>, vector<1x128xf32>
    %201 = vector.broadcast %200 : vector<1x128xf32> to vector<2x128xf32>
    %202 = arith.addf %199, %201 : vector<2x128xf32>
    %cst_113 = arith.constant 0.000000e+00 : f32
    %203 = vector.broadcast %cst_113 : f32 to vector<6x128xf32>
    %204 = tpu.concatenate %202, %203 in 0 : vector<2x128xf32>, vector<6x128xf32> -> vector<8x128xf32>
    %c0_114 = arith.constant 0 : index
    %c0_115 = arith.constant 0 : index
    %205 = vector.load %arg10[%c0_114, %c0_115] : memref<8x128xf32, #tpu.memory_space<vmem>>, vector<8x128xf32>
    tpu.vector_store %arg10[%c0_114, %c0_115], %204 {strides = array<i32>} : memref<8x128xf32, #tpu.memory_space<vmem>>, vector<8x128xf32>,
    return
  }
  func.func @transform_0(%arg0: i32) -> (i32, i32, i32) {
    %c0_i32 = arith.constant 0 : i32
    %c0_i32_0 = arith.constant 0 : i32
    %c0_i32_1 = arith.constant 0 : i32
    %c0_i32_2 = arith.constant 0 : i32
    return %c0_i32, %c0_i32_0, %c0_i32_1 : i32, i32, i32
  }
  func.func @transform_1(%arg0: i32) -> (i32, i32) {
    %c0_i32 = arith.constant 0 : i32
    %c0_i32_0 = arith.constant 0 : i32
    %c0_i32_1 = arith.constant 0 : i32
    return %c0_i32, %c0_i32_0 : i32, i32
  }
  func.func @transform_2(%arg0: i32) -> (i32, i32) {
    %c0_i32 = arith.constant 0 : i32
    %c0_i32_0 = arith.constant 0 : i32
    %c0_i32_1 = arith.constant 0 : i32
    return %c0_i32, %c0_i32_0 : i32, i32
  }
  func.func @transform_3(%arg0: i32) -> (i32, i32, i32) {
    %c0_i32 = arith.constant 0 : i32
    %c0_i32_0 = arith.constant 0 : i32
    %c0_i32_1 = arith.constant 0 : i32
    %c0_i32_2 = arith.constant 0 : i32
    return %c0_i32, %c0_i32_0, %c0_i32_1 : i32, i32, i32
  }
  func.func @transform_4(%arg0: i32) -> (i32, i32) {
    %c0_i32 = arith.constant 0 : i32
    %c0_i32_0 = arith.constant 0 : i32
    %c0_i32_1 = arith.constant 0 : i32
    return %c0_i32, %c0_i32_0 : i32, i32
  }
  func.func @transform_5(%arg0: i32) -> (i32, i32) {
    %c0_i32 = arith.constant 0 : i32
    %c0_i32_0 = arith.constant 0 : i32
    %c0_i32_1 = arith.constant 0 : i32
    return %c0_i32, %c0_i32_0 : i32, i32
  }
  func.func @transform_6(%arg0: i32) -> (i32, i32) {
    %c0_i32 = arith.constant 0 : i32
    %c0_i32_0 = arith.constant 0 : i32
    %c0_i32_1 = arith.constant 0 : i32
    return %c0_i32, %c0_i32_0 : i32, i32
  }
  func.func @transform_7(%arg0: i32) -> (i32, i32) {
    %c0_i32 = arith.constant 0 : i32
    %c0_i32_0 = arith.constant 0 : i32
    %c0_i32_1 = arith.constant 0 : i32
    return %c0_i32, %c0_i32_0 : i32, i32
  }
  func.func @transform_8(%arg0: i32) -> (i32, i32) {
    %c0_i32 = arith.constant 0 : i32
    %c0_i32_0 = arith.constant 0 : i32
    %c0_i32_1 = arith.constant 0 : i32
    return %c0_i32, %c0_i32_0 : i32, i32
  }
  func.func @transform_9(%arg0: i32) -> (i32, i32) {
    %c0_i32 = arith.constant 0 : i32
    %c0_i32_0 = arith.constant 0 : i32
    %c0_i32_1 = arith.constant 0 : i32
    return %c0_i32, %c0_i32_0 : i32, i32
  }
}

</mosaic_0001>

<bundles_post_ra>
// kernel: net_forward.2
= control target key start
LH: loop header
LB: loop body
LE: loop exit
PB: predicated region body
PF: predicated region fallthrough
CT: control target
= control target key end

     0   :  { %s2754_s12 = smov 0   ;;  %s2756_s13 = smov 0   ;;  %s3323_s0 = inlined_call_operand.vmem [shape: bf16[4,400,128], index: 0, kind: input, shape index: {}]   ;;  %s3324_s1 = inlined_call_operand.vmem [shape: bf16[128,128], index: 1, kind: input, shape index: {}]   ;;  %s3325_s2 = inlined_call_operand.vmem [shape: f32[1,128], index: 2, kind: input, shape index: {}]   ;;  %s3326_s3 = inlined_call_operand.vmem [shape: bf16[400,128], index: 3, kind: output, shape index: {}]  }
   0x1   :  { %s2758_s14 = smov 0  }
   0x2 LB: > { %s1997_s15 = sadd.s32 4294967295, %s2730_s14   ;;  %s2771_s16 = sadd.s32 1, %s2730_s14   ;;  %s2730_s14 = sphi %s2758_s14, %s3329_s14   ;;  %s2726_s13 = sphi %s2756_s13, %s3328_s13   ;;  %s2722_s12 = sphi %s2754_s12, %s3327_s12  }
   0x3   : > { %s17_s17 = ssub.s32 %s2730_s14, %s2771_s16  ;;  %s20_s18 = sadd.s32 1, %s2726_s13 }
   0x4   : > { %p18_p0 = scmp.eq.s32.totalorder %s17_s17, 0  ;;  %p27_p1 = scmp.ne.s32.totalorder %s2726_s13, %s2722_s12 }
   0x5   : > { %p28_p2 = scmp.eq.s32.totalorder %s2730_s14, 0  ;;  %p2000_p4 = scmp.ge.s32.totalorder %s2730_s14, 2 }
   0x6   : > { %s2780_s19 = scalar_select %p18_p0, %s2726_s13, %s20_s18  }
   0x7   : > { %p29_p3 = por %p28_p2, %p27_p1  ;;  %127 = sbr.rel (%p2000_p4) target bundleno = 45 (0x2d), region = 24 }
   0xe   : > { %130 = sbr.rel (!%p29_p3) target bundleno = 45 (0x2d), region = 28  ;;  %s132_s20 = sand.u32 (%p29_p3), 1, %s2726_s13  }
   0xf   : > { %s2167_s21 = smul.u32 (%p29_p3), 100, %s2730_s14 }
  0x10   : > { %s2620_s22 = smul.u32 (%p29_p3), 400, %s132_s20 }
  0x11   : > { %s2788_s25 = scalar_lea.vmem (%p29_p3), %s3323_s0, %s2167_s21 }
  0x12   : > { %v153_v0 = vld [vmem:[%s2788_s25] sm:$0xff] (%p29_p3)   ;;  %v157_v1 = vld [vmem:[%s2788_s25 + $0x8] sm:$0xff] (%p29_p3)   ;;  %v161_v2 = vld [vmem:[%s2788_s25 + $0x10] sm:$0xff] (%p29_p3)   ;;  %s2793_s26 = scalar_lea.vmem (%p29_p3), [#allocation2], %s2620_s22 }
  0x13   : > { %154 = vst [vmem:[%s2793_s26] sm:$0xff] (%p29_p3), %v153_v0   ;;  %158 = vst [vmem:[%s2793_s26 + $0x8] sm:$0xff] (%p29_p3), %v157_v1   ;;  %v165_v3 = vld [vmem:[%s2788_s25 + $0x18] sm:$0xff] (%p29_p3)   ;;  %v169_v4 = vld [vmem:[%s2788_s25 + $0x20] sm:$0xff] (%p29_p3)  }
  0x14   : > { %162 = vst [vmem:[%s2793_s26 + $0x10] sm:$0xff] (%p29_p3), %v161_v2   ;;  %v173_v5 = vld [vmem:[%s2788_s25 + $0x28] sm:$0xff] (%p29_p3)   ;;  %166 = vst [vmem:[%s2793_s26 + $0x18] sm:$0xff] (%p29_p3), %v165_v3   ;;  %v177_v6 = vld [vmem:[%s2788_s25 + $0x30] sm:$0xff] (%p29_p3)  }
  0x15   : > { %170 = vst [vmem:[%s2793_s26 + $0x20] sm:$0xff] %v169_v4   ;;  %174 = vst [vmem:[%s2793_s26 + $0x28] sm:$0xff] %v173_v5   ;;  %v181_v7 = vld [vmem:[%s2788_s25 + $0x38] sm:$0xff]   ;;  %v185_v8 = vld [vmem:[%s2788_s25 + $0x40] sm:$0xff]  }
  0x16   : > { %178 = vst [vmem:[%s2793_s26 + $0x30] sm:$0xff] %v177_v6   ;;  %182 = vst [vmem:[%s2793_s26 + $0x38] sm:$0xff] %v181_v7   ;;  %v189_v9 = vld [vmem:[%s2788_s25 + $0x48] sm:$0xff]   ;;  %v193_v10 = vld [vmem:[%s2788_s25 + $0x50] sm:$0xff]  }
  0x17   : > { %186 = vst [vmem:[%s2793_s26 + $0x40] sm:$0xff] %v185_v8   ;;  %v197_v11 = vld [vmem:[%s2788_s25 + $0x58] sm:$0xff]   ;;  %190 = vst [vmem:[%s2793_s26 + $0x48] sm:$0xff] %v189_v9   ;;  %v201_v12 = vld [vmem:[%s2788_s25 + $0x60] sm:$0xf] }
  0x18   : > { %194 = vst [vmem:[%s2793_s26 + $0x50] sm:$0xff] %v193_v10   ;;  %198 = vst [vmem:[%s2793_s26 + $0x58] sm:$0xff] %v197_v11   ;;  %v203_v13 = vld [vmem:[%s2788_s25 + $0xc8] sm:$0xff]   ;;  %v207_v14 = vld [vmem:[%s2788_s25 + $0xd0] sm:$0xff]  }
  0x19   : > { %202 = vst [vmem:[%s2793_s26 + $0x60] sm:$0xf] %v201_v12  ;;  %204 = vst [vmem:[%s2793_s26 + $0x64] sm:$0xff] %v203_v13   ;;  %v211_v15 = vld [vmem:[%s2788_s25 + $0xd8] sm:$0xff]   ;;  %v215_v16 = vld [vmem:[%s2788_s25 + $0xe0] sm:$0xff]  }
  0x1a   : > { %208 = vst [vmem:[%s2793_s26 + $0x6c] sm:$0xff] %v207_v14   ;;  %v219_v17 = vld [vmem:[%s2788_s25 + $0xe8] sm:$0xff]   ;;  %212 = vst [vmem:[%s2793_s26 + $0x74] sm:$0xff] %v211_v15   ;;  %v223_v18 = vld [vmem:[%s2788_s25 + $0xf0] sm:$0xff]  }
  0x1b   : > { %216 = vst [vmem:[%s2793_s26 + $0x7c] sm:$0xff] %v215_v16   ;;  %220 = vst [vmem:[%s2793_s26 + $0x84] sm:$0xff] %v219_v17   ;;  %v227_v19 = vld [vmem:[%s2788_s25 + $0xf8] sm:$0xff]   ;;  %v231_v20 = vld [vmem:[%s2788_s25 + $0x100] sm:$0xff]  }
  0x1c   : > { %224 = vst [vmem:[%s2793_s26 + $0x8c] sm:$0xff] %v223_v18   ;;  %228 = vst [vmem:[%s2793_s26 + $0x94] sm:$0xff] %v227_v19   ;;  %v235_v21 = vld [vmem:[%s2788_s25 + $0x108] sm:$0xff]   ;;  %v239_v22 = vld [vmem:[%s2788_s25 + $0x110] sm:$0xff]  }
  0x1d   : > { %232 = vst [vmem:[%s2793_s26 + $0x9c] sm:$0xff] %v231_v20   ;;  %v243_v23 = vld [vmem:[%s2788_s25 + $0x118] sm:$0xff]   ;;  %236 = vst [vmem:[%s2793_s26 + $0xa4] sm:$0xff] %v235_v21   ;;  %v247_v24 = vld [vmem:[%s2788_s25 + $0x120] sm:$0xff]  }
  0x1e   : > { %240 = vst [vmem:[%s2793_s26 + $0xac] sm:$0xff] %v239_v22   ;;  %244 = vst [vmem:[%s2793_s26 + $0xb4] sm:$0xff] %v243_v23   ;;  %v251_v25 = vld [vmem:[%s2788_s25 + $0x128] sm:$0xf]  ;;  %v253_v26 = vld [vmem:[%s2788_s25 + $0x190] sm:$0xff]  }
  0x1f   : > { %248 = vst [vmem:[%s2793_s26 + $0xbc] sm:$0xff] %v247_v24   ;;  %252 = vst [vmem:[%s2793_s26 + $0xc4] sm:$0xf] %v251_v25  ;;  %v257_v27 = vld [vmem:[%s2788_s25 + $0x198] sm:$0xff]   ;;  %v261_v28 = vld [vmem:[%s2788_s25 + $0x1a0] sm:$0xff]  }
  0x20   : > { %254 = vst [vmem:[%s2793_s26 + $0xc8] sm:$0xff] %v253_v26   ;;  %v265_v29 = vld [vmem:[%s2788_s25 + $0x1a8] sm:$0xff]   ;;  %258 = vst [vmem:[%s2793_s26 + $0xd0] sm:$0xff] %v257_v27   ;;  %v269_v30 = vld [vmem:[%s2788_s25 + $0x1b0] sm:$0xff]  }
  0x21   : > { %262 = vst [vmem:[%s2793_s26 + $0xd8] sm:$0xff] %v261_v28   ;;  %266 = vst [vmem:[%s2793_s26 + $0xe0] sm:$0xff] %v265_v29   ;;  %v273_v31 = vld [vmem:[%s2788_s25 + $0x1b8] sm:$0xff]   ;;  %v277_v32 = vld [vmem:[%s2788_s25 + $0x1c0] sm:$0xff]  }
  0x22   : > { %270 = vst [vmem:[%s2793_s26 + $0xe8] sm:$0xff] %v269_v30   ;;  %274 = vst [vmem:[%s2793_s26 + $0xf0] sm:$0xff] %v273_v31   ;;  %v281_v33 = vld [vmem:[%s2788_s25 + $0x1c8] sm:$0xff]   ;;  %v285_v34 = vld [vmem:[%s2788_s25 + $0x1d0] sm:$0xff]  }
  0x23   : > { %278 = vst [vmem:[%s2793_s26 + $0xf8] sm:$0xff] %v277_v32   ;;  %v289_v35 = vld [vmem:[%s2788_s25 + $0x1d8] sm:$0xff]   ;;  %282 = vst [vmem:[%s2793_s26 + $0x100] sm:$0xff] %v281_v33   ;;  %v293_v36 = vld [vmem:[%s2788_s25 + $0x1e0] sm:$0xff]  }
  0x24   : > { %286 = vst [vmem:[%s2793_s26 + $0x108] sm:$0xff] %v285_v34   ;;  %290 = vst [vmem:[%s2793_s26 + $0x110] sm:$0xff] %v289_v35   ;;  %v297_v37 = vld [vmem:[%s2788_s25 + $0x1e8] sm:$0xff]   ;;  %v301_v38 = vld [vmem:[%s2788_s25 + $0x1f0] sm:$0xf] }
  0x25   : > { %294 = vst [vmem:[%s2793_s26 + $0x118] sm:$0xff] %v293_v36   ;;  %298 = vst [vmem:[%s2793_s26 + $0x120] sm:$0xff] %v297_v37   ;;  %v303_v39 = vld [vmem:[%s2788_s25 + $0x258] sm:$0xff]   ;;  %v307_v40 = vld [vmem:[%s2788_s25 + $0x260] sm:$0xff]  }
  0x26   : > { %302 = vst [vmem:[%s2793_s26 + $0x128] sm:$0xf] %v301_v38  ;;  %v311_v41 = vld [vmem:[%s2788_s25 + $0x268] sm:$0xff]   ;;  %304 = vst [vmem:[%s2793_s26 + $0x12c] sm:$0xff] %v303_v39   ;;  %v315_v42 = vld [vmem:[%s2788_s25 + $0x270] sm:$0xff]  }
  0x27   : > { %308 = vst [vmem:[%s2793_s26 + $0x134] sm:$0xff] %v307_v40   ;;  %312 = vst [vmem:[%s2793_s26 + $0x13c] sm:$0xff] %v311_v41   ;;  %v319_v43 = vld [vmem:[%s2788_s25 + $0x278] sm:$0xff]   ;;  %v323_v44 = vld [vmem:[%s2788_s25 + $0x280] sm:$0xff]  }
  0x28   : > { %316 = vst [vmem:[%s2793_s26 + $0x144] sm:$0xff] %v315_v42   ;;  %320 = vst [vmem:[%s2793_s26 + $0x14c] sm:$0xff] %v319_v43   ;;  %v327_v45 = vld [vmem:[%s2788_s25 + $0x288] sm:$0xff]   ;;  %v331_v46 = vld [vmem:[%s2788_s25 + $0x290] sm:$0xff]  }
  0x29   : > { %324 = vst [vmem:[%s2793_s26 + $0x154] sm:$0xff] %v323_v44   ;;  %v335_v47 = vld [vmem:[%s2788_s25 + $0x298] sm:$0xff]   ;;  %328 = vst [vmem:[%s2793_s26 + $0x15c] sm:$0xff] %v327_v45   ;;  %v339_v48 = vld [vmem:[%s2788_s25 + $0x2a0] sm:$0xff]  }
  0x2a   : > { %332 = vst [vmem:[%s2793_s26 + $0x164] sm:$0xff] %v331_v46   ;;  %336 = vst [vmem:[%s2793_s26 + $0x16c] sm:$0xff] %v335_v47   ;;  %v343_v49 = vld [vmem:[%s2788_s25 + $0x2a8] sm:$0xff]   ;;  %v347_v50 = vld [vmem:[%s2788_s25 + $0x2b0] sm:$0xff]  }
  0x2b   : > { %340 = vst [vmem:[%s2793_s26 + $0x174] sm:$0xff] %v339_v48   ;;  %344 = vst [vmem:[%s2793_s26 + $0x17c] sm:$0xff] %v343_v49   ;;  %v351_v51 = vld [vmem:[%s2788_s25 + $0x2b8] sm:$0xf] }
  0x2c   : > { %348 = vst [vmem:[%s2793_s26 + $0x184] sm:$0xff] %v347_v50   ;;  %352 = vst [vmem:[%s2793_s26 + $0x18c] sm:$0xf] %v351_v51 }
  0x2d PF: > { %p2002_p5 = scmp.ge.s32.totalorder %s2730_s14, 1  ;;  %p574_p6 = scmp.lt.s32.totalorder %s2730_s14, 3 }
  0x2f   : > { %p575_p7 = pnand %p2002_p5, %p574_p6 }
  0x30   : > { %v2648_v52 = vld [vmem:[%s3324_s1] sm:$0xff] (!%p575_p7)   ;;  %v2732_v53 = vmov (!%p575_p7), 0.0   ;;  %v2649_v54 = vld [vmem:[%s3324_s1 + $0x8] sm:$0xff] (!%p575_p7)   ;;  %s581_s4 = sand.u32 (!%p575_p7), 1, %s2722_s12   ;;  %vm2733_vm0 = vmmov (!%p575_p7), 0   ;;  %v2650_v55 = vld [vmem:[%s3324_s1 + $0x10] sm:$0xff] (!%p575_p7)  }
  0x31   : > { %578 = sbr.rel (%p575_p7) target bundleno = 504 (0x1f8), region = 69  ;;  %2348 = vmatprep.subr.bf16.mxu0 (!%p575_p7), %v2732_v53  ;;  %2416 = vmatprep.subr.bf16.mxu1 (!%p575_p7), %v2732_v53  ;;  %v2651_v56 = vld [vmem:[%s3324_s1 + $0x18] sm:$0xff] (!%p575_p7)   ;;  %v2652_v57 = vld [vmem:[%s3324_s1 + $0x20] sm:$0xff] (!%p575_p7)   ;;  %v2653_v58 = vld [vmem:[%s3324_s1 + $0x28] sm:$0xff] (!%p575_p7)  }
  0x32   : > { %2349 = vmatpush3.bf16.msra.mxu0 (!%p575_p7), %v2648_v52  ;;  %2417 = vmatpush3.bf16.msra.mxu1 (!%p575_p7), %v2648_v52  ;;  %s2621_s5 = smul.u32 (!%p575_p7), 400, %s581_s4  ;;  %v2654_v59 = vld [vmem:[%s3324_s1 + $0x30] sm:$0xff] (!%p575_p7)   ;;  %v2655_v60 = vld [vmem:[%s3324_s1 + $0x38] sm:$0xff] (!%p575_p7)   ;;  %v3116_v49 = vld [vmem:[%s3325_s2] ss:$0 sm:$0xff] (!%p575_p7) }
  0x33   : > { %2350 = vmatprep.subr.bf16.mxu0 (!%p575_p7), %v2732_v53  ;;  %2418 = vmatprep.subr.bf16.mxu1 (!%p575_p7), %v2732_v53  ;;  %s605_s26 = smul.u32 (!%p575_p7), 25, %s1997_s15 }
  0x34   : > { %2364 = vmatprep.mubr.msk.bf16.mxu0 (!%p575_p7), %vm2733_vm0, %v2732_v53  ;;  %2432 = vmatprep.mubr.msk.bf16.mxu1 (!%p575_p7), %vm2733_vm0, %v2732_v53  ;;  %s2918_s8 = scalar_lea.vmem (!%p575_p7), [#allocation2], %s2621_s5 }
  0x35   : > { %v2656_v61 = vld [vmem:[%s2918_s8] sm:$0xff] (!%p575_p7)   ;;  %v2658_v63 = vld [vmem:[%s2918_s8 + $0x8] sm:$0xff] (!%p575_p7)   ;;  %v2660_v1 = vld [vmem:[%s2918_s8 + $0x10] sm:$0xff] (!%p575_p7)   ;;  %p606_p8 = scmp.lt.s32.totalorder (!%p575_p7), %s605_s26, 49 }
  0x36   : > { %2351 = vmatpush3.bf16.msra.mxu0 (!%p575_p7), %v2649_v54  ;;  %2419 = vmatpush3.bf16.msra.mxu1 (!%p575_p7), %v2649_v54  ;;  %v2657_v62 = vld [vmem:[%s2918_s8 + $0x64] sm:$0xff] (!%p575_p7)   ;;  %v2659_v0 = vld [vmem:[%s2918_s8 + $0x6c] sm:$0xff] (!%p575_p7)   ;;  %v2661_v2 = vld [vmem:[%s2918_s8 + $0x74] sm:$0xff] (!%p575_p7)  }
  0x37   : > { %2352 = vmatprep.subr.bf16.mxu0 (!%p575_p7), %v2732_v53  ;;  %2420 = vmatprep.subr.bf16.mxu1 (!%p575_p7), %v2732_v53  ;;  %v2662_v3 = vld [vmem:[%s2918_s8 + $0x18] sm:$0xff] (!%p575_p7)   ;;  %v2664_v5 = vld [vmem:[%s2918_s8 + $0x20] sm:$0xff] (!%p575_p7)   ;;  %v2666_v7 = vld [vmem:[%s2918_s8 + $0x28] sm:$0xff] (!%p575_p7)  }
  0x38   : > { %v2663_v4 = vld [vmem:[%s2918_s8 + $0x7c] sm:$0xff]   ;;  %v2665_v6 = vld [vmem:[%s2918_s8 + $0x84] sm:$0xff]   ;;  %v2667_v8 = vld [vmem:[%s2918_s8 + $0x8c] sm:$0xff]   ;;  %s3331_s26 = smov (!%p606_p8, %s605_s26), 49 }
  0x39   : > { %v2668_v9 = vld [vmem:[%s2918_s8 + $0x30] sm:$0xff]   ;;  %v2670_v11 = vld [vmem:[%s2918_s8 + $0x38] sm:$0xff]   ;;  %v2672_v13 = vld [vmem:[%s2918_s8 + $0x40] sm:$0xff]   ;;  %s2003_s14 = sshll.u32 %s3331_s26, 2 }
  0x3a   : > { %2353 = vmatpush3.bf16.msra.mxu0 %v2650_v55  ;;  %2421 = vmatpush3.bf16.msra.mxu1 %v2650_v55  ;;  %v2669_v10 = vld [vmem:[%s2918_s8 + $0x94] sm:$0xff]   ;;  %v2671_v12 = vld [vmem:[%s2918_s8 + $0x9c] sm:$0xff]   ;;  %v2673_v14 = vld [vmem:[%s2918_s8 + $0xa4] sm:$0xff]   ;;  %s3231_s28 = scalar_lea.vmem %s3326_s3, %s2003_s14 }
  0x3b   : > { %2354 = vmatprep.subr.bf16.mxu0 %v2732_v53  ;;  %2422 = vmatprep.subr.bf16.mxu1 %v2732_v53  ;;  %v2674_v15 = vld [vmem:[%s2918_s8 + $0x48] sm:$0xff]   ;;  %v2676_v17 = vld [vmem:[%s2918_s8 + $0x50] sm:$0xff]   ;;  %v2678_v19 = vld [vmem:[%s2918_s8 + $0x58] sm:$0xff]  }
  0x3c   : > { %v2675_v16 = vld [vmem:[%s2918_s8 + $0xac] sm:$0xff]   ;;  %v2677_v18 = vld [vmem:[%s2918_s8 + $0xb4] sm:$0xff]   ;;  %v2679_v20 = vld [vmem:[%s2918_s8 + $0xbc] sm:$0xff]  }
  0x3d   : > { %v2680_v21 = vld [vmem:[%s2918_s8 + $0x60] ss:$0 sps:$4 sm:$0xff]   ;;  %v2681_v22 = vld [vmem:[%s2918_s8 + $0xc4] ss:$0 sps:$4 sm:$0xff]   ;;  %v2682_v23 = vld [vmem:[%s2918_s8 + $0xc8] sm:$0xff]  }
  0x3e   : > { %2355 = vmatpush3.bf16.msra.mxu0 %v2651_v56  ;;  %2423 = vmatpush3.bf16.msra.mxu1 %v2651_v56  ;;  %v2683_v24 = vld [vmem:[%s2918_s8 + $0x12c] sm:$0xff]   ;;  %v2685_v26 = vld [vmem:[%s2918_s8 + $0x134] sm:$0xff]   ;;  %v2687_v28 = vld [vmem:[%s2918_s8 + $0x13c] sm:$0xff]  }
  0x3f   : > { %2356 = vmatprep.subr.bf16.mxu0 %v2732_v53  ;;  %2424 = vmatprep.subr.bf16.mxu1 %v2732_v53  ;;  %v2684_v25 = vld [vmem:[%s2918_s8 + $0xd0] sm:$0xff]   ;;  %v2686_v27 = vld [vmem:[%s2918_s8 + $0xd8] sm:$0xff]   ;;  %v2688_v29 = vld [vmem:[%s2918_s8 + $0xe0] sm:$0xff]  }
  0x40   : > { %v2689_v30 = vld [vmem:[%s2918_s8 + $0x144] sm:$0xff]   ;;  %v2691_v32 = vld [vmem:[%s2918_s8 + $0x14c] sm:$0xff]   ;;  %v2693_v34 = vld [vmem:[%s2918_s8 + $0x154] sm:$0xff]  }
  0x41   : > { %v2690_v31 = vld [vmem:[%s2918_s8 + $0xe8] sm:$0xff]   ;;  %v2692_v33 = vld [vmem:[%s2918_s8 + $0xf0] sm:$0xff]   ;;  %v2694_v35 = vld [vmem:[%s2918_s8 + $0xf8] sm:$0xff]  }
  0x42   : > { %2357 = vmatpush3.bf16.msra.mxu0 %v2652_v57  ;;  %2425 = vmatpush3.bf16.msra.mxu1 %v2652_v57  ;;  %v2695_v36 = vld [vmem:[%s2918_s8 + $0x15c] sm:$0xff]   ;;  %v2697_v38 = vld [vmem:[%s2918_s8 + $0x164] sm:$0xff]   ;;  %v2699_v40 = vld [vmem:[%s2918_s8 + $0x16c] sm:$0xff]  }
  0x43   : > { %2358 = vmatprep.subr.bf16.mxu0 %v2732_v53  ;;  %2426 = vmatprep.subr.bf16.mxu1 %v2732_v53  ;;  %v2696_v37 = vld [vmem:[%s2918_s8 + $0x100] sm:$0xff]   ;;  %v2698_v39 = vld [vmem:[%s2918_s8 + $0x108] sm:$0xff]   ;;  %v2700_v41 = vld [vmem:[%s2918_s8 + $0x110] sm:$0xff]  }
  0x44   : > { %v2701_v42 = vld [vmem:[%s2918_s8 + $0x174] sm:$0xff]   ;;  %v2703_v44 = vld [vmem:[%s2918_s8 + $0x17c] sm:$0xff]   ;;  %v2705_v46 = vld [vmem:[%s2918_s8 + $0x184] sm:$0xff]  }
  0x45   : > { %v2702_v43 = vld [vmem:[%s2918_s8 + $0x118] sm:$0xff]   ;;  %v2704_v45 = vld [vmem:[%s2918_s8 + $0x120] sm:$0xff]   ;;  %v2706_v47 = vld [vmem:[%s2918_s8 + $0x128] ss:$0 sps:$4 sm:$0xff]  }
  0x46   : > { %2359 = vmatpush3.bf16.msra.mxu0 %v2653_v58  ;;  %2427 = vmatpush3.bf16.msra.mxu1 %v2653_v58  ;;  %v2707_v48 = vld [vmem:[%s2918_s8 + $0x18c] ss:$0 sps:$4 sm:$0xff]  }
  0x47   : > { %2360 = vmatprep.subr.bf16.mxu0 %v2732_v53  ;;  %2428 = vmatprep.subr.bf16.mxu1 %v2732_v53 }
  0x4a   : > { %2361 = vmatpush3.bf16.msra.mxu0 %v2654_v59  ;;  %2429 = vmatpush3.bf16.msra.mxu1 %v2654_v59 }
  0x4b   : > { %2362 = vmatprep.subr.bf16.mxu0 %v2732_v53  ;;  %2430 = vmatprep.subr.bf16.mxu1 %v2732_v53 }
  0x4e   : > { %2363 = vmatpush3.bf16.msra.mxu0 %v2655_v60  ;;  %2431 = vmatpush3.bf16.msra.mxu1 %v2655_v60 }
  0x4f   : > { %2484 = vmatprep.subr.bf16.mxu0 %v2732_v53  ;;  %2552 = vmatprep.subr.bf16.mxu1 %v2732_v53 }
  0x51   : > { %2365 = vmatmul.mubr.bf16.vlgmr.msra.gmra.mrb[0].mxu0 %v2656_v61  ;;  %2433 = vmatmul.mubr.bf16.vlgmr.msra.gmra.mrb[0].mxu1 %v2657_v62 }
  0x52   : > { %2485 = vmatpush3.bf16.msra.mxu0 %v2648_v52  ;;  %2553 = vmatpush3.bf16.msra.mxu1 %v2648_v52 }
  0x53   : > { %2368 = vmatprep.mubr.msk.bf16.mxu0 %vm2733_vm0, %v2732_v53  ;;  %2436 = vmatprep.mubr.msk.bf16.mxu1 %vm2733_vm0, %v2732_v53 }
  0x54   : > { %2486 = vmatprep.subr.bf16.mxu0 %v2732_v53  ;;  %2554 = vmatprep.subr.bf16.mxu1 %v2732_v53 }
  0x56   : > { %2487 = vmatpush3.bf16.msra.mxu0 %v2649_v54  ;;  %2555 = vmatpush3.bf16.msra.mxu1 %v2649_v54 }
  0x57   : > { %2488 = vmatprep.subr.bf16.mxu0 %v2732_v53  ;;  %2556 = vmatprep.subr.bf16.mxu1 %v2732_v53 }
  0x59   : > { %2369 = vmatmul.mubr.bf16.gmra.mrb[4].mxu0 %v2658_v63  ;;  %2437 = vmatmul.mubr.bf16.gmra.mrb[4].mxu1 %v2659_v0 }
  0x5a   : > { %2372 = vmatprep.mubr.msk.bf16.mxu0 %vm2733_vm0, %v2732_v53  ;;  %2440 = vmatprep.mubr.msk.bf16.mxu1 %vm2733_vm0, %v2732_v53 }
  0x5b   : > { %2489 = vmatpush3.bf16.msra.mxu0 %v2650_v55  ;;  %2557 = vmatpush3.bf16.msra.mxu1 %v2650_v55 }
  0x5c   : > { %2490 = vmatprep.subr.bf16.mxu0 %v2732_v53  ;;  %2558 = vmatprep.subr.bf16.mxu1 %v2732_v53 }
  0x5f   : > { %2491 = vmatpush3.bf16.msra.mxu0 %v2651_v56  ;;  %2559 = vmatpush3.bf16.msra.mxu1 %v2651_v56 }
  0x60   : > { %2492 = vmatprep.subr.bf16.mxu0 %v2732_v53  ;;  %2560 = vmatprep.subr.bf16.mxu1 %v2732_v53 }
  0x61   : > { %2373 = vmatmul.mubr.bf16.gmra.mrb[8].mxu0 %v2660_v1  ;;  %2441 = vmatmul.mubr.bf16.gmra.mrb[8].mxu1 %v2661_v2 }
  0x62   : > { %2376 = vmatprep.mubr.msk.bf16.mxu0 %vm2733_vm0, %v2732_v53  ;;  %2444 = vmatprep.mubr.msk.bf16.mxu1 %vm2733_vm0, %v2732_v53 }
  0x63   : > { %2493 = vmatpush3.bf16.msra.mxu0 %v2652_v57  ;;  %2561 = vmatpush3.bf16.msra.mxu1 %v2652_v57 }
  0x64   : > { %2494 = vmatprep.subr.bf16.mxu0 %v2732_v53  ;;  %2562 = vmatprep.subr.bf16.mxu1 %v2732_v53 }
  0x67   : > { %2495 = vmatpush3.bf16.msra.mxu0 %v2653_v58  ;;  %2563 = vmatpush3.bf16.msra.mxu1 %v2653_v58 }
  0x68   : > { %2496 = vmatprep.subr.bf16.mxu0 %v2732_v53  ;;  %2564 = vmatprep.subr.bf16.mxu1 %v2732_v53 }
  0x69   : > { %2377 = vmatmul.mubr.bf16.gmra.mrb[12].mxu0 %v2662_v3  ;;  %2445 = vmatmul.mubr.bf16.gmra.mrb[12].mxu1 %v2663_v4 }
  0x6a   : > { %2380 = vmatprep.mubr.msk.bf16.mxu0 %vm2733_vm0, %v2732_v53  ;;  %2448 = vmatprep.mubr.msk.bf16.mxu1 %vm2733_vm0, %v2732_v53 }
  0x6b   : > { %2497 = vmatpush3.bf16.msra.mxu0 %v2654_v59  ;;  %2565 = vmatpush3.bf16.msra.mxu1 %v2654_v59 }
  0x6c   : > { %2498 = vmatprep.subr.bf16.mxu0 %v2732_v53  ;;  %2566 = vmatprep.subr.bf16.mxu1 %v2732_v53 }
  0x6f   : > { %2499 = vmatpush3.bf16.msra.mxu0 %v2655_v60  ;;  %2567 = vmatpush3.bf16.msra.mxu1 %v2655_v60 }
  0x71   : > { %2381 = vmatmul.mubr.bf16.gmra.mrb[16].mxu0 %v2664_v5  ;;  %2449 = vmatmul.mubr.bf16.gmra.mrb[16].mxu1 %v2665_v6 }
  0x72   : > { %2384 = vmatprep.mubr.msk.bf16.mxu0 %vm2733_vm0, %v2732_v53  ;;  %2452 = vmatprep.mubr.msk.bf16.mxu1 %vm2733_vm0, %v2732_v53 }
  0x79   : > { %2385 = vmatmul.mubr.bf16.gmra.mrb[20].mxu0 %v2666_v7  ;;  %2453 = vmatmul.mubr.bf16.gmra.mrb[20].mxu1 %v2667_v8 }
  0x7a   : > { %2388 = vmatprep.mubr.msk.bf16.mxu0 %vm2733_vm0, %v2732_v53  ;;  %2456 = vmatprep.mubr.msk.bf16.mxu1 %vm2733_vm0, %v2732_v53 }
  0x81   : > { %2389 = vmatmul.mubr.bf16.gmra.mrb[24].mxu0 %v2668_v9  ;;  %2457 = vmatmul.mubr.bf16.gmra.mrb[24].mxu1 %v2669_v10 }
  0x82   : > { %2392 = vmatprep.mubr.msk.bf16.mxu0 %vm2733_vm0, %v2732_v53  ;;  %2460 = vmatprep.mubr.msk.bf16.mxu1 %vm2733_vm0, %v2732_v53 }
  0x89   : > { %2393 = vmatmul.mubr.bf16.gmra.mrb[28].mxu0 %v2670_v11  ;;  %2461 = vmatmul.mubr.bf16.gmra.mrb[28].mxu1 %v2671_v12 }
  0x8a   : > { %2396 = vmatprep.mubr.msk.bf16.mxu0 %vm2733_vm0, %v2732_v53  ;;  %2464 = vmatprep.mubr.msk.bf16.mxu1 %vm2733_vm0, %v2732_v53 }
  0x91   : > { %2397 = vmatmul.mubr.bf16.gmra.mrb[32].mxu0 %v2672_v13  ;;  %2465 = vmatmul.mubr.bf16.gmra.mrb[32].mxu1 %v2673_v14 }
  0x92   : > { %2400 = vmatprep.mubr.msk.bf16.mxu0 %vm2733_vm0, %v2732_v53  ;;  %2468 = vmatprep.mubr.msk.bf16.mxu1 %vm2733_vm0, %v2732_v53 }
  0x99   : > { %2401 = vmatmul.mubr.bf16.gmra.mrb[36].mxu0 %v2674_v15  ;;  %2469 = vmatmul.mubr.bf16.gmra.mrb[36].mxu1 %v2675_v16 }
  0x9a   : > { %2404 = vmatprep.mubr.msk.bf16.mxu0 %vm2733_vm0, %v2732_v53  ;;  %2472 = vmatprep.mubr.msk.bf16.mxu1 %vm2733_vm0, %v2732_v53 }
  0xa1   : > { %2405 = vmatmul.mubr.bf16.gmra.mrb[40].mxu0 %v2676_v17  ;;  %2473 = vmatmul.mubr.bf16.gmra.mrb[40].mxu1 %v2677_v18 }
  0xa2   : > { %2408 = vmatprep.mubr.msk.bf16.mxu0 %vm2733_vm0, %v2732_v53  ;;  %2476 = vmatprep.mubr.msk.bf16.mxu1 %vm2733_vm0, %v2732_v53 }
  0xa9   : > { %2409 = vmatmul.mubr.bf16.gmra.mrb[44].mxu0 %v2678_v19  ;;  %2477 = vmatmul.mubr.bf16.gmra.mrb[44].mxu1 %v2679_v20 }
  0xaa   : > { %2412 = vmatprep.mubr.msk.bf16.mxu0 %vm2733_vm0, %v2732_v53  ;;  %2480 = vmatprep.mubr.msk.bf16.mxu1 %vm2733_vm0, %v2732_v53 }
  0xb1   : > { %2413 = vmatmul.mubr.bf16.gmra.mrb[48].mxu0 %v2680_v21  ;;  %2481 = vmatmul.mubr.bf16.gmra.mrb[48].mxu1 %v2681_v22 }
  0xb2   : > { %2500 = vmatprep.mubr.msk.bf16.mxu0 %vm2733_vm0, %v2732_v53  ;;  %2568 = vmatprep.mubr.msk.bf16.mxu1 %vm2733_vm0, %v2732_v53 }
  0xb9   : > { %2501 = vmatmul.mubr.bf16.vlgmr.msra.gmra.mrb[52].mxu0 %v2682_v23  ;;  %2569 = vmatmul.mubr.bf16.vlgmr.msra.gmra.mrb[52].mxu1 %v2683_v24 }
  0xba   : > { %2504 = vmatprep.mubr.msk.bf16.mxu0 %vm2733_vm0, %v2732_v53  ;;  %2572 = vmatprep.mubr.msk.bf16.mxu1 %vm2733_vm0, %v2732_v53 }
  0xc1   : > { %2505 = vmatmul.mubr.bf16.gmra.mrb[56].mxu0 %v2684_v25  ;;  %2573 = vmatmul.mubr.bf16.gmra.mrb[56].mxu1 %v2685_v26 }
  0xc2   : > { %2508 = vmatprep.mubr.msk.bf16.mxu0 %vm2733_vm0, %v2732_v53  ;;  %2576 = vmatprep.mubr.msk.bf16.mxu1 %vm2733_vm0, %v2732_v53 }
  0xc9   : > { %2509 = vmatmul.mubr.bf16.gmra.mrb[60].mxu0 %v2686_v27  ;;  %2577 = vmatmul.mubr.bf16.gmra.mrb[60].mxu1 %v2687_v28 }
  0xca   : > { %2512 = vmatprep.mubr.msk.bf16.mxu0 %vm2733_vm0, %v2732_v53  ;;  %2580 = vmatprep.mubr.msk.bf16.mxu1 %vm2733_vm0, %v2732_v53 }
  0xd1   : > { %2513 = vmatmul.mubr.bf16.gmra.mrb[64].mxu0 %v2688_v29  ;;  %2581 = vmatmul.mubr.bf16.gmra.mrb[64].mxu1 %v2689_v30 }
  0xd2   : > { %2516 = vmatprep.mubr.msk.bf16.mxu0 %vm2733_vm0, %v2732_v53  ;;  %2584 = vmatprep.mubr.msk.bf16.mxu1 %vm2733_vm0, %v2732_v53 }
  0xd9   : > { %2517 = vmatmul.mubr.bf16.gmra.mrb[68].mxu0 %v2690_v31  ;;  %2585 = vmatmul.mubr.bf16.gmra.mrb[68].mxu1 %v2691_v32 }
  0xda   : > { %2520 = vmatprep.mubr.msk.bf16.mxu0 %vm2733_vm0, %v2732_v53  ;;  %2588 = vmatprep.mubr.msk.bf16.mxu1 %vm2733_vm0, %v2732_v53 }
  0xe1   : > { %2521 = vmatmul.mubr.bf16.gmra.mrb[72].mxu0 %v2692_v33  ;;  %2589 = vmatmul.mubr.bf16.gmra.mrb[72].mxu1 %v2693_v34 }
  0xe2   : > { %2524 = vmatprep.mubr.msk.bf16.mxu0 %vm2733_vm0, %v2732_v53  ;;  %2592 = vmatprep.mubr.msk.bf16.mxu1 %vm2733_vm0, %v2732_v53 }
  0xe9   : > { %2525 = vmatmul.mubr.bf16.gmra.mrb[76].mxu0 %v2694_v35  ;;  %2593 = vmatmul.mubr.bf16.gmra.mrb[76].mxu1 %v2695_v36 }
  0xea   : > { %2528 = vmatprep.mubr.msk.bf16.mxu0 %vm2733_vm0, %v2732_v53  ;;  %2596 = vmatprep.mubr.msk.bf16.mxu1 %vm2733_vm0, %v2732_v53 }
  0xf1   : > { %2529 = vmatmul.mubr.bf16.gmra.mrb[80].mxu0 %v2696_v37  ;;  %2597 = vmatmul.mubr.bf16.gmra.mrb[80].mxu1 %v2697_v38 }
  0xf2   : > { %2532 = vmatprep.mubr.msk.bf16.mxu0 %vm2733_vm0, %v2732_v53  ;;  %2600 = vmatprep.mubr.msk.bf16.mxu1 %vm2733_vm0, %v2732_v53 }
  0xf9   : > { %2533 = vmatmul.mubr.bf16.gmra.mrb[84].mxu0 %v2698_v39  ;;  %2601 = vmatmul.mubr.bf16.gmra.mrb[84].mxu1 %v2699_v40 }
  0xfa   : > { %2536 = vmatprep.mubr.msk.bf16.mxu0 %vm2733_vm0, %v2732_v53  ;;  %2604 = vmatprep.mubr.msk.bf16.mxu1 %vm2733_vm0, %v2732_v53 }
 0x101   : > { %2537 = vmatmul.mubr.bf16.gmra.mrb[88].mxu0 %v2700_v41  ;;  %2605 = vmatmul.mubr.bf16.gmra.mrb[88].mxu1 %v2701_v42 }
 0x102   : > { %2540 = vmatprep.mubr.msk.bf16.mxu0 %vm2733_vm0, %v2732_v53  ;;  %2608 = vmatprep.mubr.msk.bf16.mxu1 %vm2733_vm0, %v2732_v53 }
 0x109   : > { %2541 = vmatmul.mubr.bf16.gmra.mrb[92].mxu0 %v2702_v43  ;;  %2609 = vmatmul.mubr.bf16.gmra.mrb[92].mxu1 %v2703_v44 }
 0x10a   : > { %2544 = vmatprep.mubr.msk.bf16.mxu0 %vm2733_vm0, %v2732_v53  ;;  %2612 = vmatprep.mubr.msk.bf16.mxu1 %vm2733_vm0, %v2732_v53 }
 0x111   : > { %2545 = vmatmul.mubr.bf16.gmra.mrb[96].mxu0 %v2704_v45  ;;  %2613 = vmatmul.mubr.bf16.gmra.mrb[96].mxu1 %v2705_v46 }
 0x112   : > { %2548 = vmatprep.mubr.msk.bf16.mxu0 %vm2733_vm0, %v2732_v53  ;;  %2616 = vmatprep.mubr.msk.bf16.mxu1 %vm2733_vm0, %v2732_v53 }
 0x119   : > { %2549 = vmatmul.mubr.bf16.gmra.mrb[100].mxu0 %v2706_v47  ;;  %2617 = vmatmul.mubr.bf16.gmra.mrb[100].mxu1 %v2707_v48 }
 0x124   : > { %v818_v50 = vpop.f32.mrb[0].mxu0  ;;  %v1081_v51 = vpop.f32.mrb[0].mxu1 }
 0x125   : > { %v819_v52 = vadd.f32 %v3116_v49, %v818_v50  ;;  %v1082_v54 = vadd.f32 %v3116_v49, %v1081_v51  ;;  %v2366_v55 = vpop.f32.mrb[1].mxu0  ;;  %v2434_v56 = vpop.f32.mrb[1].mxu1 }
 0x126   : > { %v821_v57 = vpop.f32.mrb[2].mxu0  ;;  %v1084_v58 = vpop.f32.mrb[2].mxu1 }
 0x127   : > { %v920_v53 = vmax.f32 %v819_v52, 0.0  ;;  %v1183_v59 = vmax.f32 %v1082_v54, 0.0  ;;  %v822_v60 = vadd.f32 %v3116_v49, %v821_v57  ;;  %v1085_v61 = vadd.f32 %v3116_v49, %v1084_v58  ;;  %v2367_v62 = vpop.f32.mrb[3].mxu0  ;;  %v2435_v63 = vpop.f32.mrb[3].mxu1 }
 0x129   : > { %v3122_v0 = vmax.f32 %v920_v53, %v1183_v59  ;;  %v921_v1 = vmax.f32 %v822_v60, 0.0  ;;  %v1184_v2 = vmax.f32 %v1085_v61, 0.0 }
 0x12b   : > { %v3124_v3 = vmax.f32 %v921_v1, %v1184_v2 }
 0x12c   : > { %v826_v4 = vpop.f32.mrb[4].mxu0  ;;  %v1089_v5 = vpop.f32.mrb[4].mxu1 }
 0x12d   : > { %v827_v6 = vadd.f32 %v3116_v49, %v826_v4  ;;  %v1090_v7 = vadd.f32 %v3116_v49, %v1089_v5  ;;  %v2370_v8 = vpop.f32.mrb[5].mxu0  ;;  %v2438_v9 = vpop.f32.mrb[5].mxu1 }
 0x12e   : > { %v829_v10 = vpop.f32.mrb[6].mxu0  ;;  %v1092_v11 = vpop.f32.mrb[6].mxu1 }
 0x12f   : > { %v922_v12 = vmax.f32 %v827_v6, 0.0  ;;  %v1185_v13 = vmax.f32 %v1090_v7, 0.0  ;;  %v830_v14 = vadd.f32 %v3116_v49, %v829_v10  ;;  %v1093_v15 = vadd.f32 %v3116_v49, %v1092_v11  ;;  %v2371_v16 = vpop.f32.mrb[7].mxu0  ;;  %v2439_v17 = vpop.f32.mrb[7].mxu1 }
 0x131   : > { %v3130_v18 = vmax.f32 %v922_v12, %v1185_v13  ;;  %v923_v19 = vmax.f32 %v830_v14, 0.0  ;;  %v1186_v20 = vmax.f32 %v1093_v15, 0.0 }
 0x133   : > { %v3132_v21 = vmax.f32 %v923_v19, %v1186_v20 }
 0x134   : > { %v834_v22 = vpop.f32.mrb[8].mxu0  ;;  %v1097_v23 = vpop.f32.mrb[8].mxu1 }
 0x135   : > { %v835_v24 = vadd.f32 %v3116_v49, %v834_v22  ;;  %v1098_v25 = vadd.f32 %v3116_v49, %v1097_v23  ;;  %v2374_v26 = vpop.f32.mrb[9].mxu0  ;;  %v2442_v27 = vpop.f32.mrb[9].mxu1 }
 0x136   : > { %v837_v28 = vpop.f32.mrb[10].mxu0  ;;  %v1100_v29 = vpop.f32.mrb[10].mxu1 }
 0x137   : > { %v924_v30 = vmax.f32 %v835_v24, 0.0  ;;  %v1187_v31 = vmax.f32 %v1098_v25, 0.0  ;;  %v838_v32 = vadd.f32 %v3116_v49, %v837_v28  ;;  %v1101_v33 = vadd.f32 %v3116_v49, %v1100_v29  ;;  %v2375_v34 = vpop.f32.mrb[11].mxu0  ;;  %v2443_v35 = vpop.f32.mrb[11].mxu1 }
 0x139   : > { %v3138_v36 = vmax.f32 %v924_v30, %v1187_v31  ;;  %v925_v37 = vmax.f32 %v838_v32, 0.0  ;;  %v1188_v38 = vmax.f32 %v1101_v33, 0.0 }
 0x13b   : > { %v3140_v39 = vmax.f32 %v925_v37, %v1188_v38 }
 0x13c   : > { %v842_v40 = vpop.f32.mrb[12].mxu0  ;;  %v1105_v41 = vpop.f32.mrb[12].mxu1 }
 0x13d   : > { %v843_v42 = vadd.f32 %v3116_v49, %v842_v40  ;;  %v1106_v43 = vadd.f32 %v3116_v49, %v1105_v41  ;;  %v2378_v44 = vpop.f32.mrb[13].mxu0  ;;  %v2446_v45 = vpop.f32.mrb[13].mxu1 }
 0x13e   : > { %v845_v46 = vpop.f32.mrb[14].mxu0  ;;  %v1108_v47 = vpop.f32.mrb[14].mxu1 }
 0x13f   : > { %v926_v48 = vmax.f32 %v843_v42, 0.0  ;;  %v1189_v50 = vmax.f32 %v1106_v43, 0.0  ;;  %v846_v51 = vadd.f32 %v3116_v49, %v845_v46  ;;  %v1109_v52 = vadd.f32 %v3116_v49, %v1108_v47  ;;  %v2379_v54 = vpop.f32.mrb[15].mxu0  ;;  %v2447_v55 = vpop.f32.mrb[15].mxu1 }
 0x141   : > { %v3146_v56 = vmax.f32 %v926_v48, %v1189_v50  ;;  %v927_v57 = vmax.f32 %v846_v51, 0.0  ;;  %v1190_v58 = vmax.f32 %v1109_v52, 0.0 }
 0x143   : > { %v3148_v53 = vmax.f32 %v927_v57, %v1190_v58 }
 0x144   : > { %v850_v59 = vpop.f32.mrb[16].mxu0  ;;  %v1113_v60 = vpop.f32.mrb[16].mxu1 }
 0x145   : > { %v851_v61 = vadd.f32 %v3116_v49, %v850_v59  ;;  %v1114_v62 = vadd.f32 %v3116_v49, %v1113_v60  ;;  %v2382_v63 = vpop.f32.mrb[17].mxu0  ;;  %v2450_v1 = vpop.f32.mrb[17].mxu1 }
 0x146   : > { %v853_v2 = vpop.f32.mrb[18].mxu0  ;;  %v1116_v4 = vpop.f32.mrb[18].mxu1 }
 0x147   : > { %v928_v5 = vmax.f32 %v851_v61, 0.0  ;;  %v1191_v6 = vmax.f32 %v1114_v62, 0.0  ;;  %v854_v7 = vadd.f32 %v3116_v49, %v853_v2  ;;  %v1117_v8 = vadd.f32 %v3116_v49, %v1116_v4  ;;  %v2383_v9 = vpop.f32.mrb[19].mxu0  ;;  %v2451_v10 = vpop.f32.mrb[19].mxu1 }
 0x149   : > { %v3154_v11 = vmax.f32 %v928_v5, %v1191_v6  ;;  %v929_v12 = vmax.f32 %v854_v7, 0.0  ;;  %v1192_v13 = vmax.f32 %v1117_v8, 0.0 }
 0x14b   : > { %v3156_v14 = vmax.f32 %v929_v12, %v1192_v13 }
 0x14c   : > { %v858_v15 = vpop.f32.mrb[20].mxu0  ;;  %v1121_v16 = vpop.f32.mrb[20].mxu1 }
 0x14d   : > { %v859_v17 = vadd.f32 %v3116_v49, %v858_v15  ;;  %v1122_v19 = vadd.f32 %v3116_v49, %v1121_v16  ;;  %v2386_v20 = vpop.f32.mrb[21].mxu0  ;;  %v2454_v22 = vpop.f32.mrb[21].mxu1 }
 0x14e   : > { %v861_v23 = vpop.f32.mrb[22].mxu0  ;;  %v1124_v24 = vpop.f32.mrb[22].mxu1 }
 0x14f   : > { %v930_v25 = vmax.f32 %v859_v17, 0.0  ;;  %v1193_v26 = vmax.f32 %v1122_v19, 0.0  ;;  %v862_v27 = vadd.f32 %v3116_v49, %v861_v23  ;;  %v1125_v28 = vadd.f32 %v3116_v49, %v1124_v24  ;;  %v2387_v29 = vpop.f32.mrb[23].mxu0  ;;  %v2455_v30 = vpop.f32.mrb[23].mxu1 }
 0x151   : > { %v3162_v31 = vmax.f32 %v930_v25, %v1193_v26  ;;  %v931_v32 = vmax.f32 %v862_v27, 0.0  ;;  %v1194_v33 = vmax.f32 %v1125_v28, 0.0 }
 0x153   : > { %v3164_v34 = vmax.f32 %v931_v32, %v1194_v33 }
 0x154   : > { %v866_v35 = vpop.f32.mrb[24].mxu0  ;;  %v1129_v37 = vpop.f32.mrb[24].mxu1 }
 0x155   : > { %v867_v38 = vadd.f32 %v3116_v49, %v866_v35  ;;  %v1130_v40 = vadd.f32 %v3116_v49, %v1129_v37  ;;  %v2390_v41 = vpop.f32.mrb[25].mxu0  ;;  %v2458_v42 = vpop.f32.mrb[25].mxu1 }
 0x156   : > { %v869_v43 = vpop.f32.mrb[26].mxu0  ;;  %v1132_v44 = vpop.f32.mrb[26].mxu1 }
 0x157   : > { %v932_v45 = vmax.f32 %v867_v38, 0.0  ;;  %v1195_v46 = vmax.f32 %v1130_v40, 0.0  ;;  %v870_v47 = vadd.f32 %v3116_v49, %v869_v43  ;;  %v1133_v48 = vadd.f32 %v3116_v49, %v1132_v44  ;;  %v2391_v50 = vpop.f32.mrb[27].mxu0  ;;  %v2459_v51 = vpop.f32.mrb[27].mxu1 }
 0x159   : > { %v3170_v52 = vmax.f32 %v932_v45, %v1195_v46  ;;  %v933_v54 = vmax.f32 %v870_v47, 0.0  ;;  %v1196_v55 = vmax.f32 %v1133_v48, 0.0 }
 0x15b   : > { %v3172_v57 = vmax.f32 %v933_v54, %v1196_v55 }
 0x15c   : > { %v874_v58 = vpop.f32.mrb[28].mxu0  ;;  %v1137_v59 = vpop.f32.mrb[28].mxu1 }
 0x15d   : > { %v875_v60 = vadd.f32 %v3116_v49, %v874_v58  ;;  %v1138_v61 = vadd.f32 %v3116_v49, %v1137_v59  ;;  %v2394_v62 = vpop.f32.mrb[29].mxu0  ;;  %v2462_v63 = vpop.f32.mrb[29].mxu1 }
 0x15e   : > { %v877_v1 = vpop.f32.mrb[30].mxu0  ;;  %v1140_v2 = vpop.f32.mrb[30].mxu1 }
 0x15f   : > { %v934_v4 = vmax.f32 %v875_v60, 0.0  ;;  %v1197_v5 = vmax.f32 %v1138_v61, 0.0  ;;  %v878_v6 = vadd.f32 %v3116_v49, %v877_v1  ;;  %v1141_v7 = vadd.f32 %v3116_v49, %v1140_v2  ;;  %v2395_v8 = vpop.f32.mrb[31].mxu0  ;;  %v2463_v9 = vpop.f32.mrb[31].mxu1 }
 0x161   : > { %v3178_v10 = vmax.f32 %v934_v4, %v1197_v5  ;;  %v935_v12 = vmax.f32 %v878_v6, 0.0  ;;  %v1198_v13 = vmax.f32 %v1141_v7, 0.0 }
 0x163   : > { %v3180_v15 = vmax.f32 %v935_v12, %v1198_v13 }
 0x164   : > { %v882_v16 = vpop.f32.mrb[32].mxu0  ;;  %v1145_v17 = vpop.f32.mrb[32].mxu1 }
 0x165   : > { %v883_v19 = vadd.f32 %v3116_v49, %v882_v16  ;;  %v1146_v20 = vadd.f32 %v3116_v49, %v1145_v17  ;;  %v2398_v22 = vpop.f32.mrb[33].mxu0  ;;  %v2466_v23 = vpop.f32.mrb[33].mxu1 }
 0x166   : > { %v885_v24 = vpop.f32.mrb[34].mxu0  ;;  %v1148_v25 = vpop.f32.mrb[34].mxu1 }
 0x167   : > { %v936_v26 = vmax.f32 %v883_v19, 0.0  ;;  %v1199_v27 = vmax.f32 %v1146_v20, 0.0  ;;  %v886_v28 = vadd.f32 %v3116_v49, %v885_v24  ;;  %v1149_v29 = vadd.f32 %v3116_v49, %v1148_v25  ;;  %v2399_v30 = vpop.f32.mrb[35].mxu0  ;;  %v2467_v32 = vpop.f32.mrb[35].mxu1 }
 0x169   : > { %v3186_v33 = vmax.f32 %v936_v26, %v1199_v27  ;;  %v937_v35 = vmax.f32 %v886_v28, 0.0  ;;  %v1200_v37 = vmax.f32 %v1149_v29, 0.0 }
 0x16b   : > { %v3188_v38 = vmax.f32 %v937_v35, %v1200_v37 }
 0x16c   : > { %v890_v40 = vpop.f32.mrb[36].mxu0  ;;  %v1153_v41 = vpop.f32.mrb[36].mxu1 }
 0x16d   : > { %v891_v42 = vadd.f32 %v3116_v49, %v890_v40  ;;  %v1154_v43 = vadd.f32 %v3116_v49, %v1153_v41  ;;  %v2402_v44 = vpop.f32.mrb[37].mxu0  ;;  %v2470_v45 = vpop.f32.mrb[37].mxu1 }
 0x16e   : > { %v893_v46 = vpop.f32.mrb[38].mxu0  ;;  %v1156_v47 = vpop.f32.mrb[38].mxu1 }
 0x16f   : > { %v938_v48 = vmax.f32 %v891_v42, 0.0  ;;  %v1201_v50 = vmax.f32 %v1154_v43, 0.0  ;;  %v894_v51 = vadd.f32 %v3116_v49, %v893_v46  ;;  %v1157_v54 = vadd.f32 %v3116_v49, %v1156_v47  ;;  %v2403_v55 = vpop.f32.mrb[39].mxu0  ;;  %v2471_v58 = vpop.f32.mrb[39].mxu1 }
 0x171   : > { %v3194_v59 = vmax.f32 %v938_v48, %v1201_v50  ;;  %v939_v60 = vmax.f32 %v894_v51, 0.0  ;;  %v1202_v61 = vmax.f32 %v1157_v54, 0.0 }
 0x173   : > { %v3196_v62 = vmax.f32 %v939_v60, %v1202_v61 }
 0x174   : > { %v898_v63 = vpop.f32.mrb[40].mxu0  ;;  %v1161_v1 = vpop.f32.mrb[40].mxu1 }
 0x175   : > { %v899_v2 = vadd.f32 %v3116_v49, %v898_v63  ;;  %v1162_v4 = vadd.f32 %v3116_v49, %v1161_v1  ;;  %v2406_v5 = vpop.f32.mrb[41].mxu0  ;;  %v2474_v6 = vpop.f32.mrb[41].mxu1 }
 0x176   : > { %v901_v7 = vpop.f32.mrb[42].mxu0  ;;  %v1164_v8 = vpop.f32.mrb[42].mxu1 }
 0x177   : > { %v940_v9 = vmax.f32 %v899_v2, 0.0  ;;  %v1203_v12 = vmax.f32 %v1162_v4, 0.0  ;;  %v902_v13 = vadd.f32 %v3116_v49, %v901_v7  ;;  %v1165_v16 = vadd.f32 %v3116_v49, %v1164_v8  ;;  %v2407_v17 = vpop.f32.mrb[43].mxu0  ;;  %v2475_v19 = vpop.f32.mrb[43].mxu1 }
 0x179   : > { %v3202_v20 = vmax.f32 %v940_v9, %v1203_v12  ;;  %v941_v22 = vmax.f32 %v902_v13, 0.0  ;;  %v1204_v23 = vmax.f32 %v1165_v16, 0.0 }
 0x17b   : > { %v3204_v24 = vmax.f32 %v941_v22, %v1204_v23 }
 0x17c   : > { %v906_v25 = vpop.f32.mrb[44].mxu0  ;;  %v1169_v26 = vpop.f32.mrb[44].mxu1 }
 0x17d   : > { %v907_v27 = vadd.f32 %v3116_v49, %v906_v25  ;;  %v1170_v28 = vadd.f32 %v3116_v49, %v1169_v26  ;;  %v2410_v29 = vpop.f32.mrb[45].mxu0  ;;  %v2478_v30 = vpop.f32.mrb[45].mxu1 }
 0x17e   : > { %v909_v32 = vpop.f32.mrb[46].mxu0  ;;  %v1172_v35 = vpop.f32.mrb[46].mxu1 }
 0x17f   : > { %v942_v37 = vmax.f32 %v907_v27, 0.0  ;;  %v1205_v40 = vmax.f32 %v1170_v28, 0.0  ;;  %v910_v41 = vadd.f32 %v3116_v49, %v909_v32  ;;  %v1173_v42 = vadd.f32 %v3116_v49, %v1172_v35  ;;  %v2411_v43 = vpop.f32.mrb[47].mxu0  ;;  %v2479_v44 = vpop.f32.mrb[47].mxu1 }
 0x181   : > { %v3210_v45 = vmax.f32 %v942_v37, %v1205_v40  ;;  %v943_v46 = vmax.f32 %v910_v41, 0.0  ;;  %v1206_v47 = vmax.f32 %v1173_v42, 0.0 }
 0x183   : > { %v3212_v48 = vmax.f32 %v943_v46, %v1206_v47 }
 0x184   : > { %v914_v50 = vpop.f32.mrb[48].mxu0  ;;  %v1177_v51 = vpop.f32.mrb[48].mxu1 }
 0x185   : > { %v915_v54 = vadd.f32 %v3116_v49, %v914_v50  ;;  %v1178_v55 = vadd.f32 %v3116_v49, %v1177_v51  ;;  %v2414_v58 = vpop.f32.mrb[49].mxu0  ;;  %v2482_v60 = vpop.f32.mrb[49].mxu1 }
 0x186   : > { %v917_v61 = vpop.f32.mrb[50].mxu0  ;;  %v1180_v63 = vpop.f32.mrb[50].mxu1 }
 0x187   : > { %v944_v1 = vmax.f32 %v915_v54, 0.0  ;;  %v1207_v2 = vmax.f32 %v1178_v55, 0.0  ;;  %v2415_v4 = vpop.f32.mrb[51].mxu0  ;;  %v2483_v5 = vpop.f32.mrb[51].mxu1 }
 0x189   : > { %v3218_v6 = vmax.f32 %v944_v1, %v1207_v2 }
 0x18c   : > { %v1369_v7 = vpop.f32.mrb[52].mxu0  ;;  %v1632_v8 = vpop.f32.mrb[52].mxu1 }
 0x18d   : > { %v1370_v9 = vadd.f32 %v3116_v49, %v1369_v7  ;;  %v1633_v12 = vadd.f32 %v3116_v49, %v1632_v8  ;;  %v2502_v13 = vpop.f32.mrb[53].mxu0  ;;  %v2570_v16 = vpop.f32.mrb[53].mxu1 }
 0x18e   : > { %v1372_v17 = vpop.f32.mrb[54].mxu0  ;;  %v1635_v19 = vpop.f32.mrb[54].mxu1 }
 0x18f   : > { %v1471_v22 = vmax.f32 %v1370_v9, 0.0  ;;  %v1734_v23 = vmax.f32 %v1633_v12, 0.0  ;;  %v1373_v25 = vadd.f32 %v3116_v49, %v1372_v17  ;;  %v1636_v26 = vadd.f32 %v3116_v49, %v1635_v19  ;;  %v2503_v27 = vpop.f32.mrb[55].mxu0  ;;  %v2571_v28 = vpop.f32.mrb[55].mxu1 }
 0x191   : > { %v1759_v29 = vmax.f32 %v1471_v22, %v1734_v23  ;;  %v1472_v30 = vmax.f32 %v1373_v25, 0.0  ;;  %v1735_v32 = vmax.f32 %v1636_v26, 0.0 }
 0x193   : > { %v1784_v35 = vmax.f32 %v3122_v0, %v1759_v29  ;;  %v1760_v37 = vmax.f32 %v1472_v30, %v1735_v32 }
 0x194   : > { %v1377_v40 = vpop.f32.mrb[56].mxu0  ;;  %v1640_v41 = vpop.f32.mrb[56].mxu1 }
 0x195   : > { %v1785_v42 = vmax.f32 %v3124_v3, %v1760_v37  ;;  %v1378_v43 = vadd.f32 %v3116_v49, %v1377_v40  ;;  %v1641_v44 = vadd.f32 %v3116_v49, %v1640_v41  ;;  %v2506_v46 = vpop.f32.mrb[57].mxu0  ;;  %v2574_v47 = vpop.f32.mrb[57].mxu1 }
 0x196   : > { %v1380_v50 = vpop.f32.mrb[58].mxu0  ;;  %v1643_v0 = vpop.f32.mrb[58].mxu1 }
 0x197   : > { %v2196_v51 = vpack.c.bf16 %v1785_v42, %v1784_v35  ;;  %v1473_v54 = vmax.f32 %v1378_v43, 0.0  ;;  %v1736_v55 = vmax.f32 %v1641_v44, 0.0  ;;  %v1381_v58 = vadd.f32 %v3116_v49, %v1380_v50  ;;  %v2507_v3 = vpop.f32.mrb[59].mxu0  ;;  %v2575_v60 = vpop.f32.mrb[59].mxu1 }
 0x198   : > { %v1644_v61 = vadd.f32 %v3116_v49, %v1643_v0 }
 0x199   : > { %2197 = vst [vmem:[%s3231_s28] sm:$0xff] %v2196_v51   ;;  %v1761_v63 = vmax.f32 %v1473_v54, %v1736_v55  ;;  %v1474_v1 = vmax.f32 %v1381_v58, 0.0 }
 0x19a   : > { %v1737_v2 = vmax.f32 %v1644_v61, 0.0 }
 0x19b   : > { %v1786_v4 = vmax.f32 %v3130_v18, %v1761_v63 }
 0x19c   : > { %v1762_v5 = vmax.f32 %v1474_v1, %v1737_v2  ;;  %v1385_v7 = vpop.f32.mrb[60].mxu0  ;;  %v1648_v8 = vpop.f32.mrb[60].mxu1 }
 0x19d   : > { %v1386_v9 = vadd.f32 %v3116_v49, %v1385_v7  ;;  %v1649_v12 = vadd.f32 %v3116_v49, %v1648_v8  ;;  %v2510_v13 = vpop.f32.mrb[61].mxu0  ;;  %v2578_v16 = vpop.f32.mrb[61].mxu1 }
 0x19e   : > { %v1787_v17 = vmax.f32 %v3132_v21, %v1762_v5  ;;  %v1388_v19 = vpop.f32.mrb[62].mxu0  ;;  %v1651_v22 = vpop.f32.mrb[62].mxu1 }
 0x19f   : > { %v1475_v23 = vmax.f32 %v1386_v9, 0.0  ;;  %v1738_v25 = vmax.f32 %v1649_v12, 0.0  ;;  %v1389_v26 = vadd.f32 %v3116_v49, %v1388_v19  ;;  %v1652_v18 = vadd.f32 %v3116_v49, %v1651_v22  ;;  %v2511_v27 = vpop.f32.mrb[63].mxu0  ;;  %v2579_v28 = vpop.f32.mrb[63].mxu1 }
 0x1a0   : > { %v2201_v29 = vpack.c.bf16 %v1787_v17, %v1786_v4 }
 0x1a1   : > { %v1763_v30 = vmax.f32 %v1475_v23, %v1738_v25  ;;  %v1476_v32 = vmax.f32 %v1389_v26, 0.0  ;;  %v1739_v35 = vmax.f32 %v1652_v18, 0.0 }
 0x1a2   : > { %2253 = vst [vmem:[%s3231_s28 + $0x8] sm:$0xff] %v2201_v29  }
 0x1a3   : > { %v1788_v37 = vmax.f32 %v3138_v36, %v1763_v30  ;;  %v1764_v40 = vmax.f32 %v1476_v32, %v1739_v35 }
 0x1a4   : > { %v1393_v41 = vpop.f32.mrb[64].mxu0  ;;  %v1656_v21 = vpop.f32.mrb[64].mxu1 }
 0x1a5   : > { %v1789_v42 = vmax.f32 %v3140_v39, %v1764_v40  ;;  %v1394_v43 = vadd.f32 %v3116_v49, %v1393_v41  ;;  %v1657_v44 = vadd.f32 %v3116_v49, %v1656_v21  ;;  %v2514_v46 = vpop.f32.mrb[65].mxu0  ;;  %v2582_v47 = vpop.f32.mrb[65].mxu1 }
 0x1a6   : > { %v1396_v50 = vpop.f32.mrb[66].mxu0  ;;  %v1659_v0 = vpop.f32.mrb[66].mxu1 }
 0x1a7   : > { %v2206_v51 = vpack.c.bf16 %v1789_v42, %v1788_v37  ;;  %v1477_v54 = vmax.f32 %v1394_v43, 0.0  ;;  %v1740_v55 = vmax.f32 %v1657_v44, 0.0  ;;  %v1397_v58 = vadd.f32 %v3116_v49, %v1396_v50  ;;  %v2515_v36 = vpop.f32.mrb[67].mxu0  ;;  %v2583_v3 = vpop.f32.mrb[67].mxu1 }
 0x1a8   : > { %v1660_v60 = vadd.f32 %v3116_v49, %v1659_v0 }
 0x1a9   : > { %2254 = vst [vmem:[%s3231_s28 + $0x10] sm:$0xff] %v2206_v51   ;;  %v1765_v61 = vmax.f32 %v1477_v54, %v1740_v55  ;;  %v1478_v39 = vmax.f32 %v1397_v58, 0.0 }
 0x1aa   : > { %v1741_v63 = vmax.f32 %v1660_v60, 0.0 }
 0x1ab   : > { %v1790_v1 = vmax.f32 %v3146_v56, %v1765_v61 }
 0x1ac   : > { %v1766_v2 = vmax.f32 %v1478_v39, %v1741_v63  ;;  %v1401_v4 = vpop.f32.mrb[68].mxu0  ;;  %v1664_v5 = vpop.f32.mrb[68].mxu1 }
 0x1ad   : > { %v1402_v7 = vadd.f32 %v3116_v49, %v1401_v4  ;;  %v1665_v8 = vadd.f32 %v3116_v49, %v1664_v5  ;;  %v2518_v9 = vpop.f32.mrb[69].mxu0  ;;  %v2586_v12 = vpop.f32.mrb[69].mxu1 }
 0x1ae   : > { %v1791_v13 = vmax.f32 %v3148_v53, %v1766_v2  ;;  %v1404_v16 = vpop.f32.mrb[70].mxu0  ;;  %v1667_v17 = vpop.f32.mrb[70].mxu1 }
 0x1af   : > { %v1479_v19 = vmax.f32 %v1402_v7, 0.0  ;;  %v1742_v22 = vmax.f32 %v1665_v8, 0.0  ;;  %v1405_v23 = vadd.f32 %v3116_v49, %v1404_v16  ;;  %v1668_v56 = vadd.f32 %v3116_v49, %v1667_v17  ;;  %v2519_v25 = vpop.f32.mrb[71].mxu0  ;;  %v2587_v26 = vpop.f32.mrb[71].mxu1 }
 0x1b0   : > { %v2211_v18 = vpack.c.bf16 %v1791_v13, %v1790_v1 }
 0x1b1   : > { %v1767_v27 = vmax.f32 %v1479_v19, %v1742_v22  ;;  %v1480_v28 = vmax.f32 %v1405_v23, 0.0  ;;  %v1743_v29 = vmax.f32 %v1668_v56, 0.0 }
 0x1b2   : > { %2255 = vst [vmem:[%s3231_s28 + $0x18] sm:$0xff] %v2211_v18  }
 0x1b3   : > { %v1792_v30 = vmax.f32 %v3154_v11, %v1767_v27  ;;  %v1768_v32 = vmax.f32 %v1480_v28, %v1743_v29 }
 0x1b4   : > { %v1409_v35 = vpop.f32.mrb[72].mxu0  ;;  %v1672_v53 = vpop.f32.mrb[72].mxu1 }
 0x1b5   : > { %v1793_v37 = vmax.f32 %v3156_v14, %v1768_v32  ;;  %v1410_v40 = vadd.f32 %v3116_v49, %v1409_v35  ;;  %v1673_v41 = vadd.f32 %v3116_v49, %v1672_v53  ;;  %v2522_v21 = vpop.f32.mrb[73].mxu0  ;;  %v2590_v42 = vpop.f32.mrb[73].mxu1 }
 0x1b6   : > { %v1412_v43 = vpop.f32.mrb[74].mxu0  ;;  %v1675_v44 = vpop.f32.mrb[74].mxu1 }
 0x1b7   : > { %v2216_v46 = vpack.c.bf16 %v1793_v37, %v1792_v30  ;;  %v1481_v47 = vmax.f32 %v1410_v40, 0.0  ;;  %v1744_v50 = vmax.f32 %v1673_v41, 0.0  ;;  %v1413_v0 = vadd.f32 %v3116_v49, %v1412_v43  ;;  %v2523_v11 = vpop.f32.mrb[75].mxu0  ;;  %v2591_v51 = vpop.f32.mrb[75].mxu1 }
 0x1b8   : > { %v1676_v54 = vadd.f32 %v3116_v49, %v1675_v44 }
 0x1b9   : > { %2256 = vst [vmem:[%s3231_s28 + $0x20] sm:$0xff] %v2216_v46   ;;  %v1769_v55 = vmax.f32 %v1481_v47, %v1744_v50  ;;  %v1482_v14 = vmax.f32 %v1413_v0, 0.0 }
 0x1ba   : > { %v1745_v58 = vmax.f32 %v1676_v54, 0.0 }
 0x1bb   : > { %v1794_v36 = vmax.f32 %v3162_v31, %v1769_v55 }
 0x1bc   : > { %v1770_v3 = vmax.f32 %v1482_v14, %v1745_v58  ;;  %v1417_v60 = vpop.f32.mrb[76].mxu0  ;;  %v1680_v61 = vpop.f32.mrb[76].mxu1 }
 0x1bd   : > { %v1418_v39 = vadd.f32 %v3116_v49, %v1417_v60  ;;  %v1681_v63 = vadd.f32 %v3116_v49, %v1680_v61  ;;  %v2526_v1 = vpop.f32.mrb[77].mxu0  ;;  %v2594_v2 = vpop.f32.mrb[77].mxu1 }
 0x1be   : > { %v1795_v4 = vmax.f32 %v3164_v34, %v1770_v3  ;;  %v1420_v5 = vpop.f32.mrb[78].mxu0  ;;  %v1683_v7 = vpop.f32.mrb[78].mxu1 }
 0x1bf   : > { %v1483_v8 = vmax.f32 %v1418_v39, 0.0  ;;  %v1746_v9 = vmax.f32 %v1681_v63, 0.0  ;;  %v1421_v12 = vadd.f32 %v3116_v49, %v1420_v5  ;;  %v1684_v31 = vadd.f32 %v3116_v49, %v1683_v7  ;;  %v2527_v13 = vpop.f32.mrb[79].mxu0  ;;  %v2595_v16 = vpop.f32.mrb[79].mxu1 }
 0x1c0   : > { %v2221_v17 = vpack.c.bf16 %v1795_v4, %v1794_v36 }
 0x1c1   : > { %v1771_v19 = vmax.f32 %v1483_v8, %v1746_v9  ;;  %v1484_v22 = vmax.f32 %v1421_v12, 0.0  ;;  %v1747_v23 = vmax.f32 %v1684_v31, 0.0 }
 0x1c2   : > { %2257 = vst [vmem:[%s3231_s28 + $0x28] sm:$0xff] %v2221_v17  }
 0x1c3   : > { %v1796_v56 = vmax.f32 %v3170_v52, %v1771_v19  ;;  %v1772_v25 = vmax.f32 %v1484_v22, %v1747_v23 }
 0x1c4   : > { %v1425_v26 = vpop.f32.mrb[80].mxu0  ;;  %v1688_v34 = vpop.f32.mrb[80].mxu1 }
 0x1c5   : > { %v1797_v18 = vmax.f32 %v3172_v57, %v1772_v25  ;;  %v1426_v27 = vadd.f32 %v3116_v49, %v1425_v26  ;;  %v1689_v28 = vadd.f32 %v3116_v49, %v1688_v34  ;;  %v2530_v29 = vpop.f32.mrb[81].mxu0  ;;  %v2598_v30 = vpop.f32.mrb[81].mxu1 }
 0x1c6   : > { %v1428_v32 = vpop.f32.mrb[82].mxu0  ;;  %v1691_v35 = vpop.f32.mrb[82].mxu1 }
 0x1c7   : > { %v2226_v53 = vpack.c.bf16 %v1797_v18, %v1796_v56  ;;  %v1485_v37 = vmax.f32 %v1426_v27, 0.0  ;;  %v1748_v40 = vmax.f32 %v1689_v28, 0.0  ;;  %v1429_v41 = vadd.f32 %v3116_v49, %v1428_v32  ;;  %v2531_v52 = vpop.f32.mrb[83].mxu0  ;;  %v2599_v21 = vpop.f32.mrb[83].mxu1 }
 0x1c8   : > { %v1692_v42 = vadd.f32 %v3116_v49, %v1691_v35 }
 0x1c9   : > { %2258 = vst [vmem:[%s3231_s28 + $0x30] sm:$0xff] %v2226_v53   ;;  %v1773_v43 = vmax.f32 %v1485_v37, %v1748_v40  ;;  %v1486_v57 = vmax.f32 %v1429_v41, 0.0 }
 0x1ca   : > { %v1749_v44 = vmax.f32 %v1692_v42, 0.0 }
 0x1cb   : > { %v1798_v46 = vmax.f32 %v3178_v10, %v1773_v43 }
 0x1cc   : > { %v1774_v47 = vmax.f32 %v1486_v57, %v1749_v44  ;;  %v1433_v50 = vpop.f32.mrb[84].mxu0  ;;  %v1696_v0 = vpop.f32.mrb[84].mxu1 }
 0x1cd   : > { %v1434_v11 = vadd.f32 %v3116_v49, %v1433_v50  ;;  %v1697_v51 = vadd.f32 %v3116_v49, %v1696_v0  ;;  %v2534_v54 = vpop.f32.mrb[85].mxu0  ;;  %v2602_v55 = vpop.f32.mrb[85].mxu1 }
 0x1ce   : > { %v1799_v14 = vmax.f32 %v3180_v15, %v1774_v47  ;;  %v1436_v58 = vpop.f32.mrb[86].mxu0  ;;  %v1699_v36 = vpop.f32.mrb[86].mxu1 }
 0x1cf   : > { %v1487_v3 = vmax.f32 %v1434_v11, 0.0  ;;  %v1750_v60 = vmax.f32 %v1697_v51, 0.0  ;;  %v1437_v61 = vadd.f32 %v3116_v49, %v1436_v58  ;;  %v1700_v10 = vadd.f32 %v3116_v49, %v1699_v36  ;;  %v2535_v39 = vpop.f32.mrb[87].mxu0  ;;  %v2603_v63 = vpop.f32.mrb[87].mxu1 }
 0x1d0   : > { %v2231_v1 = vpack.c.bf16 %v1799_v14, %v1798_v46 }
 0x1d1   : > { %v1775_v2 = vmax.f32 %v1487_v3, %v1750_v60  ;;  %v1488_v4 = vmax.f32 %v1437_v61, 0.0  ;;  %v1751_v5 = vmax.f32 %v1700_v10, 0.0 }
 0x1d2   : > { %2259 = vst [vmem:[%s3231_s28 + $0x38] sm:$0xff] %v2231_v1  }
 0x1d3   : > { %v1800_v7 = vmax.f32 %v3186_v33, %v1775_v2  ;;  %v1776_v8 = vmax.f32 %v1488_v4, %v1751_v5 }
 0x1d4   : > { %v1441_v9 = vpop.f32.mrb[88].mxu0  ;;  %v1704_v15 = vpop.f32.mrb[88].mxu1 }
 0x1d5   : > { %v1801_v12 = vmax.f32 %v3188_v38, %v1776_v8  ;;  %v1442_v31 = vadd.f32 %v3116_v49, %v1441_v9  ;;  %v1705_v13 = vadd.f32 %v3116_v49, %v1704_v15  ;;  %v2538_v16 = vpop.f32.mrb[89].mxu0  ;;  %v2606_v17 = vpop.f32.mrb[89].mxu1 }
 0x1d6   : > { %v1444_v19 = vpop.f32.mrb[90].mxu0  ;;  %v1707_v22 = vpop.f32.mrb[90].mxu1 }
 0x1d7   : > { %v2236_v23 = vpack.c.bf16 %v1801_v12, %v1800_v7  ;;  %v1489_v56 = vmax.f32 %v1442_v31, 0.0  ;;  %v1752_v25 = vmax.f32 %v1705_v13, 0.0  ;;  %v1445_v26 = vadd.f32 %v3116_v49, %v1444_v19  ;;  %v2539_v33 = vpop.f32.mrb[91].mxu0  ;;  %v2607_v34 = vpop.f32.mrb[91].mxu1 }
 0x1d8   : > { %v1708_v18 = vadd.f32 %v3116_v49, %v1707_v22 }
 0x1d9   : > { %2260 = vst [vmem:[%s3231_s28 + $0x40] sm:$0xff] %v2236_v23   ;;  %v1777_v27 = vmax.f32 %v1489_v56, %v1752_v25  ;;  %v1490_v38 = vmax.f32 %v1445_v26, 0.0 }
 0x1da   : > { %v1753_v28 = vmax.f32 %v1708_v18, 0.0 }
 0x1db   : > { %v1802_v29 = vmax.f32 %v3194_v59, %v1777_v27 }
 0x1dc   : > { %v1778_v30 = vmax.f32 %v1490_v38, %v1753_v28  ;;  %v1449_v32 = vpop.f32.mrb[92].mxu0  ;;  %v1712_v35 = vpop.f32.mrb[92].mxu1 }
 0x1dd   : > { %v1450_v53 = vadd.f32 %v3116_v49, %v1449_v32  ;;  %v1713_v37 = vadd.f32 %v3116_v49, %v1712_v35  ;;  %v2542_v40 = vpop.f32.mrb[93].mxu0  ;;  %v2610_v41 = vpop.f32.mrb[93].mxu1 }
 0x1de   : > { %v1803_v52 = vmax.f32 %v3196_v62, %v1778_v30  ;;  %v1452_v21 = vpop.f32.mrb[94].mxu0  ;;  %v1715_v42 = vpop.f32.mrb[94].mxu1 }
 0x1df   : > { %v1491_v43 = vmax.f32 %v1450_v53, 0.0  ;;  %v1754_v57 = vmax.f32 %v1713_v37, 0.0  ;;  %v1453_v44 = vadd.f32 %v3116_v49, %v1452_v21  ;;  %v1716_v59 = vadd.f32 %v3116_v49, %v1715_v42  ;;  %v2543_v46 = vpop.f32.mrb[95].mxu0  ;;  %v2611_v47 = vpop.f32.mrb[95].mxu1 }
 0x1e0   : > { %v2241_v50 = vpack.c.bf16 %v1803_v52, %v1802_v29 }
 0x1e1   : > { %v1779_v0 = vmax.f32 %v1491_v43, %v1754_v57  ;;  %v1492_v11 = vmax.f32 %v1453_v44, 0.0  ;;  %v1755_v51 = vmax.f32 %v1716_v59, 0.0 }
 0x1e2   : > { %2261 = vst [vmem:[%s3231_s28 + $0x48] sm:$0xff] %v2241_v50  }
 0x1e3   : > { %v1804_v54 = vmax.f32 %v3202_v20, %v1779_v0  ;;  %v1780_v55 = vmax.f32 %v1492_v11, %v1755_v51 }
 0x1e4   : > { %v1457_v14 = vpop.f32.mrb[96].mxu0  ;;  %v1720_v62 = vpop.f32.mrb[96].mxu1 }
 0x1e5   : > { %v1805_v58 = vmax.f32 %v3204_v24, %v1780_v55  ;;  %v1458_v36 = vadd.f32 %v3116_v49, %v1457_v14  ;;  %v1721_v3 = vadd.f32 %v3116_v49, %v1720_v62  ;;  %v2546_v60 = vpop.f32.mrb[97].mxu0  ;;  %v2614_v61 = vpop.f32.mrb[97].mxu1 }
 0x1e6   : > { %v1460_v10 = vpop.f32.mrb[98].mxu0  ;;  %v1723_v39 = vpop.f32.mrb[98].mxu1 }
 0x1e7   : > { %v2246_v63 = vpack.c.bf16 %v1805_v58, %v1804_v54  ;;  %v1493_v1 = vmax.f32 %v1458_v36, 0.0  ;;  %v1756_v2 = vmax.f32 %v1721_v3, 0.0  ;;  %v1461_v4 = vadd.f32 %v3116_v49, %v1460_v10  ;;  %v2547_v20 = vpop.f32.mrb[99].mxu0  ;;  %v2615_v5 = vpop.f32.mrb[99].mxu1 }
 0x1e8   : > { %v1724_v7 = vadd.f32 %v3116_v49, %v1723_v39 }
 0x1e9   : > { %2262 = vst [vmem:[%s3231_s28 + $0x50] sm:$0xff] %v2246_v63   ;;  %v1781_v8 = vmax.f32 %v1493_v1, %v1756_v2  ;;  %v1494_v24 = vmax.f32 %v1461_v4, 0.0 }
 0x1ea   : > { %v1757_v9 = vmax.f32 %v1724_v7, 0.0 }
 0x1eb   : > { %v1806_v15 = vmax.f32 %v3210_v45, %v1781_v8 }
 0x1ec   : > { %v1782_v12 = vmax.f32 %v1494_v24, %v1757_v9  ;;  %v1465_v31 = vpop.f32.mrb[100].mxu0  ;;  %v1728_v13 = vpop.f32.mrb[100].mxu1 }
 0x1ed   : > { %v1466_v16 = vadd.f32 %v3116_v49, %v1465_v31  ;;  %v1729_v17 = vadd.f32 %v3116_v49, %v1728_v13  ;;  %v2550_v19 = vpop.f32.mrb[101].mxu0  ;;  %v2618_v22 = vpop.f32.mrb[101].mxu1 }
 0x1ee   : > { %v1807_v23 = vmax.f32 %v3212_v48, %v1782_v12  ;;  %v1468_v56 = vpop.f32.mrb[102].mxu0  ;;  %v1731_v25 = vpop.f32.mrb[102].mxu1 }
 0x1ef   : > { %v1495_v26 = vmax.f32 %v1466_v16, 0.0  ;;  %v1758_v33 = vmax.f32 %v1729_v17, 0.0  ;;  %v2551_v34 = vpop.f32.mrb[103].mxu0  ;;  %v2619_v18 = vpop.f32.mrb[103].mxu1 }
 0x1f0   : > { %v2251_v45 = vpack.c.bf16 %v1807_v23, %v1806_v15 }
 0x1f1   : > { %v1783_v27 = vmax.f32 %v1495_v26, %v1758_v33 }
 0x1f2   : > { %2263 = vst [vmem:[%s3231_s28 + $0x58] sm:$0xff] %v2251_v45  }
 0x1f3   : > { %v1808_v38 = vmax.f32 %v3218_v6, %v1783_v27 }
 0x1f5   : > { %v2192_v28 = vpack.c.bf16 %v1808_v38, %v1808_v38 }
 0x1f7   : > { %1934 = vst [vmem:[%s3231_s28 + $0x60] sm:$0xf] %v2192_v28 }
 0x1f8 PF: > { %p10_p9 = scmp.ge.s32.totalorder %s2771_s16, 4   ;;  %s3327_s12 = smov %s2726_s13 }
 0x1f9   : > { %s3328_s13 = smov %s2780_s19  ;;  %s3329_s14 = smov %s2771_s16 }
 0x1fa   :  { %12 = sbr.rel (!%p10_p9) target bundleno = 2 (0x2), region = 111 }

// kernel: net_forward.3
= control target key start
LH: loop header
LB: loop body
LE: loop exit
PB: predicated region body
PF: predicated region fallthrough
CT: control target
= control target key end

     0   :  { %v2955_v52 = vmov 0.0   ;;  %vm2956_vm0 = vmmov 0   ;;  %vm666_vm1 = vcmask 130048   ;;  %vm2240_vm2 = vcmask 1041408   ;;  %s3534_s1 = inlined_call_operand.vmem [shape: bf16[256,16], index: 1, kind: input, shape index: {}]   ;;  %s3535_s0 = inlined_call_operand.vmem [shape: bf16[4,50,256], index: 0, kind: input, shape index: {}]   ;;  %s3536_s3 = inlined_call_operand.vmem [shape: bf16[25,16,128], index: 3, kind: input, shape index: {}]   ;;  %s3537_s2 = inlined_call_operand.vmem [shape: f32[1,16], index: 2, kind: input, shape index: {}]   ;;  %s3538_s5 = inlined_call_operand.vmem [shape: bf16[128,128], index: 5, kind: input, shape index: {}]   ;;  %s3539_s7 = inlined_call_operand.vmem [shape: bf16[128,128], index: 7, kind: input, shape index: {}]   ;;  %s3540_s4 = inlined_call_operand.vmem [shape: f32[1,128], index: 4, kind: input, shape index: {}]   ;;  %s3541_s6 = inlined_call_operand.vmem [shape: f32[1,128], index: 6, kind: input, shape index: {}]   ;;  %s3542_s8 = inlined_call_operand.vmem [shape: f32[1,128], index: 8, kind: input, shape index: {}]   ;;  %s3543_s9 = inlined_call_operand.vmem [shape: f32[8,128], index: 9, kind: output, shape index: {}]  }
   0x1   :  { %v2854_v0 = vld [vmem:[%s3534_s1 + $0x40] sm:$0xff]   ;;  %v2856_v2 = vld [vmem:[%s3534_s1 + $0x48] sm:$0xff]   ;;  %v2858_v4 = vld [vmem:[%s3534_s1 + $0x50] sm:$0xff]  }
   0x2   :  { %v2855_v1 = vld [vmem:[%s3534_s1] sm:$0xff]   ;;  %2434 = vmatprep.subr.bf16.mxu0 %v2854_v0  ;;  %2474 = vmatprep.subr.bf16.mxu1 %v2854_v0  ;;  %v2857_v3 = vld [vmem:[%s3534_s1 + $0x8] sm:$0xff]   ;;  %v3025_v5 = vld [vmem:[%s3534_s1 + $0x10] sm:$0xff]  }
   0x3   :  { %2435 = vmatpush3.bf16.msra.mxu0 %v2855_v1  ;;  %2475 = vmatpush3.bf16.msra.mxu1 %v2855_v1  ;;  %v3030_v6 = vld [vmem:[%s3534_s1 + $0x58] sm:$0xff]   ;;  %v3044_v8 = vld [vmem:[%s3534_s1 + $0x60] sm:$0xff]   ;;  %v3058_v10 = vld [vmem:[%s3534_s1 + $0x68] sm:$0xff]  }
   0x4   :  { %2436 = vmatprep.subr.bf16.mxu0 %v2856_v2  ;;  %2476 = vmatprep.subr.bf16.mxu1 %v2856_v2  ;;  %v3037_v7 = vld [vmem:[%s3534_s1 + $0x18] sm:$0xff]   ;;  %v3051_v9 = vld [vmem:[%s3534_s1 + $0x20] sm:$0xff]   ;;  %v3071_v13 = vld [vmem:[%s3534_s1 + $0x28] sm:$0xff]  }
   0x5   :  { %v2872_v11 = vld [vmem:[%s3535_s0 + $0x4] ss:$8 sps:$4 sm:$0xff]   ;;  %v3078_v14 = vld [vmem:[%s3534_s1 + $0x70] sm:$0xff]   ;;  %v3092_v16 = vld [vmem:[%s3534_s1 + $0x78] sm:$0xff]  }
   0x6   :  { %v2875_v12 = vld [vmem:[%s3535_s0 + $0x3c] ss:$8 sps:$4 sm:$0xff]   ;;  %244 = vmatprep.mubr.bf16.mxu0 %v2872_v11  ;;  %v3085_v15 = vld [vmem:[%s3534_s1 + $0x30] sm:$0xff]   ;;  %v2870_v18 = vld [vmem:[%s3535_s0] ss:$8 sps:$4 sm:$0xff]  }
   0x7   :  { %2437 = vmatpush3.bf16.msra.mxu0 %v2857_v3  ;;  %2477 = vmatpush3.bf16.msra.mxu1 %v2857_v3  ;;  %v3099_v17 = vld [vmem:[%s3534_s1 + $0x38] sm:$0xff]   ;;  %v2878_v21 = vld [vmem:[%s3535_s0 + $0x4c] ss:$8 sps:$4 sm:$0xff]   ;;  %v2881_v23 = vld [vmem:[%s3535_s0 + $0x48] ss:$8 sps:$4 sm:$0xff]  }
   0x8   :  { %2438 = vmatprep.subr.bf16.mxu0 %v2858_v4  ;;  %2478 = vmatprep.subr.bf16.mxu1 %v2858_v4  ;;  %v2873_v19 = vld [vmem:[%s3535_s0 + $0x38] ss:$8 sps:$4 sm:$0xff]   ;;  %v2876_v20 = vld [vmem:[%s3535_s0 + $0x14] ss:$8 sps:$4 sm:$0xff]   ;;  %v2882_v24 = vld [vmem:[%s3535_s0 + $0x24] ss:$8 sps:$4 sm:$0xff]  }
   0x9   :  { %360 = vmatprep.mubr.bf16.mxu1 %v2875_v12  ;;  %v2880_v22 = vld [vmem:[%s3535_s0 + $0x10] ss:$8 sps:$4 sm:$0xff]   ;;  %v2884_v25 = vld [vmem:[%s3535_s0 + $0x5c] ss:$8 sps:$4 sm:$0xff]   ;;  %v2886_v26 = vld [vmem:[%s3535_s0 + $0x20] ss:$8 sps:$4 sm:$0xff]  }
   0xa   :  { %v2887_v27 = vld [vmem:[%s3535_s0 + $0x58] ss:$8 sps:$4 sm:$0xff]   ;;  %v72_v28 = vld [vmem:[%s3535_s0 + $0x30] sm:$0x11]  ;;  %v2278_v29 = vld [vmem:[%s3535_s0 + $0x68] sm:$0x11] }
   0xb   :  { %2439 = vmatpush3.bf16.msra.mxu0 %v3025_v5  ;;  %2479 = vmatpush3.bf16.msra.mxu1 %v3025_v5  ;;  %v2255_v30 = vcombine.high %v72_v28, %v72_v28  ;;  %v2286_v31 = vcombine.high %v2278_v29, %v2278_v29  ;;  %v2254_v32 = vcombine.low %v72_v28, %v72_v28  ;;  %v2894_v34 = vld [vmem:[%s3535_s0 + $0x74] ss:$8 sps:$4 sm:$0xff]   ;;  %v2892_v36 = vld [vmem:[%s3535_s0 + $0x70] ss:$8 sps:$4 sm:$0xff]   ;;  %v2898_v38 = vld [vmem:[%s3535_s0 + $0x84] ss:$8 sps:$4 sm:$0xff]  }
   0xc   :  { %2440 = vmatprep.subr.bf16.mxu0 %v3030_v6  ;;  %2480 = vmatprep.subr.bf16.mxu1 %v3030_v6  ;;  %v2285_v33 = vcombine.low %v2278_v29, %v2278_v29  ;;  %v2897_v35 = vld [vmem:[%s3535_s0 + $0xac] ss:$8 sps:$4 sm:$0xff]   ;;  %v2895_v37 = vld [vmem:[%s3535_s0 + $0xa8] ss:$8 sps:$4 sm:$0xff]   ;;  %v2900_v39 = vld [vmem:[%s3535_s0 + $0xbc] ss:$8 sps:$4 sm:$0xff]  }
   0xd   :  { %v2902_v40 = vld [vmem:[%s3535_s0 + $0x80] ss:$8 sps:$4 sm:$0xff]   ;;  %v2904_v42 = vld [vmem:[%s3535_s0 + $0x94] ss:$8 sps:$4 sm:$0xff]   ;;  %v2908_v46 = vld [vmem:[%s3535_s0 + $0x90] ss:$8 sps:$4 sm:$0xff]  }
   0xe   :  { %v2903_v41 = vld [vmem:[%s3535_s0 + $0xb8] ss:$8 sps:$4 sm:$0xff]   ;;  %v2906_v43 = vld [vmem:[%s3535_s0 + $0xcc] ss:$8 sps:$4 sm:$0xff]   ;;  %v2909_v47 = vld [vmem:[%s3535_s0 + $0xc8] ss:$8 sps:$4 sm:$0xff]  }
   0xf   :  { %2441 = vmatpush3.bf16.msra.mxu0 %v3037_v7  ;;  %2481 = vmatpush3.bf16.msra.mxu1 %v3037_v7  ;;  %v2293_v44 = vld [vmem:[%s3535_s0 + $0xa0] sm:$0x11]  ;;  %v2308_v45 = vld [vmem:[%s3535_s0 + $0xd8] sm:$0x11]  ;;  %v2914_v53 = vld [vmem:[%s3536_s3 + $0x8] sm:$0xff]  }
  0x10   :  { %2442 = vmatprep.subr.bf16.mxu0 %v3044_v8  ;;  %2482 = vmatprep.subr.bf16.mxu1 %v3044_v8  ;;  %v2301_v48 = vcombine.high %v2293_v44, %v2293_v44  ;;  %v2316_v49 = vcombine.high %v2308_v45, %v2308_v45  ;;  %v2300_v50 = vcombine.low %v2293_v44, %v2293_v44  ;;  %v2915_v54 = vld [vmem:[%s3536_s3] sm:$0xff]  }
  0x11   :  { %v2315_v51 = vcombine.low %v2308_v45, %v2308_v45  ;;  %v3222_v57 = vld [vmem:[%s3537_s2] ss:$0 sm:$0xff] }
  0x13   :  { %2443 = vmatpush3.bf16.msra.mxu0 %v3051_v9  ;;  %2483 = vmatpush3.bf16.msra.mxu1 %v3051_v9 }
  0x14   :  { %2444 = vmatprep.subr.bf16.mxu0 %v3058_v10  ;;  %2484 = vmatprep.subr.bf16.mxu1 %v3058_v10 }
  0x17   :  { %2445 = vmatpush3.bf16.msra.mxu0 %v3071_v13  ;;  %2485 = vmatpush3.bf16.msra.mxu1 %v3071_v13 }
  0x18   :  { %2446 = vmatprep.subr.bf16.mxu0 %v3078_v14  ;;  %2486 = vmatprep.subr.bf16.mxu1 %v3078_v14 }
  0x1b   :  { %2447 = vmatpush3.bf16.msra.mxu0 %v3085_v15  ;;  %2487 = vmatpush3.bf16.msra.mxu1 %v3085_v15 }
  0x1c   :  { %2448 = vmatprep.subr.bf16.mxu0 %v3092_v16  ;;  %2488 = vmatprep.subr.bf16.mxu1 %v3092_v16 }
  0x1f   :  { %2449 = vmatpush3.bf16.msra.mxu0 %v3099_v17  ;;  %2489 = vmatpush3.bf16.msra.mxu1 %v3099_v17 }
  0x20   :  { %2514 = vmatprep.subr.bf16.mxu0 %v2854_v0  ;;  %2554 = vmatprep.subr.bf16.mxu1 %v2854_v0 }
  0x22   :  { %245 = vmatmul.mubr.bf16.vlgmr.msra.gmra.mrb[0].mxu0 %v2870_v18  ;;  %361 = vmatmul.mubr.bf16.vlgmr.msra.gmra.mrb[0].mxu1 %v2873_v19 }
  0x23   :  { %2515 = vmatpush3.bf16.msra.mxu0 %v2855_v1  ;;  %2555 = vmatpush3.bf16.msra.mxu1 %v2855_v1 }
  0x24   :  { %2516 = vmatprep.subr.bf16.mxu0 %v2856_v2  ;;  %2556 = vmatprep.subr.bf16.mxu1 %v2856_v2 }
  0x25   :  { %252 = vmatprep.mubr.bf16.mxu0 %v2876_v20  ;;  %368 = vmatprep.mubr.bf16.mxu1 %v2878_v21 }
  0x27   :  { %2517 = vmatpush3.bf16.msra.mxu0 %v2857_v3  ;;  %2557 = vmatpush3.bf16.msra.mxu1 %v2857_v3 }
  0x28   :  { %2518 = vmatprep.subr.bf16.mxu0 %v2858_v4  ;;  %2558 = vmatprep.subr.bf16.mxu1 %v2858_v4 }
  0x2a   :  { %253 = vmatmul.mubr.bf16.gmra.mrb[4].mxu0 %v2880_v22  ;;  %369 = vmatmul.mubr.bf16.gmra.mrb[4].mxu1 %v2881_v23 }
  0x2b   :  { %2519 = vmatpush3.bf16.msra.mxu0 %v3025_v5  ;;  %2559 = vmatpush3.bf16.msra.mxu1 %v3025_v5 }
  0x2c   :  { %2520 = vmatprep.subr.bf16.mxu0 %v3030_v6  ;;  %2560 = vmatprep.subr.bf16.mxu1 %v3030_v6 }
  0x2d   :  { %260 = vmatprep.mubr.bf16.mxu0 %v2882_v24  ;;  %376 = vmatprep.mubr.bf16.mxu1 %v2884_v25 }
  0x2f   :  { %2521 = vmatpush3.bf16.msra.mxu0 %v3037_v7  ;;  %2561 = vmatpush3.bf16.msra.mxu1 %v3037_v7 }
  0x30   :  { %2522 = vmatprep.subr.bf16.mxu0 %v3044_v8  ;;  %2562 = vmatprep.subr.bf16.mxu1 %v3044_v8 }
  0x32   :  { %261 = vmatmul.mubr.bf16.gmra.mrb[8].mxu0 %v2886_v26  ;;  %377 = vmatmul.mubr.bf16.gmra.mrb[8].mxu1 %v2887_v27 }
  0x33   :  { %2523 = vmatpush3.bf16.msra.mxu0 %v3051_v9  ;;  %2563 = vmatpush3.bf16.msra.mxu1 %v3051_v9 }
  0x34   :  { %2524 = vmatprep.subr.bf16.mxu0 %v3058_v10  ;;  %2564 = vmatprep.subr.bf16.mxu1 %v3058_v10 }
  0x35   :  { %268 = vmatprep.mubr.bf16.mxu0 %v2255_v30  ;;  %384 = vmatprep.mubr.bf16.mxu1 %v2286_v31 }
  0x37   :  { %2525 = vmatpush3.bf16.msra.mxu0 %v3071_v13  ;;  %2565 = vmatpush3.bf16.msra.mxu1 %v3071_v13 }
  0x38   :  { %2526 = vmatprep.subr.bf16.mxu0 %v3078_v14  ;;  %2566 = vmatprep.subr.bf16.mxu1 %v3078_v14 }
  0x3a   :  { %269 = vmatmul.mubr.bf16.gmra.mrb[12].mxu0 %v2254_v32  ;;  %385 = vmatmul.mubr.bf16.gmra.mrb[12].mxu1 %v2285_v33 }
  0x3b   :  { %2527 = vmatpush3.bf16.msra.mxu0 %v3085_v15  ;;  %2567 = vmatpush3.bf16.msra.mxu1 %v3085_v15 }
  0x3c   :  { %2528 = vmatprep.subr.bf16.mxu0 %v3092_v16  ;;  %2568 = vmatprep.subr.bf16.mxu1 %v3092_v16 }
  0x3d   :  { %483 = vmatprep.mubr.bf16.mxu0 %v2894_v34  ;;  %599 = vmatprep.mubr.bf16.mxu1 %v2897_v35 }
  0x3f   :  { %2529 = vmatpush3.bf16.msra.mxu0 %v3099_v17  ;;  %2569 = vmatpush3.bf16.msra.mxu1 %v3099_v17 }
  0x40   :  { %2662 = vmatprep.subr.bf16.mxu0 %v2955_v52  ;;  %2668 = vmatprep.subr.bf16.mxu1 %v2955_v52 }
  0x42   :  { %484 = vmatmul.mubr.bf16.vlgmr.msra.gmra.mrb[16].mxu0 %v2892_v36  ;;  %600 = vmatmul.mubr.bf16.vlgmr.msra.gmra.mrb[16].mxu1 %v2895_v37 }
  0x43   :  { %491 = vmatprep.mubr.bf16.mxu0 %v2898_v38  ;;  %607 = vmatprep.mubr.bf16.mxu1 %v2900_v39 }
  0x44   :  { %2663 = vmatpush3.bf16.msra.mxu0 %v2914_v53  ;;  %2669 = vmatpush3.bf16.msra.mxu1 %v2915_v54 }
  0x45   :  { %2674 = vmatprep.subr.bf16.mxu0 %v2955_v52  ;;  %2680 = vmatprep.subr.bf16.mxu1 %v2955_v52 }
  0x4a   :  { %492 = vmatmul.mubr.bf16.gmra.mrb[20].mxu0 %v2902_v40  ;;  %608 = vmatmul.mubr.bf16.gmra.mrb[20].mxu1 %v2903_v41 }
  0x4b   :  { %499 = vmatprep.mubr.bf16.mxu0 %v2904_v42  ;;  %615 = vmatprep.mubr.bf16.mxu1 %v2906_v43 }
  0x52   :  { %500 = vmatmul.mubr.bf16.gmra.mrb[24].mxu0 %v2908_v46  ;;  %616 = vmatmul.mubr.bf16.gmra.mrb[24].mxu1 %v2909_v47 }
  0x53   :  { %507 = vmatprep.mubr.bf16.mxu0 %v2301_v48  ;;  %623 = vmatprep.mubr.bf16.mxu1 %v2316_v49 }
  0x5a   :  { %508 = vmatmul.mubr.bf16.gmra.mrb[28].mxu0 %v2300_v50  ;;  %624 = vmatmul.mubr.bf16.gmra.mrb[28].mxu1 %v2315_v51 }
  0x5b   :  { %2670 = vmatprep.mubr.msk.bf16.mxu1 %vm2956_vm0, %v2955_v52  ;;  %2664 = vmatprep.mubr.msk.bf16.mxu0 %vm2956_vm0, %v2955_v52 }
  0xf5   :  { %v2450_v55 = vpop.f32.mrb[0].mxu0  ;;  %v2490_v56 = vpop.f32.mrb[0].mxu1 }
  0xf6   :  { %v2451_v58 = vpop.f32.mrb[1].mxu0  ;;  %v2491_v59 = vpop.f32.mrb[1].mxu1 }
  0xf7   :  { %v2452_v60 = vadd.f32 %v2451_v58, %v2450_v55  ;;  %v2492_v61 = vadd.f32 %v2491_v59, %v2490_v56  ;;  %v2453_v62 = vpop.f32.mrb[2].mxu0  ;;  %v2493_v63 = vpop.f32.mrb[2].mxu1 }
  0xf8   :  { %v2454_v0 = vpop.f32.mrb[3].mxu0  ;;  %v2494_v1 = vpop.f32.mrb[3].mxu1 }
  0xf9   :  { %v247_v2 = vadd.f32 %v2452_v60, %v3222_v57  ;;  %v363_v3 = vadd.f32 %v2492_v61, %v3222_v57  ;;  %v2455_v4 = vadd.f32 %v2454_v0, %v2453_v62  ;;  %v2495_v5 = vadd.f32 %v2494_v1, %v2493_v63 }
  0xfb   :  { %v276_v6 = vmax.f32 %v247_v2, 0.0  ;;  %v392_v7 = vmax.f32 %v363_v3, 0.0  ;;  %v250_v8 = vadd.f32 %v2455_v4, %v3222_v57  ;;  %v366_v9 = vadd.f32 %v2495_v5, %v3222_v57 }
  0xfd   :  { %v3228_v10 = vmax.f32 %v276_v6, %v392_v7  ;;  %v277_v11 = vmax.f32 %v250_v8, 0.0  ;;  %v393_v12 = vmax.f32 %v366_v9, 0.0  ;;  %v2456_v13 = vpop.f32.mrb[4].mxu0  ;;  %v2496_v14 = vpop.f32.mrb[4].mxu1 }
  0xfe   :  { %v2457_v15 = vpop.f32.mrb[5].mxu0  ;;  %v2497_v16 = vpop.f32.mrb[5].mxu1 }
  0xff   :  { %v3230_v17 = vmax.f32 %v277_v11, %v393_v12  ;;  %v2458_v18 = vadd.f32 %v2457_v15, %v2456_v13  ;;  %v2498_v19 = vadd.f32 %v2497_v16, %v2496_v14  ;;  %v2459_v20 = vpop.f32.mrb[6].mxu0  ;;  %v2499_v21 = vpop.f32.mrb[6].mxu1 }
 0x100   :  { %v2460_v22 = vpop.f32.mrb[7].mxu0  ;;  %v2500_v23 = vpop.f32.mrb[7].mxu1 }
 0x101   :  { %v255_v24 = vadd.f32 %v2458_v18, %v3222_v57  ;;  %v371_v25 = vadd.f32 %v2498_v19, %v3222_v57  ;;  %v2461_v26 = vadd.f32 %v2460_v22, %v2459_v20  ;;  %v2501_v27 = vadd.f32 %v2500_v23, %v2499_v21 }
 0x103   :  { %v278_v28 = vmax.f32 %v255_v24, 0.0  ;;  %v394_v29 = vmax.f32 %v371_v25, 0.0  ;;  %v258_v30 = vadd.f32 %v2461_v26, %v3222_v57  ;;  %v374_v31 = vadd.f32 %v2501_v27, %v3222_v57 }
 0x105   :  { %v3236_v32 = vmax.f32 %v278_v28, %v394_v29  ;;  %v279_v33 = vmax.f32 %v258_v30, 0.0  ;;  %v395_v34 = vmax.f32 %v374_v31, 0.0  ;;  %v2462_v35 = vpop.f32.mrb[8].mxu0  ;;  %v2502_v36 = vpop.f32.mrb[8].mxu1 }
 0x106   :  { %v2463_v37 = vpop.f32.mrb[9].mxu0  ;;  %v2503_v38 = vpop.f32.mrb[9].mxu1 }
 0x107   :  { %v3238_v39 = vmax.f32 %v279_v33, %v395_v34  ;;  %v2464_v40 = vadd.f32 %v2463_v37, %v2462_v35  ;;  %v2504_v41 = vadd.f32 %v2503_v38, %v2502_v36  ;;  %v2465_v42 = vpop.f32.mrb[10].mxu0  ;;  %v2505_v43 = vpop.f32.mrb[10].mxu1 }
 0x108   :  { %v2466_v44 = vpop.f32.mrb[11].mxu0  ;;  %v2506_v45 = vpop.f32.mrb[11].mxu1 }
 0x109   :  { %v263_v46 = vadd.f32 %v2464_v40, %v3222_v57  ;;  %v379_v47 = vadd.f32 %v2504_v41, %v3222_v57  ;;  %v2467_v48 = vadd.f32 %v2466_v44, %v2465_v42  ;;  %v2507_v49 = vadd.f32 %v2506_v45, %v2505_v43 }
 0x10b   :  { %v280_v50 = vmax.f32 %v263_v46, 0.0  ;;  %v396_v51 = vmax.f32 %v379_v47, 0.0  ;;  %v266_v53 = vadd.f32 %v2467_v48, %v3222_v57  ;;  %v382_v54 = vadd.f32 %v2507_v49, %v3222_v57  ;;  %v2917_v48 = vld [vmem:[%s3536_s3 + $0x18] sm:$0xff]  }
 0x10d   :  { %v3244_v55 = vmax.f32 %v280_v50, %v396_v51  ;;  %v281_v56 = vmax.f32 %v266_v53, 0.0  ;;  %v397_v58 = vmax.f32 %v382_v54, 0.0  ;;  %v2468_v59 = vpop.f32.mrb[12].mxu0  ;;  %v2508_v60 = vpop.f32.mrb[12].mxu1 }
 0x10e   :  { %v2469_v61 = vpop.f32.mrb[13].mxu0  ;;  %v2509_v62 = vpop.f32.mrb[13].mxu1 }
 0x10f   :  { %v3246_v63 = vmax.f32 %v281_v56, %v397_v58  ;;  %v2470_v0 = vadd.f32 %v2469_v61, %v2468_v59  ;;  %v2510_v1 = vadd.f32 %v2509_v62, %v2508_v60  ;;  %v2471_v2 = vpop.f32.mrb[14].mxu0  ;;  %v2511_v3 = vpop.f32.mrb[14].mxu1  ;;  %v2916_v56 = vld [vmem:[%s3536_s3 + $0x10] sm:$0xff]  }
 0x110   :  { %v2472_v4 = vpop.f32.mrb[15].mxu0  ;;  %v2512_v5 = vpop.f32.mrb[15].mxu1 }
 0x111   :  { %v271_v6 = vadd.f32 %v2470_v0, %v3222_v57  ;;  %v387_v7 = vadd.f32 %v2510_v1, %v3222_v57 }
 0x113   :  { %v282_v8 = vmax.f32 %v271_v6, 0.0  ;;  %v398_v9 = vmax.f32 %v387_v7, 0.0 }
 0x115   :  { %v3250_v11 = vmax.f32 %v282_v8, %v398_v9  ;;  %v2530_v12 = vpop.f32.mrb[16].mxu0  ;;  %v2570_v13 = vpop.f32.mrb[16].mxu1 }
 0x116   :  { %v2531_v14 = vpop.f32.mrb[17].mxu0  ;;  %v2571_v15 = vpop.f32.mrb[17].mxu1 }
 0x117   :  { %v2532_v16 = vadd.f32 %v2531_v14, %v2530_v12  ;;  %v2572_v18 = vadd.f32 %v2571_v15, %v2570_v13  ;;  %v2533_v19 = vpop.f32.mrb[18].mxu0  ;;  %v2573_v20 = vpop.f32.mrb[18].mxu1 }
 0x118   :  { %v2534_v21 = vpop.f32.mrb[19].mxu0  ;;  %v2574_v22 = vpop.f32.mrb[19].mxu1 }
 0x119   :  { %v486_v23 = vadd.f32 %v2532_v16, %v3222_v57  ;;  %v602_v24 = vadd.f32 %v2572_v18, %v3222_v57  ;;  %v2535_v25 = vadd.f32 %v2534_v21, %v2533_v19  ;;  %v2575_v26 = vadd.f32 %v2574_v22, %v2573_v20  ;;  %v2919_v16 = vld [vmem:[%s3536_s3 + $0x28] sm:$0xff]  }
 0x11b   :  { %v515_v27 = vmax.f32 %v486_v23, 0.0  ;;  %v631_v28 = vmax.f32 %v602_v24, 0.0  ;;  %v489_v29 = vadd.f32 %v2535_v25, %v3222_v57  ;;  %v605_v30 = vadd.f32 %v2575_v26, %v3222_v57  ;;  %v2918_v23 = vld [vmem:[%s3536_s3 + $0x20] sm:$0xff]  }
 0x11d   :  { %v638_v31 = vmax.f32 %v515_v27, %v631_v28  ;;  %v516_v33 = vmax.f32 %v489_v29, 0.0  ;;  %v632_v34 = vmax.f32 %v605_v30, 0.0  ;;  %v2536_v35 = vpop.f32.mrb[20].mxu0  ;;  %v2576_v36 = vpop.f32.mrb[20].mxu1 }
 0x11e   :  { %v2537_v37 = vpop.f32.mrb[21].mxu0  ;;  %v2577_v38 = vpop.f32.mrb[21].mxu1 }
 0x11f   :  { %v645_v40 = vmax.f32 %v3228_v10, %v638_v31  ;;  %v639_v41 = vmax.f32 %v516_v33, %v632_v34  ;;  %v2538_v42 = vadd.f32 %v2537_v37, %v2536_v35  ;;  %v2578_v43 = vadd.f32 %v2577_v38, %v2576_v36  ;;  %v2539_v44 = vpop.f32.mrb[22].mxu0  ;;  %v2579_v45 = vpop.f32.mrb[22].mxu1 }
 0x120   :  { %v2540_v46 = vpop.f32.mrb[23].mxu0  ;;  %v2580_v47 = vpop.f32.mrb[23].mxu1 }
 0x121   :  { %v652_v49 = vpack.c.bf16 %v645_v40, %v645_v40  ;;  %v646_v50 = vmax.f32 %v3230_v17, %v639_v41  ;;  %v494_v51 = vadd.f32 %v2538_v42, %v3222_v57  ;;  %v610_v53 = vadd.f32 %v2578_v43, %v3222_v57 }
 0x122   :  { %v2541_v10 = vadd.f32 %v2540_v46, %v2539_v44  ;;  %v2581_v54 = vadd.f32 %v2580_v47, %v2579_v45  ;;  %v2921_v44 = vld [vmem:[%s3536_s3 + $0x38] sm:$0xff]  }
 0x123   :  { %v659_v58 = vrot.slane %v652_v49, 1  ;;  %v517_v59 = vmax.f32 %v494_v51, 0.0  ;;  %v633_v60 = vmax.f32 %v610_v53, 0.0  ;;  %2671 = vmatmul.mubr.msk.bf16.vlgmr.msra.gmra.mrb[32].mxu1 %vm666_vm1, %v652_v49  ;;  %v762_v27 = vrot.slane %v652_v49, 2 }
 0x124   :  { %v497_v61 = vadd.f32 %v2541_v10, %v3222_v57  ;;  %v613_v62 = vadd.f32 %v2581_v54, %v3222_v57  ;;  %2681 = vmatpush3.bf16.msra.mxu1 %v2917_v48  ;;  %2682 = vmatprep.mubr.msk.bf16.mxu1 %vm2956_vm0, %v2955_v52 }
 0x125   :  { %v640_v17 = vmax.f32 %v517_v59, %v633_v60  ;;  %v2542_v0 = vpop.f32.mrb[24].mxu0  ;;  %v2582_v1 = vpop.f32.mrb[24].mxu1  ;;  %2665 = vmatmul.mubr.msk.bf16.vlgmr.msra.gmra.mrb[32].mxu0 %vm666_vm1, %v659_v58  ;;  %2692 = vmatprep.subr.bf16.mxu1 %v2955_v52  ;;  %v2925_v59 = vld [vmem:[%s3536_s3 + $0x58] sm:$0xff]  }
 0x126   :  { %v518_v2 = vmax.f32 %v497_v61, 0.0  ;;  %v634_v3 = vmax.f32 %v613_v62, 0.0  ;;  %v2543_v4 = vpop.f32.mrb[25].mxu0  ;;  %v2583_v5 = vpop.f32.mrb[25].mxu1  ;;  %2675 = vmatpush3.bf16.msra.mxu0 %v2916_v56  ;;  %2676 = vmatprep.mubr.msk.bf16.mxu0 %vm2956_vm0, %v2955_v52  ;;  %v2922_v56 = vld [vmem:[%s3536_s3 + $0x40] sm:$0xff]   ;;  %v2924_v61 = vld [vmem:[%s3536_s3 + $0x50] sm:$0xff]  }
 0x127   :  { %v3276_v6 = vmax.f32 %v3236_v32, %v640_v17  ;;  %v2544_v7 = vadd.f32 %v2543_v4, %v2542_v0  ;;  %v2584_v8 = vadd.f32 %v2583_v5, %v2582_v1  ;;  %v2545_v9 = vpop.f32.mrb[26].mxu0  ;;  %v2585_v12 = vpop.f32.mrb[26].mxu1  ;;  %2686 = vmatprep.subr.bf16.mxu0 %v2955_v52  ;;  %v816_v32 = vrot.slane %v652_v49, 3  ;;  %v2927_v62 = vld [vmem:[%s3536_s3 + $0x68] sm:$0xff]   ;;  %v2926_v0 = vld [vmem:[%s3536_s3 + $0x60] sm:$0xff]   ;;  %v2928_v5 = vld [vmem:[%s3536_s3 + $0x70] sm:$0xff]  }
 0x128   :  { %v641_v13 = vmax.f32 %v518_v2, %v634_v3  ;;  %v2546_v14 = vpop.f32.mrb[27].mxu0  ;;  %v2586_v15 = vpop.f32.mrb[27].mxu1  ;;  %v2929_v3 = vld [vmem:[%s3536_s3 + $0x78] sm:$0xff]  }
 0x129   :  { %v502_v18 = vadd.f32 %v2544_v7, %v3222_v57  ;;  %v618_v19 = vadd.f32 %v2584_v8, %v3222_v57  ;;  %v2547_v20 = vadd.f32 %v2546_v14, %v2545_v9  ;;  %v2587_v22 = vadd.f32 %v2586_v15, %v2585_v12  ;;  %v2930_v8 = vld [vmem:[%s3536_s3 + $0x80] sm:$0xff]   ;;  %v2932_v15 = vld [vmem:[%s3536_s3 + $0x90] sm:$0xff]  }
 0x12a   :  { %v3285_v21 = vmax.f32 %v3238_v39, %v641_v13  ;;  %v867_v39 = vpack.c.bf16 %v646_v50, %v646_v50  ;;  %v2920_v50 = vld [vmem:[%s3536_s3 + $0x30] sm:$0xff]   ;;  %v2933_v13 = vld [vmem:[%s3536_s3 + $0x98] sm:$0xff]  }
 0x12b   :  { %v519_v24 = vmax.f32 %v502_v18, 0.0  ;;  %v635_v25 = vmax.f32 %v618_v19, 0.0  ;;  %v505_v26 = vadd.f32 %v2547_v20, %v3222_v57  ;;  %2683 = vmatmul.mubr.msk.bf16.vlgmr.msra.gmra.mrb[36].mxu1 %vm666_vm1, %v816_v32  ;;  %v621_v28 = vadd.f32 %v2587_v22, %v3222_v57  ;;  %v2934_v19 = vld [vmem:[%s3536_s3 + $0xa0] sm:$0xff]  }
 0x12c   :  { %2693 = vmatpush3.bf16.msra.mxu1 %v2919_v16  ;;  %2694 = vmatprep.mubr.msk.bf16.mxu1 %vm2956_vm0, %v2955_v52  ;;  %v925_v49 = vrot.slane %v867_v39, 1  ;;  %v1033_v54 = vrot.slane %v867_v39, 3  ;;  %v979_v58 = vrot.slane %v867_v39, 2  ;;  %v1301_v2 = vpack.c.bf16 %v3285_v21, %v3285_v21  ;;  %v2935_v16 = vld [vmem:[%s3536_s3 + $0xa8] sm:$0xff]   ;;  %v2937_v21 = vld [vmem:[%s3536_s3 + $0xb8] sm:$0xff]  }
 0x12d   :  { %v642_v29 = vmax.f32 %v519_v24, %v635_v25  ;;  %v520_v30 = vmax.f32 %v505_v26, 0.0  ;;  %v2548_v31 = vpop.f32.mrb[28].mxu0  ;;  %v2588_v33 = vpop.f32.mrb[28].mxu1  ;;  %2677 = vmatmul.mubr.msk.bf16.vlgmr.msra.gmra.mrb[36].mxu0 %vm666_vm1, %v762_v27  ;;  %2704 = vmatprep.subr.bf16.mxu1 %v2955_v52  ;;  %v636_v34 = vmax.f32 %v621_v28, 0.0  ;;  %v2938_v25 = vld [vmem:[%s3536_s3 + $0xc0] sm:$0xff]  }
 0x12e   :  { %v2549_v35 = vpop.f32.mrb[29].mxu0  ;;  %v2589_v36 = vpop.f32.mrb[29].mxu1  ;;  %2687 = vmatpush3.bf16.msra.mxu0 %v2918_v23  ;;  %2688 = vmatprep.mubr.msk.bf16.mxu0 %vm2956_vm0, %v2955_v52  ;;  %v1359_v4 = vrot.slane %v1301_v2, 1  ;;  %v1467_v7 = vrot.slane %v1301_v2, 3  ;;  %v1413_v9 = vrot.slane %v1301_v2, 2  ;;  %v2936_v23 = vld [vmem:[%s3536_s3 + $0xb0] sm:$0xff]  }
 0x12f   :  { %v3300_v37 = vmax.f32 %v3244_v55, %v642_v29  ;;  %v2550_v38 = vadd.f32 %v2549_v35, %v2548_v31  ;;  %v2590_v40 = vadd.f32 %v2589_v36, %v2588_v33  ;;  %2698 = vmatprep.subr.bf16.mxu0 %v2955_v52  ;;  %v2551_v41 = vpop.f32.mrb[30].mxu0  ;;  %v2591_v42 = vpop.f32.mrb[30].mxu1  ;;  %v643_v43 = vmax.f32 %v520_v30, %v636_v34  ;;  %v2939_v28 = vld [vmem:[%s3538_s5] sm:$0xff]   ;;  %v2941_v29 = vld [vmem:[%s3538_s5 + $0x10] sm:$0xff]   ;;  %v2942_v30 = vld [vmem:[%s3538_s5 + $0x18] sm:$0xff]  }
 0x130   :  { %v2552_v45 = vpop.f32.mrb[31].mxu0  ;;  %v2592_v46 = vpop.f32.mrb[31].mxu1  ;;  %v2943_v31 = vld [vmem:[%s3538_s5 + $0x20] sm:$0xff]   ;;  %v2944_v33 = vld [vmem:[%s3538_s5 + $0x28] sm:$0xff]   ;;  %v2945_v34 = vld [vmem:[%s3538_s5 + $0x30] sm:$0xff]  }
 0x131   :  { %v510_v47 = vadd.f32 %v2550_v38, %v3222_v57  ;;  %v626_v48 = vadd.f32 %v2590_v40, %v3222_v57  ;;  %v3309_v55 = vmax.f32 %v3246_v63, %v643_v43  ;;  %v2923_v63 = vld [vmem:[%s3536_s3 + $0x48] sm:$0xff]   ;;  %v1518_v12 = vpack.c.bf16 %v3300_v37, %v3300_v37  ;;  %v2946_v35 = vld [vmem:[%s3538_s5 + $0x38] sm:$0xff]   ;;  %v2947_v36 = vld [vmem:[%s3539_s7] sm:$0xff]  }
 0x132   :  { %v2948_v37 = vld [vmem:[%s3539_s7 + $0x8] sm:$0xff]   ;;  %v2949_v38 = vld [vmem:[%s3539_s7 + $0x10] sm:$0xff]   ;;  %v2950_v40 = vld [vmem:[%s3539_s7 + $0x18] sm:$0xff]  }
 0x133   :  { %v521_v51 = vmax.f32 %v510_v47, 0.0  ;;  %v637_v53 = vmax.f32 %v626_v48, 0.0  ;;  %2695 = vmatmul.mubr.msk.bf16.vlgmr.msra.gmra.mrb[40].mxu1 %vm666_vm1, %v925_v49  ;;  %v1576_v14 = vrot.slane %v1518_v12, 1  ;;  %v1684_v18 = vrot.slane %v1518_v12, 3  ;;  %v2951_v41 = vld [vmem:[%s3539_s7 + $0x20] sm:$0xff]   ;;  %v2952_v42 = vld [vmem:[%s3539_s7 + $0x28] sm:$0xff]  }
 0x134   :  { %2705 = vmatpush3.bf16.msra.mxu1 %v2921_v44  ;;  %2706 = vmatprep.mubr.msk.bf16.mxu1 %vm2956_vm0, %v2955_v52  ;;  %v1630_v20 = vrot.slane %v1518_v12, 2  ;;  %v1735_v32 = vpack.c.bf16 %v3309_v55, %v3309_v55 }
 0x135   :  { %v644_v10 = vmax.f32 %v521_v51, %v637_v53  ;;  %2689 = vmatmul.mubr.msk.bf16.vlgmr.msra.gmra.mrb[40].mxu0 %vm666_vm1, %v867_v39  ;;  %2716 = vmatprep.subr.bf16.mxu1 %v2955_v52  ;;  %v2940_v39 = vld [vmem:[%s3538_s5 + $0x8] sm:$0xff]  }
 0x136   :  { %2699 = vmatpush3.bf16.msra.mxu0 %v2920_v50  ;;  %2700 = vmatprep.mubr.msk.bf16.mxu0 %vm2956_vm0, %v2955_v52  ;;  %v1793_v22 = vrot.slane %v1735_v32, 1  ;;  %v1901_v24 = vrot.slane %v1735_v32, 3  ;;  %v1847_v26 = vrot.slane %v1735_v32, 2 }
 0x137   :  { %v3322_v57 = vmax.f32 %v3250_v11, %v644_v10  ;;  %2710 = vmatprep.subr.bf16.mxu0 %v2955_v52  ;;  %v1084_v11 = vpack.c.bf16 %v3276_v6, %v3276_v6  ;;  %v2931_v6 = vld [vmem:[%s3536_s3 + $0x88] sm:$0xff]  }
 0x139   :  { %v1142_v60 = vrot.slane %v1084_v11, 1  ;;  %v1250_v17 = vrot.slane %v1084_v11, 3  ;;  %v1196_v1 = vrot.slane %v1084_v11, 2  ;;  %v1952_v27 = vpack.c.bf16 %v3322_v57, %v3322_v57 }
 0x13b   :  { %2707 = vmatmul.mubr.msk.bf16.vlgmr.msra.gmra.mrb[44].mxu1 %vm666_vm1, %v1033_v54 }
 0x13c   :  { %2717 = vmatpush3.bf16.msra.mxu1 %v2923_v63  ;;  %2718 = vmatprep.mubr.msk.bf16.mxu1 %vm2956_vm0, %v2955_v52 }
 0x13d   :  { %2701 = vmatmul.mubr.msk.bf16.vlgmr.msra.gmra.mrb[44].mxu0 %vm666_vm1, %v979_v58  ;;  %2728 = vmatprep.subr.bf16.mxu1 %v2955_v52 }
 0x13e   :  { %2711 = vmatpush3.bf16.msra.mxu0 %v2922_v56  ;;  %2712 = vmatprep.mubr.msk.bf16.mxu0 %vm2956_vm0, %v2955_v52 }
 0x13f   :  { %2722 = vmatprep.subr.bf16.mxu0 %v2955_v52 }
 0x143   :  { %2719 = vmatmul.mubr.msk.bf16.vlgmr.msra.gmra.mrb[48].mxu1 %vm666_vm1, %v1142_v60 }
 0x144   :  { %2729 = vmatpush3.bf16.msra.mxu1 %v2925_v59  ;;  %2730 = vmatprep.mubr.msk.bf16.mxu1 %vm2956_vm0, %v2955_v52 }
 0x145   :  { %2713 = vmatmul.mubr.msk.bf16.vlgmr.msra.gmra.mrb[48].mxu0 %vm666_vm1, %v1084_v11  ;;  %2740 = vmatprep.subr.bf16.mxu1 %v2955_v52 }
 0x146   :  { %2723 = vmatpush3.bf16.msra.mxu0 %v2924_v61  ;;  %2724 = vmatprep.mubr.msk.bf16.mxu0 %vm2956_vm0, %v2955_v52 }
 0x147   :  { %2734 = vmatprep.subr.bf16.mxu0 %v2955_v52 }
 0x14b   :  { %2731 = vmatmul.mubr.msk.bf16.vlgmr.msra.gmra.mrb[52].mxu1 %vm666_vm1, %v1250_v17 }
 0x14c   :  { %2741 = vmatpush3.bf16.msra.mxu1 %v2927_v62  ;;  %2742 = vmatprep.mubr.msk.bf16.mxu1 %vm2956_vm0, %v2955_v52 }
 0x14d   :  { %2725 = vmatmul.mubr.msk.bf16.vlgmr.msra.gmra.mrb[52].mxu0 %vm666_vm1, %v1196_v1  ;;  %2752 = vmatprep.subr.bf16.mxu1 %v2955_v52 }
 0x14e   :  { %2735 = vmatpush3.bf16.msra.mxu0 %v2926_v0  ;;  %2736 = vmatprep.mubr.msk.bf16.mxu0 %vm2956_vm0, %v2955_v52 }
 0x14f   :  { %2746 = vmatprep.subr.bf16.mxu0 %v2955_v52 }
 0x153   :  { %2743 = vmatmul.mubr.msk.bf16.vlgmr.msra.gmra.mrb[56].mxu1 %vm666_vm1, %v1359_v4 }
 0x154   :  { %2753 = vmatpush3.bf16.msra.mxu1 %v2929_v3  ;;  %2754 = vmatprep.mubr.msk.bf16.mxu1 %vm2956_vm0, %v2955_v52 }
 0x155   :  { %2737 = vmatmul.mubr.msk.bf16.vlgmr.msra.gmra.mrb[56].mxu0 %vm666_vm1, %v1301_v2  ;;  %2764 = vmatprep.subr.bf16.mxu1 %v2955_v52 }
 0x156   :  { %2747 = vmatpush3.bf16.msra.mxu0 %v2928_v5  ;;  %2748 = vmatprep.mubr.msk.bf16.mxu0 %vm2956_vm0, %v2955_v52 }
 0x157   :  { %2758 = vmatprep.subr.bf16.mxu0 %v2955_v52 }
 0x15b   :  { %2755 = vmatmul.mubr.msk.bf16.vlgmr.msra.gmra.mrb[60].mxu1 %vm666_vm1, %v1467_v7 }
 0x15c   :  { %2765 = vmatpush3.bf16.msra.mxu1 %v2931_v6  ;;  %2766 = vmatprep.mubr.msk.bf16.mxu1 %vm2956_vm0, %v2955_v52 }
 0x15d   :  { %2749 = vmatmul.mubr.msk.bf16.vlgmr.msra.gmra.mrb[60].mxu0 %vm666_vm1, %v1413_v9  ;;  %2776 = vmatprep.subr.bf16.mxu1 %v2955_v52 }
 0x15e   :  { %2759 = vmatpush3.bf16.msra.mxu0 %v2930_v8  ;;  %2760 = vmatprep.mubr.msk.bf16.mxu0 %vm2956_vm0, %v2955_v52 }
 0x15f   :  { %2770 = vmatprep.subr.bf16.mxu0 %v2955_v52 }
 0x163   :  { %2767 = vmatmul.mubr.msk.bf16.vlgmr.msra.gmra.mrb[64].mxu1 %vm666_vm1, %v1576_v14 }
 0x164   :  { %2777 = vmatpush3.bf16.msra.mxu1 %v2933_v13  ;;  %2778 = vmatprep.mubr.msk.bf16.mxu1 %vm2956_vm0, %v2955_v52 }
 0x165   :  { %2761 = vmatmul.mubr.msk.bf16.vlgmr.msra.gmra.mrb[64].mxu0 %vm666_vm1, %v1518_v12  ;;  %2788 = vmatprep.subr.bf16.mxu1 %v2955_v52 }
 0x166   :  { %2771 = vmatpush3.bf16.msra.mxu0 %v2932_v15  ;;  %2772 = vmatprep.mubr.msk.bf16.mxu0 %vm2956_vm0, %v2955_v52 }
 0x167   :  { %2782 = vmatprep.subr.bf16.mxu0 %v2955_v52 }
 0x16b   :  { %2779 = vmatmul.mubr.msk.bf16.vlgmr.msra.gmra.mrb[68].mxu1 %vm666_vm1, %v1684_v18 }
 0x16c   :  { %2789 = vmatpush3.bf16.msra.mxu1 %v2935_v16  ;;  %2790 = vmatprep.mubr.msk.bf16.mxu1 %vm2956_vm0, %v2955_v52 }
 0x16d   :  { %2773 = vmatmul.mubr.msk.bf16.vlgmr.msra.gmra.mrb[68].mxu0 %vm666_vm1, %v1630_v20  ;;  %2800 = vmatprep.subr.bf16.mxu1 %v2955_v52 }
 0x16e   :  { %2783 = vmatpush3.bf16.msra.mxu0 %v2934_v19  ;;  %2784 = vmatprep.mubr.msk.bf16.mxu0 %vm2956_vm0, %v2955_v52 }
 0x16f   :  { %2794 = vmatprep.subr.bf16.mxu0 %v2955_v52 }
 0x173   :  { %2791 = vmatmul.mubr.msk.bf16.vlgmr.msra.gmra.mrb[72].mxu1 %vm666_vm1, %v1793_v22 }
 0x174   :  { %2801 = vmatpush3.bf16.msra.mxu1 %v2937_v21  ;;  %2802 = vmatprep.mubr.msk.bf16.mxu1 %vm2956_vm0, %v2955_v52 }
 0x175   :  { %2785 = vmatmul.mubr.msk.bf16.vlgmr.msra.gmra.mrb[72].mxu0 %vm666_vm1, %v1735_v32  ;;  %2812 = vmatprep.subr.bf16.mxu1 %v2955_v52 }
 0x176   :  { %2795 = vmatpush3.bf16.msra.mxu0 %v2936_v23  ;;  %2796 = vmatprep.mubr.msk.bf16.mxu0 %vm2956_vm0, %v2955_v52 }
 0x177   :  { %2806 = vmatprep.subr.bf16.mxu0 %v2955_v52 }
 0x17b   :  { %2803 = vmatmul.mubr.msk.bf16.vlgmr.msra.gmra.mrb[76].mxu1 %vm666_vm1, %v1901_v24 }
 0x17c   :  { %2828 = vmatprep.mubr.msk.bf16.mxu1 %vm2956_vm0, %v2955_v52  ;;  %2813 = vmatpush3.bf16.msra.mxu1 %v2939_v28 }
 0x17d   :  { %2797 = vmatmul.mubr.msk.bf16.vlgmr.msra.gmra.mrb[76].mxu0 %vm666_vm1, %v1847_v26  ;;  %2814 = vmatprep.subr.bf16.mxu1 %v2955_v52 }
 0x17e   :  { %2807 = vmatpush3.bf16.msra.mxu0 %v2938_v25  ;;  %2808 = vmatprep.mubr.msk.bf16.mxu0 %vm2956_vm0, %v2955_v52 }
 0x17f   :  { %2832 = vmatprep.subr.bf16.mxu0 %v2955_v52 }
 0x180   :  { %2815 = vmatpush3.bf16.msra.mxu1 %v2940_v39 }
 0x181   :  { %2816 = vmatprep.subr.bf16.mxu1 %v2955_v52 }
 0x184   :  { %2817 = vmatpush3.bf16.msra.mxu1 %v2941_v29 }
 0x185   :  { %2809 = vmatmul.mubr.msk.bf16.vlgmr.msra.gmra.mrb[80].mxu0 %vm666_vm1, %v1952_v27  ;;  %2818 = vmatprep.subr.bf16.mxu1 %v2955_v52 }
 0x186   :  { %2848 = vmatprep.mubr.msk.bf16.mxu0 %vm2956_vm0, %v2955_v52  ;;  %2833 = vmatpush3.bf16.msra.mxu0 %v2947_v36 }
 0x187   :  { %2834 = vmatprep.subr.bf16.mxu0 %v2955_v52 }
 0x188   :  { %2819 = vmatpush3.bf16.msra.mxu1 %v2942_v30 }
 0x189   :  { %2820 = vmatprep.subr.bf16.mxu1 %v2955_v52 }
 0x18a   :  { %2835 = vmatpush3.bf16.msra.mxu0 %v2948_v37 }
 0x18b   :  { %2836 = vmatprep.subr.bf16.mxu0 %v2955_v52 }
 0x18c   :  { %2821 = vmatpush3.bf16.msra.mxu1 %v2943_v31 }
 0x18d   :  { %2822 = vmatprep.subr.bf16.mxu1 %v2955_v52 }
 0x18e   :  { %2837 = vmatpush3.bf16.msra.mxu0 %v2949_v38 }
 0x18f   :  { %2838 = vmatprep.subr.bf16.mxu0 %v2955_v52 }
 0x190   :  { %2823 = vmatpush3.bf16.msra.mxu1 %v2944_v33 }
 0x191   :  { %2824 = vmatprep.subr.bf16.mxu1 %v2955_v52 }
 0x192   :  { %2839 = vmatpush3.bf16.msra.mxu0 %v2950_v40 }
 0x193   :  { %2840 = vmatprep.subr.bf16.mxu0 %v2955_v52 }
 0x194   :  { %2825 = vmatpush3.bf16.msra.mxu1 %v2945_v34 }
 0x195   :  { %2826 = vmatprep.subr.bf16.mxu1 %v2955_v52 }
 0x196   :  { %2841 = vmatpush3.bf16.msra.mxu0 %v2951_v41 }
 0x197   :  { %2842 = vmatprep.subr.bf16.mxu0 %v2955_v52 }
 0x198   :  { %2827 = vmatpush3.bf16.msra.mxu1 %v2946_v35 }
 0x19a   :  { %2843 = vmatpush3.bf16.msra.mxu0 %v2952_v42 }
 0x19b   :  { %2844 = vmatprep.subr.bf16.mxu0 %v2955_v52 }
 0x1f6   :  { %v753_v43 = vpop.f32.mrb[32].mxu1 }
 0x1f7   :  { %v2672_v44 = vpop.f32.mrb[33].mxu1 }
 0x1f8   :  { %v704_v45 = vpop.f32.mrb[32].mxu0  ;;  %v756_v46 = vpop.f32.mrb[34].mxu1 }
 0x1f9   :  { %v754_v47 = vadd.f32 %v753_v43, %v704_v45  ;;  %v2666_v48 = vpop.f32.mrb[33].mxu0  ;;  %v2673_v49 = vpop.f32.mrb[35].mxu1 }
 0x1fa   :  { %v707_v55 = vpop.f32.mrb[34].mxu0 }
 0x1fb   :  { %v2667_v50 = vpop.f32.mrb[35].mxu0 }
 0x1fe   :  { %v860_v51 = vpop.f32.mrb[36].mxu1 }
 0x1ff   :  { %v2684_v53 = vpop.f32.mrb[37].mxu1 }
 0x200   :  { %v806_v10 = vpop.f32.mrb[36].mxu0  ;;  %v863_v57 = vpop.f32.mrb[38].mxu1 }
 0x201   :  { %v812_v63 = vadd.f32 %v806_v10, %v754_v47  ;;  %v2678_v54 = vpop.f32.mrb[37].mxu0  ;;  %v2685_v56 = vpop.f32.mrb[39].mxu1 }
 0x202   :  { %v809_v58 = vpop.f32.mrb[38].mxu0 }
 0x203   :  { %v2679_v11 = vpop.f32.mrb[39].mxu0  ;;  %v866_v59 = vadd.f32 %v860_v51, %v812_v63 }
 0x206   :  { %v969_v60 = vpop.f32.mrb[40].mxu1 }
 0x207   :  { %v2696_v61 = vpop.f32.mrb[41].mxu1 }
 0x208   :  { %v914_v62 = vpop.f32.mrb[40].mxu0  ;;  %v972_v17 = vpop.f32.mrb[42].mxu1 }
 0x209   :  { %v920_v0 = vadd.f32 %v914_v62, %v866_v59  ;;  %v2690_v1 = vpop.f32.mrb[41].mxu0  ;;  %v2697_v2 = vpop.f32.mrb[43].mxu1 }
 0x20a   :  { %v917_v3 = vpop.f32.mrb[42].mxu0 }
 0x20b   :  { %v2691_v4 = vpop.f32.mrb[43].mxu0  ;;  %v975_v5 = vadd.f32 %v969_v60, %v920_v0 }
 0x20e   :  { %v1077_v6 = vpop.f32.mrb[44].mxu1 }
 0x20f   :  { %v2708_v7 = vpop.f32.mrb[45].mxu1 }
 0x210   :  { %v1023_v8 = vpop.f32.mrb[44].mxu0  ;;  %v1080_v9 = vpop.f32.mrb[46].mxu1 }
 0x211   :  { %v1029_v12 = vadd.f32 %v1023_v8, %v975_v5  ;;  %v2702_v13 = vpop.f32.mrb[45].mxu0  ;;  %v2709_v14 = vpop.f32.mrb[47].mxu1 }
 0x212   :  { %v1026_v15 = vpop.f32.mrb[46].mxu0 }
 0x213   :  { %v2703_v16 = vpop.f32.mrb[47].mxu0  ;;  %v1083_v18 = vadd.f32 %v1077_v6, %v1029_v12 }
 0x216   :  { %v1186_v19 = vpop.f32.mrb[48].mxu1 }
 0x217   :  { %v2720_v20 = vpop.f32.mrb[49].mxu1 }
 0x218   :  { %v1131_v32 = vpop.f32.mrb[48].mxu0  ;;  %v1189_v21 = vpop.f32.mrb[50].mxu1 }
 0x219   :  { %v1137_v22 = vadd.f32 %v1131_v32, %v1083_v18  ;;  %v2714_v23 = vpop.f32.mrb[49].mxu0  ;;  %v2721_v24 = vpop.f32.mrb[51].mxu1 }
 0x21a   :  { %v1134_v25 = vpop.f32.mrb[50].mxu0 }
 0x21b   :  { %v2715_v26 = vpop.f32.mrb[51].mxu0  ;;  %v1192_v27 = vadd.f32 %v1186_v19, %v1137_v22 }
 0x21e   :  { %v1294_v28 = vpop.f32.mrb[52].mxu1 }
 0x21f   :  { %v2732_v39 = vpop.f32.mrb[53].mxu1 }
 0x220   :  { %v1240_v29 = vpop.f32.mrb[52].mxu0  ;;  %v1297_v30 = vpop.f32.mrb[54].mxu1 }
 0x221   :  { %v1246_v31 = vadd.f32 %v1240_v29, %v1192_v27  ;;  %v2726_v33 = vpop.f32.mrb[53].mxu0  ;;  %v2733_v34 = vpop.f32.mrb[55].mxu1 }
 0x222   :  { %v1243_v35 = vpop.f32.mrb[54].mxu0 }
 0x223   :  { %v2727_v36 = vpop.f32.mrb[55].mxu0  ;;  %v1300_v37 = vadd.f32 %v1294_v28, %v1246_v31 }
 0x224   :  { %v2415_v36 = vld [vmem:[%s3540_s4] ss:$0 sm:$0xff] }
 0x226   :  { %v1403_v38 = vpop.f32.mrb[56].mxu1 }
 0x227   :  { %v2744_v40 = vpop.f32.mrb[57].mxu1 }
 0x228   :  { %v1348_v41 = vpop.f32.mrb[56].mxu0  ;;  %v1406_v42 = vpop.f32.mrb[58].mxu1 }
 0x229   :  { %v1354_v43 = vadd.f32 %v1348_v41, %v1300_v37  ;;  %v2738_v44 = vpop.f32.mrb[57].mxu0  ;;  %v2745_v45 = vpop.f32.mrb[59].mxu1 }
 0x22a   :  { %v1351_v46 = vpop.f32.mrb[58].mxu0  ;;  %v2953_v45 = vld [vmem:[%s3539_s7 + $0x30] sm:$0xff]  }
 0x22b   :  { %v2739_v47 = vpop.f32.mrb[59].mxu0  ;;  %v1409_v48 = vadd.f32 %v1403_v38, %v1354_v43  ;;  %2845 = vmatpush3.bf16.msra.mxu0 %v2953_v45  ;;  %v2954_v46 = vld [vmem:[%s3539_s7 + $0x38] sm:$0xff]  }
 0x22c   :  { %2846 = vmatprep.subr.bf16.mxu0 %v2955_v52  ;;  %v2416_v47 = vld [vmem:[%s3541_s6] ss:$0 sm:$0xff] }
 0x22d   :  { %v2425_v52 = vld [vmem:[%s3542_s8] ss:$0 sm:$0xff] }
 0x22e   :  { %v1511_v49 = vpop.f32.mrb[60].mxu1 }
 0x22f   :  { %v2756_v55 = vpop.f32.mrb[61].mxu1  ;;  %2847 = vmatpush3.bf16.msra.mxu0 %v2954_v46 }
 0x230   :  { %v1457_v50 = vpop.f32.mrb[60].mxu0  ;;  %v1514_v51 = vpop.f32.mrb[62].mxu1 }
 0x231   :  { %v1463_v53 = vadd.f32 %v1457_v50, %v1409_v48  ;;  %v2750_v10 = vpop.f32.mrb[61].mxu0  ;;  %v2757_v57 = vpop.f32.mrb[63].mxu1 }
 0x232   :  { %v1460_v63 = vpop.f32.mrb[62].mxu0 }
 0x233   :  { %v2751_v54 = vpop.f32.mrb[63].mxu0  ;;  %v1517_v56 = vadd.f32 %v1511_v49, %v1463_v53 }
 0x236   :  { %v1620_v58 = vpop.f32.mrb[64].mxu1 }
 0x237   :  { %v2768_v11 = vpop.f32.mrb[65].mxu1 }
 0x238   :  { %v1565_v59 = vpop.f32.mrb[64].mxu0  ;;  %v1623_v60 = vpop.f32.mrb[66].mxu1 }
 0x239   :  { %v1571_v61 = vadd.f32 %v1565_v59, %v1517_v56  ;;  %v2762_v62 = vpop.f32.mrb[65].mxu0  ;;  %v2769_v17 = vpop.f32.mrb[67].mxu1 }
 0x23a   :  { %v1568_v0 = vpop.f32.mrb[66].mxu0 }
 0x23b   :  { %v2763_v1 = vpop.f32.mrb[67].mxu0  ;;  %v1626_v2 = vadd.f32 %v1620_v58, %v1571_v61 }
 0x23e   :  { %v1728_v3 = vpop.f32.mrb[68].mxu1 }
 0x23f   :  { %v2780_v4 = vpop.f32.mrb[69].mxu1 }
 0x240   :  { %v1674_v5 = vpop.f32.mrb[68].mxu0  ;;  %v1731_v6 = vpop.f32.mrb[70].mxu1 }
 0x241   :  { %v1680_v7 = vadd.f32 %v1674_v5, %v1626_v2  ;;  %v2774_v8 = vpop.f32.mrb[69].mxu0  ;;  %v2781_v9 = vpop.f32.mrb[71].mxu1 }
 0x242   :  { %v1677_v12 = vpop.f32.mrb[70].mxu0 }
 0x243   :  { %v2775_v13 = vpop.f32.mrb[71].mxu0  ;;  %v1734_v14 = vadd.f32 %v1728_v3, %v1680_v7 }
 0x246   :  { %v1837_v15 = vpop.f32.mrb[72].mxu1 }
 0x247   :  { %v2792_v16 = vpop.f32.mrb[73].mxu1 }
 0x248   :  { %v1782_v18 = vpop.f32.mrb[72].mxu0  ;;  %v1840_v19 = vpop.f32.mrb[74].mxu1 }
 0x249   :  { %v1788_v20 = vadd.f32 %v1782_v18, %v1734_v14  ;;  %v2786_v32 = vpop.f32.mrb[73].mxu0  ;;  %v2793_v21 = vpop.f32.mrb[75].mxu1 }
 0x24a   :  { %v1785_v22 = vpop.f32.mrb[74].mxu0 }
 0x24b   :  { %v2787_v23 = vpop.f32.mrb[75].mxu0  ;;  %v1843_v24 = vadd.f32 %v1837_v15, %v1788_v20 }
 0x24e   :  { %v1945_v25 = vpop.f32.mrb[76].mxu1 }
 0x24f   :  { %v2804_v26 = vpop.f32.mrb[77].mxu1 }
 0x250   :  { %v1891_v27 = vpop.f32.mrb[76].mxu0  ;;  %v1948_v28 = vpop.f32.mrb[78].mxu1 }
 0x251   :  { %v1897_v39 = vadd.f32 %v1891_v27, %v1843_v24  ;;  %v2798_v29 = vpop.f32.mrb[77].mxu0  ;;  %v2805_v30 = vpop.f32.mrb[79].mxu1 }
 0x252   :  { %v1894_v31 = vpop.f32.mrb[78].mxu0 }
 0x253   :  { %v2799_v33 = vpop.f32.mrb[79].mxu0  ;;  %v1951_v34 = vadd.f32 %v1945_v25, %v1897_v39 }
 0x258   :  { %v1999_v35 = vpop.f32.mrb[80].mxu0 }
 0x259   :  { %v2005_v37 = vadd.f32 %v1999_v35, %v1951_v34  ;;  %v2810_v38 = vpop.f32.mrb[81].mxu0 }
 0x25a   :  { %v2002_v40 = vpop.f32.mrb[82].mxu0 }
 0x25b   :  { %v2013_v41 = vadd.f32 %v2415_v36, %v2005_v37  ;;  %v2811_v42 = vpop.f32.mrb[83].mxu0 }
 0x25d   :  { %v2014_v43 = vmax.f32 %v2013_v41, 0.0 }
 0x25f   :  { %v2015_v44 = vpack.c.bf16 %v2014_v43, %v2014_v43 }
 0x261   :  { %2829 = vmatmul.mubr.bf16.vlgmr.msra.gmra.mrb[80].mxu1 %v2015_v44 }
 0x334   :  { %v2121_v48 = vpop.f32.mrb[80].mxu1 }
 0x335   :  { %v2122_v49 = vadd.f32 %v2416_v47, %v2121_v48  ;;  %v2830_v55 = vpop.f32.mrb[81].mxu1 }
 0x336   :  { %v2124_v50 = vpop.f32.mrb[82].mxu1 }
 0x337   :  { %v2127_v51 = vmax.f32 %v2122_v49, 0.0  ;;  %v2831_v53 = vpop.f32.mrb[83].mxu1 }
 0x339   :  { %v2128_v10 = vpack.c.bf16 %v2127_v51, %v2127_v51 }
 0x33b   :  { %2849 = vmatmul.mubr.bf16.vlgmr.msra.gmra.mrb[84].mxu0 %v2128_v10 }
 0x40e   :  { %v2234_v57 = vpop.f32.mrb[84].mxu0 }
 0x40f   :  { %v2235_v63 = vadd.f32 %v2425_v52, %v2234_v57  ;;  %v2850_v54 = vpop.f32.mrb[85].mxu0 }
 0x410   :  { %v2237_v56 = vpop.f32.mrb[86].mxu0 }
 0x411   :  { %v2241_v58 = vsel %vm2240_vm2, %v2235_v63, 0.0  ;;  %v2851_v11 = vpop.f32.mrb[87].mxu0 }
 0x412   :  { %2242 = vst [vmem:[%s3543_s9] sm:$0xff] %v2241_v58 }

</bundles_post_ra>
